<compile_context>
chip_gen: v7x
topology: tpu7x:2x2x1
jax: 0.10.0
libtpu: 0.0.40
codegen_flags: <defaults>
</compile_context>

<pallas_src>
import functools

import jax
import jax.numpy as jnp
from jax.experimental import pallas as pl
from jax.experimental.pallas import tpu as pltpu


H = 128          # GRU hidden size (fixed by the reference module)
NUM_DIRS = 2     # bidirectional
NUM_LAYERS = 3


# ------------------------------- Pallas kernel ------------------------------ #

def _rnn_classifier_kernel(x_ref, wih_ref, whh_ref, bih_ref, bhh_ref,
                           fcw_ref, fcb_ref, o_ref,
                           act, xproj, *, bp, seq_len):
    """One grid step == one GRU layer (both directions). Grid axis is "arbitrary".

    x_ref   : (T*bp, 2H) bf16   input; channels 128:256 are zero padding
    wih_ref : (2H, 6H) bf16     [W_ih_fwd | W_ih_rev] (layer-0 rows 128: are zero)
    whh_ref : (2H, 6H) bf16     block-diagonal [W_hh_fwd ; W_hh_rev]
    bih_ref : (1, 6H) f32       [b_ih_fwd | b_ih_rev]
    bhh_ref : (1, 6H) f32       [b_hh_fwd | b_hh_rev]
    fcw_ref : (2H, 128) bf16    FC weight, columns >= nclass are zero
    fcb_ref : (1, 128) f32
    o_ref   : (T*bp, 128) f32   sigmoid(logits), padded to 128 classes
    act     : (T*bp, 2H) bf16 VMEM scratch — layer activations, updated in place
    xproj   : (T*bp, 6H) f32  VMEM scratch — both directions' input projections
    """
    layer = pl.program_id(0)

    @pl.when(layer == 0)
    def _():
        act[...] = x_ref[...]

    # Fused input projection (both directions, all timesteps) in one MXU matmul.
    xproj[...] = jnp.dot(act[...], wih_ref[...],
                         preferred_element_type=jnp.float32) + bih_ref[...]

    w_hh = whh_ref[...]                      # (2H, 6H) bf16 block-diagonal
    b_hh = bhh_ref[...]                      # (1, 6H)  f32

    h_f = jnp.zeros((bp, H), jnp.float32)
    h_r = jnp.zeros((bp, H), jnp.float32)

    def gru_cell(gx, gh, h):
        # Fused (r, z) sigmoid; n-gate tanh; h = n + z * (h - n).
        rz = jax.nn.sigmoid(gx[:, :2 * H] + gh[:, :2 * H])
        n = jnp.tanh(gx[:, 2 * H:] + rz[:, :H] * gh[:, 2 * H:])
        return n + rz[:, H:2 * H] * (h - n)

    # Short fixed-length recurrence, statically unrolled; forward and reverse
    # chains are interleaved so the scheduler can hide one chain's MXU/EUP
    # latency under the other.
    for i in range(seq_len):
        tf = i
        tr = seq_len - 1 - i
        h_cat = jnp.concatenate([h_f, h_r], axis=-1).astype(jnp.bfloat16)
        gh = jnp.dot(h_cat, w_hh, preferred_element_type=jnp.float32) + b_hh
        gx_f = xproj[pl.ds(tf * bp, bp), :3 * H]
        gx_r = xproj[pl.ds(tr * bp, bp), 3 * H:]
        h_f = gru_cell(gx_f, gh[:, :3 * H], h_f)
        h_r = gru_cell(gx_r, gh[:, 3 * H:], h_r)
        # In-place, lane-dense, sublane-aligned stores (act already fully consumed
        # by the xproj matmul above, so overwriting it is safe).
        act[pl.ds(tf * bp, bp), :H] = h_f.astype(jnp.bfloat16)
        act[pl.ds(tr * bp, bp), H:] = h_r.astype(jnp.bfloat16)

    # Classifier head only after the last GRU layer: one lane-dense matmul + sigmoid.
    @pl.when(layer == pl.num_programs(0) - 1)
    def _():
        logits = jnp.dot(act[...], fcw_ref[...],
                         preferred_element_type=jnp.float32) + fcb_ref[...]
        o_ref[...] = jax.nn.sigmoid(logits)


# ------------------------------ Pallas wrapper ------------------------------ #

def rnn_classifier_forward(x, kp, nclass):
    """x: (B, T, 128) -> (B, T, nclass), matching RnnClassifier.forward."""
    B, T, D = x.shape
    assert D == H, "GRU input size is fixed at 128 by the reference module"
    Bp = max(8, ((B + 7) // 8) * 8)                     # pad batch to full sublanes
    M = T * Bp
    num_layers = int(kp["wih"].shape[0])

    # Glue: (B, T, 128) -> (T, Bp, 256) bf16 with zero padding, flattened (M, 256).
    xt = jnp.transpose(x, (1, 0, 2)).astype(jnp.bfloat16)
    xp = jnp.zeros((T, Bp, 2 * H), jnp.bfloat16).at[:, :B, :H].set(xt)
    x2d = xp.reshape(M, 2 * H)

    kernel = functools.partial(_rnn_classifier_kernel, bp=Bp, seq_len=T)

    out = pl.pallas_call(
        kernel,
        out_shape=jax.ShapeDtypeStruct((M, H), jnp.float32),
        grid_spec=pltpu.PrefetchScalarGridSpec(
            num_scalar_prefetch=0,
            grid=(num_layers,),
            in_specs=[
                pl.BlockSpec((M, 2 * H), lambda l: (0, 0)),              # x (layer 0 only)
                pl.BlockSpec((None, 2 * H, 6 * H), lambda l: (l, 0, 0)),  # wih per layer
                pl.BlockSpec((None, 2 * H, 6 * H), lambda l: (l, 0, 0)),  # whh per layer
                pl.BlockSpec((None, 1, 6 * H), lambda l: (l, 0, 0)),      # bih per layer
                pl.BlockSpec((None, 1, 6 * H), lambda l: (l, 0, 0)),      # bhh per layer
                pl.BlockSpec((2 * H, H), lambda l: (0, 0)),               # fc_w (once)
                pl.BlockSpec((1, H), lambda l: (0, 0)),                   # fc_b (once)
            ],
            out_specs=pl.BlockSpec((M, H), lambda l: (0, 0)),
            scratch_shapes=[
                pltpu.VMEM((M, 2 * H), jnp.bfloat16),    # layer activations (in place)
                pltpu.VMEM((M, 6 * H), jnp.float32),     # fused input projections
            ],
        ),
        compiler_params=pltpu.CompilerParams(
            dimension_semantics=("arbitrary",),
            vmem_limit_bytes=32 * 1024 * 1024,
        ),
    )(x2d, kp["wih"], kp["whh"], kp["bih"], kp["bhh"], kp["fc_w"], kp["fc_b"])

    out = out.reshape(T, Bp, H)
    return jnp.transpose(out, (1, 0, 2))[:B, :, :nclass]


# ------------------------------- Parameters --------------------------------- #

def init_raw_params(key, nclass):
    """PyTorch-style GRU / Linear parameters (uniform(-1/sqrt(H), 1/sqrt(H)))."""
    k = 1.0 / (H ** 0.5)
    keys = iter(jax.random.split(key, NUM_LAYERS * NUM_DIRS * 4 + 2))
    layers = []
    for layer in range(NUM_LAYERS):
        din = H if layer == 0 else 2 * H
        dirs = []
        for _ in range(NUM_DIRS):
            dirs.append({
                "w_ih": jax.random.uniform(next(keys), (3 * H, din), jnp.float32, -k, k),
                "w_hh": jax.random.uniform(next(keys), (3 * H, H), jnp.float32, -k, k),
                "b_ih": jax.random.uniform(next(keys), (3 * H,), jnp.float32, -k, k),
                "b_hh": jax.random.uniform(next(keys), (3 * H,), jnp.float32, -k, k),
            })
        layers.append(dirs)
    fc_w = jax.random.uniform(next(keys), (nclass, 2 * H), jnp.float32, -k, k)
    fc_b = jax.random.uniform(next(keys), (nclass,), jnp.float32, -k, k)
    return {"layers": layers, "fc_w": fc_w, "fc_b": fc_b}


def pack_params(raw):
    """Transpose / pad / fuse raw params into the kernel layout (bf16 weights).

    Per layer:
      wih : (2H, 6H) = [W_ih_fwd^T | W_ih_rev^T]  (layer-0 rows 128:256 are zero)
      whh : (2H, 6H) block-diagonal: rows 0:H cols 0:3H = W_hh_fwd^T,
                                     rows H:2H cols 3H:6H = W_hh_rev^T
      bih/bhh : (1, 6H) = [b_fwd | b_rev]
    """
    nclass = raw["fc_w"].shape[0]
    assert nclass <= H
    wih, whh, bih, bhh = [], [], [], []
    for layer_dirs in raw["layers"]:
        wih_d, whh_d, bih_d, bhh_d = [], [], [], []
        for p in layer_dirs:
            w_ih_t = p["w_ih"].T                                  # (din, 3H)
            if w_ih_t.shape[0] < 2 * H:                           # layer 0: pad 128->256
                w_ih_t = jnp.pad(w_ih_t, ((0, 2 * H - w_ih_t.shape[0]), (0, 0)))
            wih_d.append(w_ih_t)
            whh_d.append(p["w_hh"].T)                             # (H, 3H)
            bih_d.append(p["b_ih"])
            bhh_d.append(p["b_hh"])
        wih.append(jnp.concatenate(wih_d, axis=1))                # (2H, 6H)
        whh_bd = jnp.zeros((2 * H, 6 * H), jnp.float32)
        whh_bd = whh_bd.at[:H, :3 * H].set(whh_d[0]).at[H:, 3 * H:].set(whh_d[1])
        whh.append(whh_bd)                                        # (2H, 6H)
        bih.append(jnp.concatenate(bih_d).reshape(1, 6 * H))
        bhh.append(jnp.concatenate(bhh_d).reshape(1, 6 * H))
    fc_w_t = jnp.pad(raw["fc_w"].T, ((0, 0), (0, H - nclass)))    # (2H, 128)
    fc_b = jnp.pad(raw["fc_b"], (0, H - nclass)).reshape(1, H)
    return {
        "wih": jnp.stack(wih).astype(jnp.bfloat16),   # (3, 256, 768)
        "whh": jnp.stack(whh).astype(jnp.bfloat16),   # (3, 256, 768)
        "bih": jnp.stack(bih).astype(jnp.float32),    # (3, 1, 768)
        "bhh": jnp.stack(bhh).astype(jnp.float32),    # (3, 1, 768)
        "fc_w": fc_w_t.astype(jnp.bfloat16),          # (256, 128)
        "fc_b": fc_b.astype(jnp.float32),             # (1, 128)
    }


# --------------------------- Pure-JAX reference ------------------------------ #

def _bf16_mm(a, b):
    return jnp.dot(a.astype(jnp.bfloat16), b.astype(jnp.bfloat16),
                   preferred_element_type=jnp.float32)


def reference_forward(x, raw, nclass):
    B, T, _ = x.shape
    inp = x.astype(jnp.float32)                                   # (B, T, 128)
    for layer_dirs in raw["layers"]:
        dir_outs = []
        for d, p in enumerate(layer_dirs):
            w_ih_t, w_hh_t = p["w_ih"].T, p["w_hh"].T
            b_ih, b_hh = p["b_ih"], p["b_hh"]
            h = jnp.zeros((B, H), jnp.float32)
            ys = [None] * T
            steps = range(T) if d == 0 else range(T - 1, -1, -1)
            for t in steps:
                gx = _bf16_mm(inp[:, t, :], w_ih_t) + b_ih
                gh = _bf16_mm(h, w_hh_t) + b_hh
                r = jax.nn.sigmoid(gx[:, :H] + gh[:, :H])
                z = jax.nn.sigmoid(gx[:, H:2 * H] + gh[:, H:2 * H])
                n = jnp.tanh(gx[:, 2 * H:] + r * gh[:, 2 * H:])
                h = (1.0 - z) * n + z * h
                ys[t] = h
            dir_outs.append(jnp.stack(ys, axis=1))                # (B, T, H)
        inp = jnp.concatenate(dir_outs, axis=-1)                  # (B, T, 2H)
    logits = _bf16_mm(inp.reshape(B * T, 2 * H), raw["fc_w"].T) + raw["fc_b"]
    return jax.nn.sigmoid(logits).reshape(B, T, nclass)


# ----------------------------------- Main ------------------------------------ #

if __name__ == "__main__":
    key = jax.random.PRNGKey(0)
    k_x, k_p = jax.random.split(key)

    B, T, NCLASS = 2, 8, 10
    x = jax.random.normal(k_x, (B, T, 128), jnp.float32)
    raw = init_raw_params(k_p, NCLASS)
    kp = pack_params(raw)

    fwd = jax.jit(rnn_classifier_forward, static_argnums=(2,))
    out = jax.block_until_ready(fwd(x, kp, NCLASS))

    assert out.shape == (B, T, NCLASS), out.shape
    assert bool(jnp.all(jnp.isfinite(out)))

    ref = reference_forward(x, raw, NCLASS)
    max_err = float(jnp.max(jnp.abs(out - ref)))
    assert max_err < 5e-2, f"kernel/reference mismatch: {max_err}"

    print("KERNEL_OK")
</pallas_src>

<mosaic_0001>
module attributes {stable_mosaic.version = 11 : i64} {
  func.func @_rnn_classifier_kernel(%arg0: i32, %arg1: memref<64x256xbf16, #tpu.memory_space<vmem>>, %arg2: memref<1x256x768xbf16, #tpu.memory_space<vmem>>, %arg3: memref<1x256x768xbf16, #tpu.memory_space<vmem>>, %arg4: memref<1x1x768xf32, #tpu.memory_space<vmem>>, %arg5: memref<1x1x768xf32, #tpu.memory_space<vmem>>, %arg6: memref<256x128xbf16, #tpu.memory_space<vmem>>, %arg7: memref<1x128xf32, #tpu.memory_space<vmem>>, %arg8: memref<64x128xf32, #tpu.memory_space<vmem>>, %arg9: memref<64x256xbf16, #tpu.memory_space<vmem>>, %arg10: memref<64x768xf32, #tpu.memory_space<vmem>>) attributes {dimension_semantics = [#tpu.dimension_semantics<arbitrary>], iteration_bounds = array<i64: 3>, scalar_prefetch = 0 : i64, scratch_operands = 2 : i64, tpu.core_type = #tpu.core_type<tc>, window_params = [{pipeline_mode = #tpu.pipeline_mode<synchronous>, transform_indices = @transform_0, window_bounds = array<i64: 64, 256>}, {transform_indices = @transform_1, window_bounds = array<i64: 1, 256, 768>}, {transform_indices = @transform_2, window_bounds = array<i64: 1, 256, 768>}, {transform_indices = @transform_3, window_bounds = array<i64: 1, 1, 768>}, {transform_indices = @transform_4, window_bounds = array<i64: 1, 1, 768>}, {pipeline_mode = #tpu.pipeline_mode<synchronous>, transform_indices = @transform_5, window_bounds = array<i64: 256, 128>}, {pipeline_mode = #tpu.pipeline_mode<synchronous>, transform_indices = @transform_6, window_bounds = array<i64: 1, 128>}, {pipeline_mode = #tpu.pipeline_mode<synchronous>, transform_indices = @transform_7, window_bounds = array<i64: 64, 128>}]} {
    %c0_i32 = arith.constant 0 : i32
    %0 = arith.cmpi eq, %arg0, %c0_i32 : i32
    %1 = arith.extui %0 : i1 to i32
    %c0_i32_0 = arith.constant 0 : i32
    %2 = arith.cmpi ne, %1, %c0_i32_0 : i32
    scf.if %2 {
      %c0_98 = arith.constant 0 : index
      %c0_99 = arith.constant 0 : index
      %413 = vector.load %arg1[%c0_98, %c0_99] : memref<64x256xbf16, #tpu.memory_space<vmem>>, vector<64x256xbf16>
      %c0_100 = arith.constant 0 : index
      %c0_101 = arith.constant 0 : index
      %414 = vector.load %arg9[%c0_100, %c0_101] : memref<64x256xbf16, #tpu.memory_space<vmem>>, vector<64x256xbf16>
      tpu.vector_store %arg9[%c0_100, %c0_101], %413 {strides = array<i32>} : memref<64x256xbf16, #tpu.memory_space<vmem>>, vector<64x256xbf16>,
    } else {
    }
    %c0 = arith.constant 0 : index
    %c0_1 = arith.constant 0 : index
    %3 = vector.load %arg9[%c0, %c0_1] : memref<64x256xbf16, #tpu.memory_space<vmem>>, vector<64x256xbf16>
    %c0_2 = arith.constant 0 : index
    %c0_3 = arith.constant 0 : index
    %c0_4 = arith.constant 0 : index
    %4 = vector.load %arg2[%c0_2, %c0_3, %c0_4] : memref<1x256x768xbf16, #tpu.memory_space<vmem>>, vector<1x256x768xbf16>
    %5 = vector.shape_cast %4 : vector<1x256x768xbf16> to vector<256x768xbf16>
    %cst = arith.constant dense<0.000000e+00> : vector<64x768xf32>
    %6 = tpu.matmul %3, %5, %cst {dimension_numbers = #tpu.dot_dimension_numbers<[1], [0], [0], [1], [0, 0, 1, 1], [], []>} : vector<64x256xbf16>, vector<256x768xbf16>, vector<64x768xf32> -> vector<64x768xf32>
    %c0_5 = arith.constant 0 : index
    %c0_6 = arith.constant 0 : index
    %c0_7 = arith.constant 0 : index
    %7 = vector.load %arg4[%c0_5, %c0_6, %c0_7] : memref<1x1x768xf32, #tpu.memory_space<vmem>>, vector<1x1x768xf32>
    %8 = vector.shape_cast %7 : vector<1x1x768xf32> to vector<1x768xf32>
    %9 = vector.broadcast %8 : vector<1x768xf32> to vector<64x768xf32>
    %10 = arith.addf %6, %9 : vector<64x768xf32>
    %c0_8 = arith.constant 0 : index
    %c0_9 = arith.constant 0 : index
    %11 = vector.load %arg10[%c0_8, %c0_9] : memref<64x768xf32, #tpu.memory_space<vmem>>, vector<64x768xf32>
    tpu.vector_store %arg10[%c0_8, %c0_9], %10 {strides = array<i32>} : memref<64x768xf32, #tpu.memory_space<vmem>>, vector<64x768xf32>,
    %c0_10 = arith.constant 0 : index
    %c0_11 = arith.constant 0 : index
    %c0_12 = arith.constant 0 : index
    %12 = vector.load %arg3[%c0_10, %c0_11, %c0_12] : memref<1x256x768xbf16, #tpu.memory_space<vmem>>, vector<1x256x768xbf16>
    %13 = vector.shape_cast %12 : vector<1x256x768xbf16> to vector<256x768xbf16>
    %c0_13 = arith.constant 0 : index
    %c0_14 = arith.constant 0 : index
    %c0_15 = arith.constant 0 : index
    %14 = vector.load %arg5[%c0_13, %c0_14, %c0_15] : memref<1x1x768xf32, #tpu.memory_space<vmem>>, vector<1x1x768xf32>
    %15 = vector.shape_cast %14 : vector<1x1x768xf32> to vector<1x768xf32>
    %cst_16 = arith.constant 0.000000e+00 : f32
    %16 = vector.broadcast %cst_16 : f32 to vector<8x128xf32>
    %cst_17 = arith.constant 0.000000e+00 : f32
    %17 = vector.broadcast %cst_17 : f32 to vector<8x128xf32>
    %18 = tpu.concatenate %16, %17 in 1 : vector<8x128xf32>, vector<8x128xf32> -> vector<8x256xf32>
    %19 = arith.truncf %18 : vector<8x256xf32> to vector<8x256xbf16>
    %cst_18 = arith.constant dense<0.000000e+00> : vector<8x768xf32>
    %20 = tpu.matmul %19, %13, %cst_18 {dimension_numbers = #tpu.dot_dimension_numbers<[1], [0], [0], [1], [0, 0, 1, 1], [], []>} : vector<8x256xbf16>, vector<256x768xbf16>, vector<8x768xf32> -> vector<8x768xf32>
    %21 = vector.broadcast %15 : vector<1x768xf32> to vector<8x768xf32>
    %22 = arith.addf %20, %21 : vector<8x768xf32>
    %c0_19 = arith.constant 0 : index
    %c0_20 = arith.constant 0 : index
    %23 = vector.load %arg10[%c0_19, %c0_20] : memref<64x768xf32, #tpu.memory_space<vmem>>, vector<8x384xf32>
    %c56 = arith.constant 56 : index
    %c384 = arith.constant 384 : index
    %24 = vector.load %arg10[%c56, %c384] : memref<64x768xf32, #tpu.memory_space<vmem>>, vector<8x384xf32>
    %25 = vector.extract_strided_slice %22 {offsets = [0, 0], sizes = [8, 384], strides = [1, 1]} : vector<8x768xf32> to vector<8x384xf32>
    %26 = vector.extract_strided_slice %23 {offsets = [0, 0], sizes = [8, 256], strides = [1, 1]} : vector<8x384xf32> to vector<8x256xf32>
    %27 = vector.extract_strided_slice %25 {offsets = [0, 0], sizes = [8, 256], strides = [1, 1]} : vector<8x384xf32> to vector<8x256xf32>
    %28 = arith.addf %26, %27 : vector<8x256xf32>
    %29 = arith.negf %28 : vector<8x256xf32>
    %30 = math.exp %29 : vector<8x256xf32>
    %cst_21 = arith.constant 1.000000e+00 : f32
    %31 = vector.broadcast %cst_21 : f32 to vector<8x256xf32>
    %32 = arith.addf %31, %30 : vector<8x256xf32>
    %33 = arith.divf %31, %32 : vector<8x256xf32>
    %34 = vector.extract_strided_slice %23 {offsets = [0, 256], sizes = [8, 128], strides = [1, 1]} : vector<8x384xf32> to vector<8x128xf32>
    %35 = vector.extract_strided_slice %33 {offsets = [0, 0], sizes = [8, 128], strides = [1, 1]} : vector<8x256xf32> to vector<8x128xf32>
    %36 = vector.extract_strided_slice %25 {offsets = [0, 256], sizes = [8, 128], strides = [1, 1]} : vector<8x384xf32> to vector<8x128xf32>
    %37 = arith.mulf %35, %36 : vector<8x128xf32>
    %38 = arith.addf %34, %37 : vector<8x128xf32>
    %39 = math.tanh %38 : vector<8x128xf32>
    %40 = vector.extract_strided_slice %33 {offsets = [0, 128], sizes = [8, 128], strides = [1, 1]} : vector<8x256xf32> to vector<8x128xf32>
    %41 = arith.subf %16, %39 : vector<8x128xf32>
    %42 = arith.mulf %40, %41 : vector<8x128xf32>
    %43 = arith.addf %39, %42 : vector<8x128xf32>
    %44 = vector.extract_strided_slice %22 {offsets = [0, 384], sizes = [8, 384], strides = [1, 1]} : vector<8x768xf32> to vector<8x384xf32>
    %45 = vector.extract_strided_slice %24 {offsets = [0, 0], sizes = [8, 256], strides = [1, 1]} : vector<8x384xf32> to vector<8x256xf32>
    %46 = vector.extract_strided_slice %44 {offsets = [0, 0], sizes = [8, 256], strides = [1, 1]} : vector<8x384xf32> to vector<8x256xf32>
    %47 = arith.addf %45, %46 : vector<8x256xf32>
    %48 = arith.negf %47 : vector<8x256xf32>
    %49 = math.exp %48 : vector<8x256xf32>
    %cst_22 = arith.constant 1.000000e+00 : f32
    %50 = vector.broadcast %cst_22 : f32 to vector<8x256xf32>
    %51 = arith.addf %50, %49 : vector<8x256xf32>
    %52 = arith.divf %50, %51 : vector<8x256xf32>
    %53 = vector.extract_strided_slice %24 {offsets = [0, 256], sizes = [8, 128], strides = [1, 1]} : vector<8x384xf32> to vector<8x128xf32>
    %54 = vector.extract_strided_slice %52 {offsets = [0, 0], sizes = [8, 128], strides = [1, 1]} : vector<8x256xf32> to vector<8x128xf32>
    %55 = vector.extract_strided_slice %44 {offsets = [0, 256], sizes = [8, 128], strides = [1, 1]} : vector<8x384xf32> to vector<8x128xf32>
    %56 = arith.mulf %54, %55 : vector<8x128xf32>
    %57 = arith.addf %53, %56 : vector<8x128xf32>
    %58 = math.tanh %57 : vector<8x128xf32>
    %59 = vector.extract_strided_slice %52 {offsets = [0, 128], sizes = [8, 128], strides = [1, 1]} : vector<8x256xf32> to vector<8x128xf32>
    %60 = arith.subf %17, %58 : vector<8x128xf32>
    %61 = arith.mulf %59, %60 : vector<8x128xf32>
    %62 = arith.addf %58, %61 : vector<8x128xf32>
    %63 = arith.truncf %43 : vector<8x128xf32> to vector<8x128xbf16>
    %c0_23 = arith.constant 0 : index
    %c0_24 = arith.constant 0 : index
    %64 = vector.load %arg9[%c0_23, %c0_24] : memref<64x256xbf16, #tpu.memory_space<vmem>>, vector<8x128xbf16>
    tpu.vector_store %arg9[%c0_23, %c0_24], %63 {strides = array<i32>} : memref<64x256xbf16, #tpu.memory_space<vmem>>, vector<8x128xbf16>,
    %65 = arith.truncf %62 : vector<8x128xf32> to vector<8x128xbf16>
    %c56_25 = arith.constant 56 : index
    %c128 = arith.constant 128 : index
    %66 = vector.load %arg9[%c56_25, %c128] : memref<64x256xbf16, #tpu.memory_space<vmem>>, vector<8x128xbf16>
    tpu.vector_store %arg9[%c56_25, %c128], %65 {strides = array<i32>} : memref<64x256xbf16, #tpu.memory_space<vmem>>, vector<8x128xbf16>,
    %67 = tpu.concatenate %43, %62 in 1 : vector<8x128xf32>, vector<8x128xf32> -> vector<8x256xf32>
    %68 = arith.truncf %67 : vector<8x256xf32> to vector<8x256xbf16>
    %cst_26 = arith.constant dense<0.000000e+00> : vector<8x768xf32>
    %69 = tpu.matmul %68, %13, %cst_26 {dimension_numbers = #tpu.dot_dimension_numbers<[1], [0], [0], [1], [0, 0, 1, 1], [], []>} : vector<8x256xbf16>, vector<256x768xbf16>, vector<8x768xf32> -> vector<8x768xf32>
    %70 = vector.broadcast %15 : vector<1x768xf32> to vector<8x768xf32>
    %71 = arith.addf %69, %70 : vector<8x768xf32>
    %c8 = arith.constant 8 : index
    %c0_27 = arith.constant 0 : index
    %72 = vector.load %arg10[%c8, %c0_27] : memref<64x768xf32, #tpu.memory_space<vmem>>, vector<8x384xf32>
    %c48 = arith.constant 48 : index
    %c384_28 = arith.constant 384 : index
    %73 = vector.load %arg10[%c48, %c384_28] : memref<64x768xf32, #tpu.memory_space<vmem>>, vector<8x384xf32>
    %74 = vector.extract_strided_slice %71 {offsets = [0, 0], sizes = [8, 384], strides = [1, 1]} : vector<8x768xf32> to vector<8x384xf32>
    %75 = vector.extract_strided_slice %72 {offsets = [0, 0], sizes = [8, 256], strides = [1, 1]} : vector<8x384xf32> to vector<8x256xf32>
    %76 = vector.extract_strided_slice %74 {offsets = [0, 0], sizes = [8, 256], strides = [1, 1]} : vector<8x384xf32> to vector<8x256xf32>
    %77 = arith.addf %75, %76 : vector<8x256xf32>
    %78 = arith.negf %77 : vector<8x256xf32>
    %79 = math.exp %78 : vector<8x256xf32>
    %cst_29 = arith.constant 1.000000e+00 : f32
    %80 = vector.broadcast %cst_29 : f32 to vector<8x256xf32>
    %81 = arith.addf %80, %79 : vector<8x256xf32>
    %82 = arith.divf %80, %81 : vector<8x256xf32>
    %83 = vector.extract_strided_slice %72 {offsets = [0, 256], sizes = [8, 128], strides = [1, 1]} : vector<8x384xf32> to vector<8x128xf32>
    %84 = vector.extract_strided_slice %82 {offsets = [0, 0], sizes = [8, 128], strides = [1, 1]} : vector<8x256xf32> to vector<8x128xf32>
    %85 = vector.extract_strided_slice %74 {offsets = [0, 256], sizes = [8, 128], strides = [1, 1]} : vector<8x384xf32> to vector<8x128xf32>
    %86 = arith.mulf %84, %85 : vector<8x128xf32>
    %87 = arith.addf %83, %86 : vector<8x128xf32>
    %88 = math.tanh %87 : vector<8x128xf32>
    %89 = vector.extract_strided_slice %82 {offsets = [0, 128], sizes = [8, 128], strides = [1, 1]} : vector<8x256xf32> to vector<8x128xf32>
    %90 = arith.subf %43, %88 : vector<8x128xf32>
    %91 = arith.mulf %89, %90 : vector<8x128xf32>
    %92 = arith.addf %88, %91 : vector<8x128xf32>
    %93 = vector.extract_strided_slice %71 {offsets = [0, 384], sizes = [8, 384], strides = [1, 1]} : vector<8x768xf32> to vector<8x384xf32>
    %94 = vector.extract_strided_slice %73 {offsets = [0, 0], sizes = [8, 256], strides = [1, 1]} : vector<8x384xf32> to vector<8x256xf32>
    %95 = vector.extract_strided_slice %93 {offsets = [0, 0], sizes = [8, 256], strides = [1, 1]} : vector<8x384xf32> to vector<8x256xf32>
    %96 = arith.addf %94, %95 : vector<8x256xf32>
    %97 = arith.negf %96 : vector<8x256xf32>
    %98 = math.exp %97 : vector<8x256xf32>
    %cst_30 = arith.constant 1.000000e+00 : f32
    %99 = vector.broadcast %cst_30 : f32 to vector<8x256xf32>
    %100 = arith.addf %99, %98 : vector<8x256xf32>
    %101 = arith.divf %99, %100 : vector<8x256xf32>
    %102 = vector.extract_strided_slice %73 {offsets = [0, 256], sizes = [8, 128], strides = [1, 1]} : vector<8x384xf32> to vector<8x128xf32>
    %103 = vector.extract_strided_slice %101 {offsets = [0, 0], sizes = [8, 128], strides = [1, 1]} : vector<8x256xf32> to vector<8x128xf32>
    %104 = vector.extract_strided_slice %93 {offsets = [0, 256], sizes = [8, 128], strides = [1, 1]} : vector<8x384xf32> to vector<8x128xf32>
    %105 = arith.mulf %103, %104 : vector<8x128xf32>
    %106 = arith.addf %102, %105 : vector<8x128xf32>
    %107 = math.tanh %106 : vector<8x128xf32>
    %108 = vector.extract_strided_slice %101 {offsets = [0, 128], sizes = [8, 128], strides = [1, 1]} : vector<8x256xf32> to vector<8x128xf32>
    %109 = arith.subf %62, %107 : vector<8x128xf32>
    %110 = arith.mulf %108, %109 : vector<8x128xf32>
    %111 = arith.addf %107, %110 : vector<8x128xf32>
    %112 = arith.truncf %92 : vector<8x128xf32> to vector<8x128xbf16>
    %c8_31 = arith.constant 8 : index
    %c0_32 = arith.constant 0 : index
    %113 = vector.load %arg9[%c8_31, %c0_32] : memref<64x256xbf16, #tpu.memory_space<vmem>>, vector<8x128xbf16>
    tpu.vector_store %arg9[%c8_31, %c0_32], %112 {strides = array<i32>} : memref<64x256xbf16, #tpu.memory_space<vmem>>, vector<8x128xbf16>,
    %114 = arith.truncf %111 : vector<8x128xf32> to vector<8x128xbf16>
    %c48_33 = arith.constant 48 : index
    %c128_34 = arith.constant 128 : index
    %115 = vector.load %arg9[%c48_33, %c128_34] : memref<64x256xbf16, #tpu.memory_space<vmem>>, vector<8x128xbf16>
    tpu.vector_store %arg9[%c48_33, %c128_34], %114 {strides = array<i32>} : memref<64x256xbf16, #tpu.memory_space<vmem>>, vector<8x128xbf16>,
    %116 = tpu.concatenate %92, %111 in 1 : vector<8x128xf32>, vector<8x128xf32> -> vector<8x256xf32>
    %117 = arith.truncf %116 : vector<8x256xf32> to vector<8x256xbf16>
    %cst_35 = arith.constant dense<0.000000e+00> : vector<8x768xf32>
    %118 = tpu.matmul %117, %13, %cst_35 {dimension_numbers = #tpu.dot_dimension_numbers<[1], [0], [0], [1], [0, 0, 1, 1], [], []>} : vector<8x256xbf16>, vector<256x768xbf16>, vector<8x768xf32> -> vector<8x768xf32>
    %119 = vector.broadcast %15 : vector<1x768xf32> to vector<8x768xf32>
    %120 = arith.addf %118, %119 : vector<8x768xf32>
    %c16 = arith.constant 16 : index
    %c0_36 = arith.constant 0 : index
    %121 = vector.load %arg10[%c16, %c0_36] : memref<64x768xf32, #tpu.memory_space<vmem>>, vector<8x384xf32>
    %c40 = arith.constant 40 : index
    %c384_37 = arith.constant 384 : index
    %122 = vector.load %arg10[%c40, %c384_37] : memref<64x768xf32, #tpu.memory_space<vmem>>, vector<8x384xf32>
    %123 = vector.extract_strided_slice %120 {offsets = [0, 0], sizes = [8, 384], strides = [1, 1]} : vector<8x768xf32> to vector<8x384xf32>
    %124 = vector.extract_strided_slice %121 {offsets = [0, 0], sizes = [8, 256], strides = [1, 1]} : vector<8x384xf32> to vector<8x256xf32>
    %125 = vector.extract_strided_slice %123 {offsets = [0, 0], sizes = [8, 256], strides = [1, 1]} : vector<8x384xf32> to vector<8x256xf32>
    %126 = arith.addf %124, %125 : vector<8x256xf32>
    %127 = arith.negf %126 : vector<8x256xf32>
    %128 = math.exp %127 : vector<8x256xf32>
    %cst_38 = arith.constant 1.000000e+00 : f32
    %129 = vector.broadcast %cst_38 : f32 to vector<8x256xf32>
    %130 = arith.addf %129, %128 : vector<8x256xf32>
    %131 = arith.divf %129, %130 : vector<8x256xf32>
    %132 = vector.extract_strided_slice %121 {offsets = [0, 256], sizes = [8, 128], strides = [1, 1]} : vector<8x384xf32> to vector<8x128xf32>
    %133 = vector.extract_strided_slice %131 {offsets = [0, 0], sizes = [8, 128], strides = [1, 1]} : vector<8x256xf32> to vector<8x128xf32>
    %134 = vector.extract_strided_slice %123 {offsets = [0, 256], sizes = [8, 128], strides = [1, 1]} : vector<8x384xf32> to vector<8x128xf32>
    %135 = arith.mulf %133, %134 : vector<8x128xf32>
    %136 = arith.addf %132, %135 : vector<8x128xf32>
    %137 = math.tanh %136 : vector<8x128xf32>
    %138 = vector.extract_strided_slice %131 {offsets = [0, 128], sizes = [8, 128], strides = [1, 1]} : vector<8x256xf32> to vector<8x128xf32>
    %139 = arith.subf %92, %137 : vector<8x128xf32>
    %140 = arith.mulf %138, %139 : vector<8x128xf32>
    %141 = arith.addf %137, %140 : vector<8x128xf32>
    %142 = vector.extract_strided_slice %120 {offsets = [0, 384], sizes = [8, 384], strides = [1, 1]} : vector<8x768xf32> to vector<8x384xf32>
    %143 = vector.extract_strided_slice %122 {offsets = [0, 0], sizes = [8, 256], strides = [1, 1]} : vector<8x384xf32> to vector<8x256xf32>
    %144 = vector.extract_strided_slice %142 {offsets = [0, 0], sizes = [8, 256], strides = [1, 1]} : vector<8x384xf32> to vector<8x256xf32>
    %145 = arith.addf %143, %144 : vector<8x256xf32>
    %146 = arith.negf %145 : vector<8x256xf32>
    %147 = math.exp %146 : vector<8x256xf32>
    %cst_39 = arith.constant 1.000000e+00 : f32
    %148 = vector.broadcast %cst_39 : f32 to vector<8x256xf32>
    %149 = arith.addf %148, %147 : vector<8x256xf32>
    %150 = arith.divf %148, %149 : vector<8x256xf32>
    %151 = vector.extract_strided_slice %122 {offsets = [0, 256], sizes = [8, 128], strides = [1, 1]} : vector<8x384xf32> to vector<8x128xf32>
    %152 = vector.extract_strided_slice %150 {offsets = [0, 0], sizes = [8, 128], strides = [1, 1]} : vector<8x256xf32> to vector<8x128xf32>
    %153 = vector.extract_strided_slice %142 {offsets = [0, 256], sizes = [8, 128], strides = [1, 1]} : vector<8x384xf32> to vector<8x128xf32>
    %154 = arith.mulf %152, %153 : vector<8x128xf32>
    %155 = arith.addf %151, %154 : vector<8x128xf32>
    %156 = math.tanh %155 : vector<8x128xf32>
    %157 = vector.extract_strided_slice %150 {offsets = [0, 128], sizes = [8, 128], strides = [1, 1]} : vector<8x256xf32> to vector<8x128xf32>
    %158 = arith.subf %111, %156 : vector<8x128xf32>
    %159 = arith.mulf %157, %158 : vector<8x128xf32>
    %160 = arith.addf %156, %159 : vector<8x128xf32>
    %161 = arith.truncf %141 : vector<8x128xf32> to vector<8x128xbf16>
    %c16_40 = arith.constant 16 : index
    %c0_41 = arith.constant 0 : index
    %162 = vector.load %arg9[%c16_40, %c0_41] : memref<64x256xbf16, #tpu.memory_space<vmem>>, vector<8x128xbf16>
    tpu.vector_store %arg9[%c16_40, %c0_41], %161 {strides = array<i32>} : memref<64x256xbf16, #tpu.memory_space<vmem>>, vector<8x128xbf16>,
    %163 = arith.truncf %160 : vector<8x128xf32> to vector<8x128xbf16>
    %c40_42 = arith.constant 40 : index
    %c128_43 = arith.constant 128 : index
    %164 = vector.load %arg9[%c40_42, %c128_43] : memref<64x256xbf16, #tpu.memory_space<vmem>>, vector<8x128xbf16>
    tpu.vector_store %arg9[%c40_42, %c128_43], %163 {strides = array<i32>} : memref<64x256xbf16, #tpu.memory_space<vmem>>, vector<8x128xbf16>,
    %165 = tpu.concatenate %141, %160 in 1 : vector<8x128xf32>, vector<8x128xf32> -> vector<8x256xf32>
    %166 = arith.truncf %165 : vector<8x256xf32> to vector<8x256xbf16>
    %cst_44 = arith.constant dense<0.000000e+00> : vector<8x768xf32>
    %167 = tpu.matmul %166, %13, %cst_44 {dimension_numbers = #tpu.dot_dimension_numbers<[1], [0], [0], [1], [0, 0, 1, 1], [], []>} : vector<8x256xbf16>, vector<256x768xbf16>, vector<8x768xf32> -> vector<8x768xf32>
    %168 = vector.broadcast %15 : vector<1x768xf32> to vector<8x768xf32>
    %169 = arith.addf %167, %168 : vector<8x768xf32>
    %c24 = arith.constant 24 : index
    %c0_45 = arith.constant 0 : index
    %170 = vector.load %arg10[%c24, %c0_45] : memref<64x768xf32, #tpu.memory_space<vmem>>, vector<8x384xf32>
    %c32 = arith.constant 32 : index
    %c384_46 = arith.constant 384 : index
    %171 = vector.load %arg10[%c32, %c384_46] : memref<64x768xf32, #tpu.memory_space<vmem>>, vector<8x384xf32>
    %172 = vector.extract_strided_slice %169 {offsets = [0, 0], sizes = [8, 384], strides = [1, 1]} : vector<8x768xf32> to vector<8x384xf32>
    %173 = vector.extract_strided_slice %170 {offsets = [0, 0], sizes = [8, 256], strides = [1, 1]} : vector<8x384xf32> to vector<8x256xf32>
    %174 = vector.extract_strided_slice %172 {offsets = [0, 0], sizes = [8, 256], strides = [1, 1]} : vector<8x384xf32> to vector<8x256xf32>
    %175 = arith.addf %173, %174 : vector<8x256xf32>
    %176 = arith.negf %175 : vector<8x256xf32>
    %177 = math.exp %176 : vector<8x256xf32>
    %cst_47 = arith.constant 1.000000e+00 : f32
    %178 = vector.broadcast %cst_47 : f32 to vector<8x256xf32>
    %179 = arith.addf %178, %177 : vector<8x256xf32>
    %180 = arith.divf %178, %179 : vector<8x256xf32>
    %181 = vector.extract_strided_slice %170 {offsets = [0, 256], sizes = [8, 128], strides = [1, 1]} : vector<8x384xf32> to vector<8x128xf32>
    %182 = vector.extract_strided_slice %180 {offsets = [0, 0], sizes = [8, 128], strides = [1, 1]} : vector<8x256xf32> to vector<8x128xf32>
    %183 = vector.extract_strided_slice %172 {offsets = [0, 256], sizes = [8, 128], strides = [1, 1]} : vector<8x384xf32> to vector<8x128xf32>
    %184 = arith.mulf %182, %183 : vector<8x128xf32>
    %185 = arith.addf %181, %184 : vector<8x128xf32>
    %186 = math.tanh %185 : vector<8x128xf32>
    %187 = vector.extract_strided_slice %180 {offsets = [0, 128], sizes = [8, 128], strides = [1, 1]} : vector<8x256xf32> to vector<8x128xf32>
    %188 = arith.subf %141, %186 : vector<8x128xf32>
    %189 = arith.mulf %187, %188 : vector<8x128xf32>
    %190 = arith.addf %186, %189 : vector<8x128xf32>
    %191 = vector.extract_strided_slice %169 {offsets = [0, 384], sizes = [8, 384], strides = [1, 1]} : vector<8x768xf32> to vector<8x384xf32>
    %192 = vector.extract_strided_slice %171 {offsets = [0, 0], sizes = [8, 256], strides = [1, 1]} : vector<8x384xf32> to vector<8x256xf32>
    %193 = vector.extract_strided_slice %191 {offsets = [0, 0], sizes = [8, 256], strides = [1, 1]} : vector<8x384xf32> to vector<8x256xf32>
    %194 = arith.addf %192, %193 : vector<8x256xf32>
    %195 = arith.negf %194 : vector<8x256xf32>
    %196 = math.exp %195 : vector<8x256xf32>
    %cst_48 = arith.constant 1.000000e+00 : f32
    %197 = vector.broadcast %cst_48 : f32 to vector<8x256xf32>
    %198 = arith.addf %197, %196 : vector<8x256xf32>
    %199 = arith.divf %197, %198 : vector<8x256xf32>
    %200 = vector.extract_strided_slice %171 {offsets = [0, 256], sizes = [8, 128], strides = [1, 1]} : vector<8x384xf32> to vector<8x128xf32>
    %201 = vector.extract_strided_slice %199 {offsets = [0, 0], sizes = [8, 128], strides = [1, 1]} : vector<8x256xf32> to vector<8x128xf32>
    %202 = vector.extract_strided_slice %191 {offsets = [0, 256], sizes = [8, 128], strides = [1, 1]} : vector<8x384xf32> to vector<8x128xf32>
    %203 = arith.mulf %201, %202 : vector<8x128xf32>
    %204 = arith.addf %200, %203 : vector<8x128xf32>
    %205 = math.tanh %204 : vector<8x128xf32>
    %206 = vector.extract_strided_slice %199 {offsets = [0, 128], sizes = [8, 128], strides = [1, 1]} : vector<8x256xf32> to vector<8x128xf32>
    %207 = arith.subf %160, %205 : vector<8x128xf32>
    %208 = arith.mulf %206, %207 : vector<8x128xf32>
    %209 = arith.addf %205, %208 : vector<8x128xf32>
    %210 = arith.truncf %190 : vector<8x128xf32> to vector<8x128xbf16>
    %c24_49 = arith.constant 24 : index
    %c0_50 = arith.constant 0 : index
    %211 = vector.load %arg9[%c24_49, %c0_50] : memref<64x256xbf16, #tpu.memory_space<vmem>>, vector<8x128xbf16>
    tpu.vector_store %arg9[%c24_49, %c0_50], %210 {strides = array<i32>} : memref<64x256xbf16, #tpu.memory_space<vmem>>, vector<8x128xbf16>,
    %212 = arith.truncf %209 : vector<8x128xf32> to vector<8x128xbf16>
    %c32_51 = arith.constant 32 : index
    %c128_52 = arith.constant 128 : index
    %213 = vector.load %arg9[%c32_51, %c128_52] : memref<64x256xbf16, #tpu.memory_space<vmem>>, vector<8x128xbf16>
    tpu.vector_store %arg9[%c32_51, %c128_52], %212 {strides = array<i32>} : memref<64x256xbf16, #tpu.memory_space<vmem>>, vector<8x128xbf16>,
    %214 = tpu.concatenate %190, %209 in 1 : vector<8x128xf32>, vector<8x128xf32> -> vector<8x256xf32>
    %215 = arith.truncf %214 : vector<8x256xf32> to vector<8x256xbf16>
    %cst_53 = arith.constant dense<0.000000e+00> : vector<8x768xf32>
    %216 = tpu.matmul %215, %13, %cst_53 {dimension_numbers = #tpu.dot_dimension_numbers<[1], [0], [0], [1], [0, 0, 1, 1], [], []>} : vector<8x256xbf16>, vector<256x768xbf16>, vector<8x768xf32> -> vector<8x768xf32>
    %217 = vector.broadcast %15 : vector<1x768xf32> to vector<8x768xf32>
    %218 = arith.addf %216, %217 : vector<8x768xf32>
    %c32_54 = arith.constant 32 : index
    %c0_55 = arith.constant 0 : index
    %219 = vector.load %arg10[%c32_54, %c0_55] : memref<64x768xf32, #tpu.memory_space<vmem>>, vector<8x384xf32>
    %c24_56 = arith.constant 24 : index
    %c384_57 = arith.constant 384 : index
    %220 = vector.load %arg10[%c24_56, %c384_57] : memref<64x768xf32, #tpu.memory_space<vmem>>, vector<8x384xf32>
    %221 = vector.extract_strided_slice %218 {offsets = [0, 0], sizes = [8, 384], strides = [1, 1]} : vector<8x768xf32> to vector<8x384xf32>
    %222 = vector.extract_strided_slice %219 {offsets = [0, 0], sizes = [8, 256], strides = [1, 1]} : vector<8x384xf32> to vector<8x256xf32>
    %223 = vector.extract_strided_slice %221 {offsets = [0, 0], sizes = [8, 256], strides = [1, 1]} : vector<8x384xf32> to vector<8x256xf32>
    %224 = arith.addf %222, %223 : vector<8x256xf32>
    %225 = arith.negf %224 : vector<8x256xf32>
    %226 = math.exp %225 : vector<8x256xf32>
    %cst_58 = arith.constant 1.000000e+00 : f32
    %227 = vector.broadcast %cst_58 : f32 to vector<8x256xf32>
    %228 = arith.addf %227, %226 : vector<8x256xf32>
    %229 = arith.divf %227, %228 : vector<8x256xf32>
    %230 = vector.extract_strided_slice %219 {offsets = [0, 256], sizes = [8, 128], strides = [1, 1]} : vector<8x384xf32> to vector<8x128xf32>
    %231 = vector.extract_strided_slice %229 {offsets = [0, 0], sizes = [8, 128], strides = [1, 1]} : vector<8x256xf32> to vector<8x128xf32>
    %232 = vector.extract_strided_slice %221 {offsets = [0, 256], sizes = [8, 128], strides = [1, 1]} : vector<8x384xf32> to vector<8x128xf32>
    %233 = arith.mulf %231, %232 : vector<8x128xf32>
    %234 = arith.addf %230, %233 : vector<8x128xf32>
    %235 = math.tanh %234 : vector<8x128xf32>
    %236 = vector.extract_strided_slice %229 {offsets = [0, 128], sizes = [8, 128], strides = [1, 1]} : vector<8x256xf32> to vector<8x128xf32>
    %237 = arith.subf %190, %235 : vector<8x128xf32>
    %238 = arith.mulf %236, %237 : vector<8x128xf32>
    %239 = arith.addf %235, %238 : vector<8x128xf32>
    %240 = vector.extract_strided_slice %218 {offsets = [0, 384], sizes = [8, 384], strides = [1, 1]} : vector<8x768xf32> to vector<8x384xf32>
    %241 = vector.extract_strided_slice %220 {offsets = [0, 0], sizes = [8, 256], strides = [1, 1]} : vector<8x384xf32> to vector<8x256xf32>
    %242 = vector.extract_strided_slice %240 {offsets = [0, 0], sizes = [8, 256], strides = [1, 1]} : vector<8x384xf32> to vector<8x256xf32>
    %243 = arith.addf %241, %242 : vector<8x256xf32>
    %244 = arith.negf %243 : vector<8x256xf32>
    %245 = math.exp %244 : vector<8x256xf32>
    %cst_59 = arith.constant 1.000000e+00 : f32
    %246 = vector.broadcast %cst_59 : f32 to vector<8x256xf32>
    %247 = arith.addf %246, %245 : vector<8x256xf32>
    %248 = arith.divf %246, %247 : vector<8x256xf32>
    %249 = vector.extract_strided_slice %220 {offsets = [0, 256], sizes = [8, 128], strides = [1, 1]} : vector<8x384xf32> to vector<8x128xf32>
    %250 = vector.extract_strided_slice %248 {offsets = [0, 0], sizes = [8, 128], strides = [1, 1]} : vector<8x256xf32> to vector<8x128xf32>
    %251 = vector.extract_strided_slice %240 {offsets = [0, 256], sizes = [8, 128], strides = [1, 1]} : vector<8x384xf32> to vector<8x128xf32>
    %252 = arith.mulf %250, %251 : vector<8x128xf32>
    %253 = arith.addf %249, %252 : vector<8x128xf32>
    %254 = math.tanh %253 : vector<8x128xf32>
    %255 = vector.extract_strided_slice %248 {offsets = [0, 128], sizes = [8, 128], strides = [1, 1]} : vector<8x256xf32> to vector<8x128xf32>
    %256 = arith.subf %209, %254 : vector<8x128xf32>
    %257 = arith.mulf %255, %256 : vector<8x128xf32>
    %258 = arith.addf %254, %257 : vector<8x128xf32>
    %259 = arith.truncf %239 : vector<8x128xf32> to vector<8x128xbf16>
    %c32_60 = arith.constant 32 : index
    %c0_61 = arith.constant 0 : index
    %260 = vector.load %arg9[%c32_60, %c0_61] : memref<64x256xbf16, #tpu.memory_space<vmem>>, vector<8x128xbf16>
    tpu.vector_store %arg9[%c32_60, %c0_61], %259 {strides = array<i32>} : memref<64x256xbf16, #tpu.memory_space<vmem>>, vector<8x128xbf16>,
    %261 = arith.truncf %258 : vector<8x128xf32> to vector<8x128xbf16>
    %c24_62 = arith.constant 24 : index
    %c128_63 = arith.constant 128 : index
    %262 = vector.load %arg9[%c24_62, %c128_63] : memref<64x256xbf16, #tpu.memory_space<vmem>>, vector<8x128xbf16>
    tpu.vector_store %arg9[%c24_62, %c128_63], %261 {strides = array<i32>} : memref<64x256xbf16, #tpu.memory_space<vmem>>, vector<8x128xbf16>,
    %263 = tpu.concatenate %239, %258 in 1 : vector<8x128xf32>, vector<8x128xf32> -> vector<8x256xf32>
    %264 = arith.truncf %263 : vector<8x256xf32> to vector<8x256xbf16>
    %cst_64 = arith.constant dense<0.000000e+00> : vector<8x768xf32>
    %265 = tpu.matmul %264, %13, %cst_64 {dimension_numbers = #tpu.dot_dimension_numbers<[1], [0], [0], [1], [0, 0, 1, 1], [], []>} : vector<8x256xbf16>, vector<256x768xbf16>, vector<8x768xf32> -> vector<8x768xf32>
    %266 = vector.broadcast %15 : vector<1x768xf32> to vector<8x768xf32>
    %267 = arith.addf %265, %266 : vector<8x768xf32>
    %c40_65 = arith.constant 40 : index
    %c0_66 = arith.constant 0 : index
    %268 = vector.load %arg10[%c40_65, %c0_66] : memref<64x768xf32, #tpu.memory_space<vmem>>, vector<8x384xf32>
    %c16_67 = arith.constant 16 : index
    %c384_68 = arith.constant 384 : index
    %269 = vector.load %arg10[%c16_67, %c384_68] : memref<64x768xf32, #tpu.memory_space<vmem>>, vector<8x384xf32>
    %270 = vector.extract_strided_slice %267 {offsets = [0, 0], sizes = [8, 384], strides = [1, 1]} : vector<8x768xf32> to vector<8x384xf32>
    %271 = vector.extract_strided_slice %268 {offsets = [0, 0], sizes = [8, 256], strides = [1, 1]} : vector<8x384xf32> to vector<8x256xf32>
    %272 = vector.extract_strided_slice %270 {offsets = [0, 0], sizes = [8, 256], strides = [1, 1]} : vector<8x384xf32> to vector<8x256xf32>
    %273 = arith.addf %271, %272 : vector<8x256xf32>
    %274 = arith.negf %273 : vector<8x256xf32>
    %275 = math.exp %274 : vector<8x256xf32>
    %cst_69 = arith.constant 1.000000e+00 : f32
    %276 = vector.broadcast %cst_69 : f32 to vector<8x256xf32>
    %277 = arith.addf %276, %275 : vector<8x256xf32>
    %278 = arith.divf %276, %277 : vector<8x256xf32>
    %279 = vector.extract_strided_slice %268 {offsets = [0, 256], sizes = [8, 128], strides = [1, 1]} : vector<8x384xf32> to vector<8x128xf32>
    %280 = vector.extract_strided_slice %278 {offsets = [0, 0], sizes = [8, 128], strides = [1, 1]} : vector<8x256xf32> to vector<8x128xf32>
    %281 = vector.extract_strided_slice %270 {offsets = [0, 256], sizes = [8, 128], strides = [1, 1]} : vector<8x384xf32> to vector<8x128xf32>
    %282 = arith.mulf %280, %281 : vector<8x128xf32>
    %283 = arith.addf %279, %282 : vector<8x128xf32>
    %284 = math.tanh %283 : vector<8x128xf32>
    %285 = vector.extract_strided_slice %278 {offsets = [0, 128], sizes = [8, 128], strides = [1, 1]} : vector<8x256xf32> to vector<8x128xf32>
    %286 = arith.subf %239, %284 : vector<8x128xf32>
    %287 = arith.mulf %285, %286 : vector<8x128xf32>
    %288 = arith.addf %284, %287 : vector<8x128xf32>
    %289 = vector.extract_strided_slice %267 {offsets = [0, 384], sizes = [8, 384], strides = [1, 1]} : vector<8x768xf32> to vector<8x384xf32>
    %290 = vector.extract_strided_slice %269 {offsets = [0, 0], sizes = [8, 256], strides = [1, 1]} : vector<8x384xf32> to vector<8x256xf32>
    %291 = vector.extract_strided_slice %289 {offsets = [0, 0], sizes = [8, 256], strides = [1, 1]} : vector<8x384xf32> to vector<8x256xf32>
    %292 = arith.addf %290, %291 : vector<8x256xf32>
    %293 = arith.negf %292 : vector<8x256xf32>
    %294 = math.exp %293 : vector<8x256xf32>
    %cst_70 = arith.constant 1.000000e+00 : f32
    %295 = vector.broadcast %cst_70 : f32 to vector<8x256xf32>
    %296 = arith.addf %295, %294 : vector<8x256xf32>
    %297 = arith.divf %295, %296 : vector<8x256xf32>
    %298 = vector.extract_strided_slice %269 {offsets = [0, 256], sizes = [8, 128], strides = [1, 1]} : vector<8x384xf32> to vector<8x128xf32>
    %299 = vector.extract_strided_slice %297 {offsets = [0, 0], sizes = [8, 128], strides = [1, 1]} : vector<8x256xf32> to vector<8x128xf32>
    %300 = vector.extract_strided_slice %289 {offsets = [0, 256], sizes = [8, 128], strides = [1, 1]} : vector<8x384xf32> to vector<8x128xf32>
    %301 = arith.mulf %299, %300 : vector<8x128xf32>
    %302 = arith.addf %298, %301 : vector<8x128xf32>
    %303 = math.tanh %302 : vector<8x128xf32>
    %304 = vector.extract_strided_slice %297 {offsets = [0, 128], sizes = [8, 128], strides = [1, 1]} : vector<8x256xf32> to vector<8x128xf32>
    %305 = arith.subf %258, %303 : vector<8x128xf32>
    %306 = arith.mulf %304, %305 : vector<8x128xf32>
    %307 = arith.addf %303, %306 : vector<8x128xf32>
    %308 = arith.truncf %288 : vector<8x128xf32> to vector<8x128xbf16>
    %c40_71 = arith.constant 40 : index
    %c0_72 = arith.constant 0 : index
    %309 = vector.load %arg9[%c40_71, %c0_72] : memref<64x256xbf16, #tpu.memory_space<vmem>>, vector<8x128xbf16>
    tpu.vector_store %arg9[%c40_71, %c0_72], %308 {strides = array<i32>} : memref<64x256xbf16, #tpu.memory_space<vmem>>, vector<8x128xbf16>,
    %310 = arith.truncf %307 : vector<8x128xf32> to vector<8x128xbf16>
    %c16_73 = arith.constant 16 : index
    %c128_74 = arith.constant 128 : index
    %311 = vector.load %arg9[%c16_73, %c128_74] : memref<64x256xbf16, #tpu.memory_space<vmem>>, vector<8x128xbf16>
    tpu.vector_store %arg9[%c16_73, %c128_74], %310 {strides = array<i32>} : memref<64x256xbf16, #tpu.memory_space<vmem>>, vector<8x128xbf16>,
    %312 = tpu.concatenate %288, %307 in 1 : vector<8x128xf32>, vector<8x128xf32> -> vector<8x256xf32>
    %313 = arith.truncf %312 : vector<8x256xf32> to vector<8x256xbf16>
    %cst_75 = arith.constant dense<0.000000e+00> : vector<8x768xf32>
    %314 = tpu.matmul %313, %13, %cst_75 {dimension_numbers = #tpu.dot_dimension_numbers<[1], [0], [0], [1], [0, 0, 1, 1], [], []>} : vector<8x256xbf16>, vector<256x768xbf16>, vector<8x768xf32> -> vector<8x768xf32>
    %315 = vector.broadcast %15 : vector<1x768xf32> to vector<8x768xf32>
    %316 = arith.addf %314, %315 : vector<8x768xf32>
    %c48_76 = arith.constant 48 : index
    %c0_77 = arith.constant 0 : index
    %317 = vector.load %arg10[%c48_76, %c0_77] : memref<64x768xf32, #tpu.memory_space<vmem>>, vector<8x384xf32>
    %c8_78 = arith.constant 8 : index
    %c384_79 = arith.constant 384 : index
    %318 = vector.load %arg10[%c8_78, %c384_79] : memref<64x768xf32, #tpu.memory_space<vmem>>, vector<8x384xf32>
    %319 = vector.extract_strided_slice %316 {offsets = [0, 0], sizes = [8, 384], strides = [1, 1]} : vector<8x768xf32> to vector<8x384xf32>
    %320 = vector.extract_strided_slice %317 {offsets = [0, 0], sizes = [8, 256], strides = [1, 1]} : vector<8x384xf32> to vector<8x256xf32>
    %321 = vector.extract_strided_slice %319 {offsets = [0, 0], sizes = [8, 256], strides = [1, 1]} : vector<8x384xf32> to vector<8x256xf32>
    %322 = arith.addf %320, %321 : vector<8x256xf32>
    %323 = arith.negf %322 : vector<8x256xf32>
    %324 = math.exp %323 : vector<8x256xf32>
    %cst_80 = arith.constant 1.000000e+00 : f32
    %325 = vector.broadcast %cst_80 : f32 to vector<8x256xf32>
    %326 = arith.addf %325, %324 : vector<8x256xf32>
    %327 = arith.divf %325, %326 : vector<8x256xf32>
    %328 = vector.extract_strided_slice %317 {offsets = [0, 256], sizes = [8, 128], strides = [1, 1]} : vector<8x384xf32> to vector<8x128xf32>
    %329 = vector.extract_strided_slice %327 {offsets = [0, 0], sizes = [8, 128], strides = [1, 1]} : vector<8x256xf32> to vector<8x128xf32>
    %330 = vector.extract_strided_slice %319 {offsets = [0, 256], sizes = [8, 128], strides = [1, 1]} : vector<8x384xf32> to vector<8x128xf32>
    %331 = arith.mulf %329, %330 : vector<8x128xf32>
    %332 = arith.addf %328, %331 : vector<8x128xf32>
    %333 = math.tanh %332 : vector<8x128xf32>
    %334 = vector.extract_strided_slice %327 {offsets = [0, 128], sizes = [8, 128], strides = [1, 1]} : vector<8x256xf32> to vector<8x128xf32>
    %335 = arith.subf %288, %333 : vector<8x128xf32>
    %336 = arith.mulf %334, %335 : vector<8x128xf32>
    %337 = arith.addf %333, %336 : vector<8x128xf32>
    %338 = vector.extract_strided_slice %316 {offsets = [0, 384], sizes = [8, 384], strides = [1, 1]} : vector<8x768xf32> to vector<8x384xf32>
    %339 = vector.extract_strided_slice %318 {offsets = [0, 0], sizes = [8, 256], strides = [1, 1]} : vector<8x384xf32> to vector<8x256xf32>
    %340 = vector.extract_strided_slice %338 {offsets = [0, 0], sizes = [8, 256], strides = [1, 1]} : vector<8x384xf32> to vector<8x256xf32>
    %341 = arith.addf %339, %340 : vector<8x256xf32>
    %342 = arith.negf %341 : vector<8x256xf32>
    %343 = math.exp %342 : vector<8x256xf32>
    %cst_81 = arith.constant 1.000000e+00 : f32
    %344 = vector.broadcast %cst_81 : f32 to vector<8x256xf32>
    %345 = arith.addf %344, %343 : vector<8x256xf32>
    %346 = arith.divf %344, %345 : vector<8x256xf32>
    %347 = vector.extract_strided_slice %318 {offsets = [0, 256], sizes = [8, 128], strides = [1, 1]} : vector<8x384xf32> to vector<8x128xf32>
    %348 = vector.extract_strided_slice %346 {offsets = [0, 0], sizes = [8, 128], strides = [1, 1]} : vector<8x256xf32> to vector<8x128xf32>
    %349 = vector.extract_strided_slice %338 {offsets = [0, 256], sizes = [8, 128], strides = [1, 1]} : vector<8x384xf32> to vector<8x128xf32>
    %350 = arith.mulf %348, %349 : vector<8x128xf32>
    %351 = arith.addf %347, %350 : vector<8x128xf32>
    %352 = math.tanh %351 : vector<8x128xf32>
    %353 = vector.extract_strided_slice %346 {offsets = [0, 128], sizes = [8, 128], strides = [1, 1]} : vector<8x256xf32> to vector<8x128xf32>
    %354 = arith.subf %307, %352 : vector<8x128xf32>
    %355 = arith.mulf %353, %354 : vector<8x128xf32>
    %356 = arith.addf %352, %355 : vector<8x128xf32>
    %357 = arith.truncf %337 : vector<8x128xf32> to vector<8x128xbf16>
    %c48_82 = arith.constant 48 : index
    %c0_83 = arith.constant 0 : index
    %358 = vector.load %arg9[%c48_82, %c0_83] : memref<64x256xbf16, #tpu.memory_space<vmem>>, vector<8x128xbf16>
    tpu.vector_store %arg9[%c48_82, %c0_83], %357 {strides = array<i32>} : memref<64x256xbf16, #tpu.memory_space<vmem>>, vector<8x128xbf16>,
    %359 = arith.truncf %356 : vector<8x128xf32> to vector<8x128xbf16>
    %c8_84 = arith.constant 8 : index
    %c128_85 = arith.constant 128 : index
    %360 = vector.load %arg9[%c8_84, %c128_85] : memref<64x256xbf16, #tpu.memory_space<vmem>>, vector<8x128xbf16>
    tpu.vector_store %arg9[%c8_84, %c128_85], %359 {strides = array<i32>} : memref<64x256xbf16, #tpu.memory_space<vmem>>, vector<8x128xbf16>,
    %361 = tpu.concatenate %337, %356 in 1 : vector<8x128xf32>, vector<8x128xf32> -> vector<8x256xf32>
    %362 = arith.truncf %361 : vector<8x256xf32> to vector<8x256xbf16>
    %cst_86 = arith.constant dense<0.000000e+00> : vector<8x768xf32>
    %363 = tpu.matmul %362, %13, %cst_86 {dimension_numbers = #tpu.dot_dimension_numbers<[1], [0], [0], [1], [0, 0, 1, 1], [], []>} : vector<8x256xbf16>, vector<256x768xbf16>, vector<8x768xf32> -> vector<8x768xf32>
    %364 = vector.broadcast %15 : vector<1x768xf32> to vector<8x768xf32>
    %365 = arith.addf %363, %364 : vector<8x768xf32>
    %c56_87 = arith.constant 56 : index
    %c0_88 = arith.constant 0 : index
    %366 = vector.load %arg10[%c56_87, %c0_88] : memref<64x768xf32, #tpu.memory_space<vmem>>, vector<8x384xf32>
    %c0_89 = arith.constant 0 : index
    %c384_90 = arith.constant 384 : index
    %367 = vector.load %arg10[%c0_89, %c384_90] : memref<64x768xf32, #tpu.memory_space<vmem>>, vector<8x384xf32>
    %368 = vector.extract_strided_slice %365 {offsets = [0, 0], sizes = [8, 384], strides = [1, 1]} : vector<8x768xf32> to vector<8x384xf32>
    %369 = vector.extract_strided_slice %366 {offsets = [0, 0], sizes = [8, 256], strides = [1, 1]} : vector<8x384xf32> to vector<8x256xf32>
    %370 = vector.extract_strided_slice %368 {offsets = [0, 0], sizes = [8, 256], strides = [1, 1]} : vector<8x384xf32> to vector<8x256xf32>
    %371 = arith.addf %369, %370 : vector<8x256xf32>
    %372 = arith.negf %371 : vector<8x256xf32>
    %373 = math.exp %372 : vector<8x256xf32>
    %cst_91 = arith.constant 1.000000e+00 : f32
    %374 = vector.broadcast %cst_91 : f32 to vector<8x256xf32>
    %375 = arith.addf %374, %373 : vector<8x256xf32>
    %376 = arith.divf %374, %375 : vector<8x256xf32>
    %377 = vector.extract_strided_slice %366 {offsets = [0, 256], sizes = [8, 128], strides = [1, 1]} : vector<8x384xf32> to vector<8x128xf32>
    %378 = vector.extract_strided_slice %376 {offsets = [0, 0], sizes = [8, 128], strides = [1, 1]} : vector<8x256xf32> to vector<8x128xf32>
    %379 = vector.extract_strided_slice %368 {offsets = [0, 256], sizes = [8, 128], strides = [1, 1]} : vector<8x384xf32> to vector<8x128xf32>
    %380 = arith.mulf %378, %379 : vector<8x128xf32>
    %381 = arith.addf %377, %380 : vector<8x128xf32>
    %382 = math.tanh %381 : vector<8x128xf32>
    %383 = vector.extract_strided_slice %376 {offsets = [0, 128], sizes = [8, 128], strides = [1, 1]} : vector<8x256xf32> to vector<8x128xf32>
    %384 = arith.subf %337, %382 : vector<8x128xf32>
    %385 = arith.mulf %383, %384 : vector<8x128xf32>
    %386 = arith.addf %382, %385 : vector<8x128xf32>
    %387 = vector.extract_strided_slice %365 {offsets = [0, 384], sizes = [8, 384], strides = [1, 1]} : vector<8x768xf32> to vector<8x384xf32>
    %388 = vector.extract_strided_slice %367 {offsets = [0, 0], sizes = [8, 256], strides = [1, 1]} : vector<8x384xf32> to vector<8x256xf32>
    %389 = vector.extract_strided_slice %387 {offsets = [0, 0], sizes = [8, 256], strides = [1, 1]} : vector<8x384xf32> to vector<8x256xf32>
    %390 = arith.addf %388, %389 : vector<8x256xf32>
    %391 = arith.negf %390 : vector<8x256xf32>
    %392 = math.exp %391 : vector<8x256xf32>
    %cst_92 = arith.constant 1.000000e+00 : f32
    %393 = vector.broadcast %cst_92 : f32 to vector<8x256xf32>
    %394 = arith.addf %393, %392 : vector<8x256xf32>
    %395 = arith.divf %393, %394 : vector<8x256xf32>
    %396 = vector.extract_strided_slice %367 {offsets = [0, 256], sizes = [8, 128], strides = [1, 1]} : vector<8x384xf32> to vector<8x128xf32>
    %397 = vector.extract_strided_slice %395 {offsets = [0, 0], sizes = [8, 128], strides = [1, 1]} : vector<8x256xf32> to vector<8x128xf32>
    %398 = vector.extract_strided_slice %387 {offsets = [0, 256], sizes = [8, 128], strides = [1, 1]} : vector<8x384xf32> to vector<8x128xf32>
    %399 = arith.mulf %397, %398 : vector<8x128xf32>
    %400 = arith.addf %396, %399 : vector<8x128xf32>
    %401 = math.tanh %400 : vector<8x128xf32>
    %402 = vector.extract_strided_slice %395 {offsets = [0, 128], sizes = [8, 128], strides = [1, 1]} : vector<8x256xf32> to vector<8x128xf32>
    %403 = arith.subf %356, %401 : vector<8x128xf32>
    %404 = arith.mulf %402, %403 : vector<8x128xf32>
    %405 = arith.addf %401, %404 : vector<8x128xf32>
    %406 = arith.truncf %386 : vector<8x128xf32> to vector<8x128xbf16>
    %c56_93 = arith.constant 56 : index
    %c0_94 = arith.constant 0 : index
    %407 = vector.load %arg9[%c56_93, %c0_94] : memref<64x256xbf16, #tpu.memory_space<vmem>>, vector<8x128xbf16>
    tpu.vector_store %arg9[%c56_93, %c0_94], %406 {strides = array<i32>} : memref<64x256xbf16, #tpu.memory_space<vmem>>, vector<8x128xbf16>,
    %408 = arith.truncf %405 : vector<8x128xf32> to vector<8x128xbf16>
    %c0_95 = arith.constant 0 : index
    %c128_96 = arith.constant 128 : index
    %409 = vector.load %arg9[%c0_95, %c128_96] : memref<64x256xbf16, #tpu.memory_space<vmem>>, vector<8x128xbf16>
    tpu.vector_store %arg9[%c0_95, %c128_96], %408 {strides = array<i32>} : memref<64x256xbf16, #tpu.memory_space<vmem>>, vector<8x128xbf16>,
    %c2_i32 = arith.constant 2 : i32
    %410 = arith.cmpi eq, %arg0, %c2_i32 : i32
    %411 = arith.extui %410 : i1 to i32
    %c0_i32_97 = arith.constant 0 : i32
    %412 = arith.cmpi ne, %411, %c0_i32_97 : i32
    scf.if %412 {
      %c0_98 = arith.constant 0 : index
      %c0_99 = arith.constant 0 : index
      %413 = vector.load %arg9[%c0_98, %c0_99] : memref<64x256xbf16, #tpu.memory_space<vmem>>, vector<64x256xbf16>
      %c0_100 = arith.constant 0 : index
      %c0_101 = arith.constant 0 : index
      %414 = vector.load %arg6[%c0_100, %c0_101] : memref<256x128xbf16, #tpu.memory_space<vmem>>, vector<256x128xbf16>
      %cst_102 = arith.constant dense<0.000000e+00> : vector<64x128xf32>
      %415 = tpu.matmul %413, %414, %cst_102 {dimension_numbers = #tpu.dot_dimension_numbers<[1], [0], [0], [1], [0, 0, 1, 1], [], []>} : vector<64x256xbf16>, vector<256x128xbf16>, vector<64x128xf32> -> vector<64x128xf32>
      %c0_103 = arith.constant 0 : index
      %c0_104 = arith.constant 0 : index
      %416 = vector.load %arg7[%c0_103, %c0_104] : memref<1x128xf32, #tpu.memory_space<vmem>>, vector<1x128xf32>
      %417 = vector.broadcast %416 : vector<1x128xf32> to vector<64x128xf32>
      %418 = arith.addf %415, %417 : vector<64x128xf32>
      %419 = arith.negf %418 : vector<64x128xf32>
      %420 = math.exp %419 : vector<64x128xf32>
      %cst_105 = arith.constant 1.000000e+00 : f32
      %421 = vector.broadcast %cst_105 : f32 to vector<64x128xf32>
      %422 = arith.addf %421, %420 : vector<64x128xf32>
      %423 = arith.divf %421, %422 : vector<64x128xf32>
      %c0_106 = arith.constant 0 : index
      %c0_107 = arith.constant 0 : index
      %424 = vector.load %arg8[%c0_106, %c0_107] : memref<64x128xf32, #tpu.memory_space<vmem>>, vector<64x128xf32>
      tpu.vector_store %arg8[%c0_106, %c0_107], %423 {strides = array<i32>} : memref<64x128xf32, #tpu.memory_space<vmem>>, vector<64x128xf32>,
    } else {
    }
    return
  }
  func.func @transform_0(%arg0: i32) -> (i32, i32) {
    %c0_i32 = arith.constant 0 : i32
    %c0_i32_0 = arith.constant 0 : i32
    %c0_i32_1 = arith.constant 0 : i32
    return %c0_i32, %c0_i32_0 : i32, i32
  }
  func.func @transform_1(%arg0: i32) -> (i32, i32, i32) {
    %c0_i32 = arith.constant 0 : i32
    %c0_i32_0 = arith.constant 0 : i32
    %c0_i32_1 = arith.constant 0 : i32
    return %arg0, %c0_i32, %c0_i32_0 : i32, i32, i32
  }
  func.func @transform_2(%arg0: i32) -> (i32, i32, i32) {
    %c0_i32 = arith.constant 0 : i32
    %c0_i32_0 = arith.constant 0 : i32
    %c0_i32_1 = arith.constant 0 : i32
    return %arg0, %c0_i32, %c0_i32_0 : i32, i32, i32
  }
  func.func @transform_3(%arg0: i32) -> (i32, i32, i32) {
    %c0_i32 = arith.constant 0 : i32
    %c0_i32_0 = arith.constant 0 : i32
    %c0_i32_1 = arith.constant 0 : i32
    return %arg0, %c0_i32, %c0_i32_0 : i32, i32, i32
  }
  func.func @transform_4(%arg0: i32) -> (i32, i32, i32) {
    %c0_i32 = arith.constant 0 : i32
    %c0_i32_0 = arith.constant 0 : i32
    %c0_i32_1 = arith.constant 0 : i32
    return %arg0, %c0_i32, %c0_i32_0 : i32, i32, i32
  }
  func.func @transform_5(%arg0: i32) -> (i32, i32) {
    %c0_i32 = arith.constant 0 : i32
    %c0_i32_0 = arith.constant 0 : i32
    %c0_i32_1 = arith.constant 0 : i32
    return %c0_i32, %c0_i32_0 : i32, i32
  }
  func.func @transform_6(%arg0: i32) -> (i32, i32) {
    %c0_i32 = arith.constant 0 : i32
    %c0_i32_0 = arith.constant 0 : i32
    %c0_i32_1 = arith.constant 0 : i32
    return %c0_i32, %c0_i32_0 : i32, i32
  }
  func.func @transform_7(%arg0: i32) -> (i32, i32) {
    %c0_i32 = arith.constant 0 : i32
    %c0_i32_0 = arith.constant 0 : i32
    %c0_i32_1 = arith.constant 0 : i32
    return %c0_i32, %c0_i32_0 : i32, i32
  }
}

</mosaic_0001>

<bundles_post_ra>
// kernel: rnn_classifier_forward.1
= control target key start
LH: loop header
LB: loop body
LE: loop exit
PB: predicated region body
PF: predicated region fallthrough
CT: control target
= control target key end

     0   :  { %s7547_s0 = inlined_call_operand.vmem [shape: bf16[64,256], index: 0, kind: input, shape index: {}]   ;;  %s7548_s1 = inlined_call_operand.hbm [shape: bf16[3,256,768], index: 1, kind: input, shape index: {}]   ;;  %s7549_s2 = inlined_call_operand.hbm [shape: bf16[3,256,768], index: 2, kind: input, shape index: {}]   ;;  %s7550_s3 = inlined_call_operand.hbm [shape: f32[3,1,768], index: 3, kind: input, shape index: {}]   ;;  %s7551_s4 = inlined_call_operand.hbm [shape: f32[3,1,768], index: 4, kind: input, shape index: {}]   ;;  %s7552_s5 = inlined_call_operand.hbm [shape: bf16[256,128], index: 5, kind: input, shape index: {}]   ;;  %s7553_s6 = inlined_call_operand.hbm [shape: f32[1,128], index: 6, kind: input, shape index: {}]   ;;  %s7554_s7 = inlined_call_operand.vmem [shape: f32[64,128], index: 7, kind: output, shape index: {}]  }
   0x1   :  { %7766 = sst [smem:[#allocation110_spill]] %s7549_s2 }
   0x2   :  { %7767 = sst [smem:[#allocation111_spill]] %s7552_s5 }
   0x3   :  { %12 = vsyncpa [#allocation5], 0 }
   0x4   :  { %14 = vsyncpa [#allocation5 + $0x1], 0 }
   0x5   :  { %15 = vsyncpa [#allocation7], 0 }
   0x6   :  { %17 = vsyncpa [#allocation7 + $0x1], 0 }
   0x7   :  { %18 = vsyncpa [#allocation10], 0 }
   0x8   :  { %20 = vsyncpa [#allocation10 + $0x1], 0 }
   0x9   :  { %21 = vsyncpa [#allocation13], 0  ;;  %s5175_s24 = smov 0   ;;  %s5177_s25 = smov 0  }
   0xa   :  { %s5179_s26 = smov 0   ;;  %s5181_s27 = smov 0  }
   0xb LB: > { %s5194_s28 = sadd.s32 4294967295, %s5122_s27   ;;  %s5197_s29 = sadd.s32 1, %s5122_s27   ;;  %s5122_s27 = sphi %s5181_s27, %s8201_s27   ;;  %s5118_s26 = sphi %s5179_s26, %s8200_s26   ;;  %s5114_s25 = sphi %s5177_s25, %s8199_s25   ;;  %s5110_s24 = sphi %s5175_s24, %s8198_s24  }
   0xc   : > { %s52_s30 = ssub.s32 %s5122_s27, %s5197_s29  ;;  %s55_s8 = sadd.s32 1, %s5118_s26 }
   0xd   : > { %p53_p0 = scmp.eq.s32.totalorder %s52_s30, 0  ;;  %p62_p1 = scmp.ne.s32.totalorder %s5118_s26, %s5114_s25 }
   0xe   : > { %p63_p2 = scmp.eq.s32.totalorder %s5122_s27, 0  ;;  %p68_p3 = scmp.ne.s32.totalorder %s5114_s25, %s5110_s24 }
   0xf   : > { %s5207_s9 = scalar_select %p53_p0, %s5118_s26, %s55_s8  }
  0x10   : > { %p5209_p4 = por %p63_p2, %p62_p1  ;;  %p7555_p5 = scmp.eq.s32.totalorder %s5194_s28, 0 }
  0x11   : > { %p3778_p6 = scmp.ge.s32.totalorder %s5122_s27, 1  ;;  %p220_p7 = scmp.lt.s32.totalorder %s5122_s27, 4 }
  0x12   : > { %s7768_s10 = scalar_select %p5209_p4, 1, 0 }
  0x13   : > { %p5218_p8 = por %p7555_p5, %p68_p3  ;;  %p5223_p10 = pnand %p3778_p6, %p220_p7 }
  0x14   : > { %s5124_s13 = smov [#allocation11]   ;;  %s5237_s16 = sand.u32 1, %s5118_s26  }
  0x15   : > { %s7769_s11 = scalar_select %p5218_p8, 1, 0 }
  0x16   : > { %s7770_s12 = scalar_select %p5223_p10, 1, 0 }
  0x17   : > { %s235_s14 = sshll.u32 %s5124_s13, 4  ;;  %p4132_p11 = pneg %p5223_p10  ;;  %s236_s14 = int_to_ptr.vmem [resolvable:$true] %s235_s14 }
  0x18   : > { %s7559_s17 = smul.u32 12288, %s5122_s27  ;;  %s7772_s5 = sld [smem:[#allocation111_spill]] }
  0x19   : > { %p5231_p12 = pnand %p4132_p11, %p7555_p5  ;;  %s7558_s18 = smul.u32 768, %s5237_s16 }
  0x1b   : > { %s7771_s15 = scalar_select %p5231_p12, 1, 0 }
  0x1c   : > { %p7561_p1 = pneg %p5231_p12 }
  0x1e   : > { %s4896_s21 = scalar_lea.hbm %s7772_s5, 2048 }
  0x1f   : > { %p4897_p0 = scmp.ne.s32.totalorder %s7772_s5, %s4896_s21  ;;  %p4903_p6 = scmp.lt.u32.totalorder %s4896_s21, %s7772_s5 }
  0x21   : > { %p4899_p2 = pnand %p7561_p1, %p4897_p0 }
  0x23   : > { %p4900_p3 = pneg %p4899_p2 }
  0x25   : > { %p4905_p7 = pnand %p4903_p6, %p4900_p3 }
  0x27   : > { %4908 = shalt.err (!%p4905_p7)
}
  0x28   : > { %s4909_s8 = scalar_lea.vmem %s236_s14, 2048  ;;  %p4917_p13 = scmp.lt.s32.totalorder %s236_s14, %s236_s14 }
  0x29   : > { %p4910_p11 = scmp.ne.s32.totalorder %s236_s14, %s4909_s8  ;;  %p4918_p8 = scmp.lt.s32.totalorder %s4909_s8, %s4909_s8 }
  0x2b   : > { %p4912_p9 = pnand %p4910_p11, %p7561_p1  ;;  %p4919_p10 = por %p4918_p8, %p4917_p13 }
  0x2d   : > { %p4913_p5 = pneg %p4912_p9 }
  0x2f   : > { %p4920_p4 = pnand %p4919_p10, %p4913_p5 }
  0x31   : > { %4923 = shalt.err (!%p4920_p4)
}
  0x32   : > { %s5125_s13 = smov 64   ;;  %s5126_s19 = smov 4  }
  0x33   : > { %4135 = dma.hbm_to_vmem [thread:$0]  (!%p5231_p12), %s7772_s5, 2048, %s236_s14, [#allocation10], %s5125_s13, %s5125_s13, %s5126_s19  }
  0x34   : > { %p7773_p9 = scmp.ne.s32.totalorder %s7768_s10, 0  ;;  %p7774_p0 = scmp.lt.s32.totalorder %s5122_s27, 3 }
  0x35   : > { %s7560_s23 = sand.u32 1, %s5122_s27   ;;  %s7776_s2 = sld [smem:[#allocation110_spill]] }
  0x36   : > { %p5267_p2 = pnand %p7774_p0, %p7773_p9  ;;  %s285_s14 = scalar_lea.vmem [#allocation6], %s7558_s18 }
  0x37   : > { %s292_s10 = sshll.u32 %s285_s14, 4  ;;  %s5127_s13 = smov [#allocation12]   ;;  %s5281_s10 = int_to_ptr.vmem [resolvable:$true] %s292_s10 }
  0x38   : > { %s7775_s22 = scalar_select %p5267_p2, 1, 0 }
  0x39   : > { %s5283_s19 = sshll.u32 %s5127_s13, 4  ;;  %s5287_s20 = scalar_lea.sflag [#allocation7], %s7560_s23  ;;  %s250_s19 = int_to_ptr.vmem [resolvable:$true] %s5283_s19 }
  0x3a   : > { %p5293_p5 = pneg %p5267_p2 }
  0x3b   : > { %s5277_s8 = scalar_lea.hbm %s7776_s2, %s7559_s17  ;;  %s4929_s18 = scalar_lea.hbm %s7776_s2, 36864 }
  0x3c   : > { %s4924_s21 = scalar_lea.hbm %s5277_s8, 12288  ;;  %p4930_p13 = scmp.lt.u32.totalorder %s5277_s8, %s7776_s2 }
  0x3d   : > { %p4925_p4 = scmp.ne.s32.totalorder %s5277_s8, %s4924_s21  ;;  %p4931_p3 = scmp.lt.u32.totalorder %s4929_s18, %s4924_s21 }
  0x3e   : > { %s7777_s24 = scalar_select %p5293_p5, 1, 0 }
  0x3f   : > { %p4927_p8 = pnand %p5293_p5, %p4925_p4  ;;  %p4932_p6 = por %p4931_p3, %p4930_p13 }
  0x40   : > { %p4933_p7 = scmp.lt.u32.totalorder %s4924_s21, %s5277_s8 }
  0x41   : > { %p4928_p10 = pneg %p4927_p8 }
  0x42   : > { %p4934_p11 = por %p4933_p7, %p4932_p6 }
  0x44   : > { %p4935_p9 = pnand %p4934_p11, %p4928_p10 }
  0x46   : > { %4938 = shalt.err (!%p4935_p9)
}
  0x47   : > { %s4939_s23 = scalar_lea.vmem %s5281_s10, 12288  ;;  %s5128_s30 = smov [#allocation6]  }
  0x48   : > { %p4940_p0 = scmp.ne.s32.totalorder %s5281_s10, %s4939_s23  ;;  %s4944_s14 = sshll.u32 %s5128_s30, 4  ;;  %s4945_s14 = int_to_ptr.vmem [resolvable:$false] %s4944_s14 }
  0x49   : > { %s4946_s17 = scalar_lea.vmem %s4945_s14, 24576  ;;  %p4947_p1 = scmp.lt.s32.totalorder %s5281_s10, %s4945_s14 }
  0x4a   : > { %p4942_p4 = pnand %p4940_p0, %p5293_p5  ;;  %p4948_p12 = scmp.lt.s32.totalorder %s4946_s17, %s4939_s23 }
  0x4c   : > { %p4943_p8 = pneg %p4942_p4  ;;  %p4949_p13 = por %p4948_p12, %p4947_p1 }
  0x4e   : > { %p4950_p3 = pnand %p4949_p13, %p4943_p8 }
  0x50   : > { %4953 = shalt.err (!%p4950_p3)
}
  0x51   : > { %s7568_s18 = smov 384   ;;  %s7569_s21 = smov 24  }
  0x52   : > { %4145 = dma.hbm_to_vmem [thread:$0]  (!%p5267_p2), %s5277_s8, 12288, %s5281_s10, %s5287_s20, %s7568_s18, %s7568_s18, %s7569_s21  }
  0x53   : > { %s4954_s23 = scalar_lea.hbm %s7553_s6, 16  ;;  %p7778_p1 = scmp.ne.s32.totalorder %s7771_s15, 0 }
  0x54   : > { %p4955_p12 = scmp.ne.s32.totalorder %s7553_s6, %s4954_s23  ;;  %p4961_p11 = scmp.lt.u32.totalorder %s4954_s23, %s7553_s6 }
  0x55   : > { %p7779_p10 = pneg %p7778_p1 }
  0x57   : > { %p4957_p6 = pnand %p4955_p12, %p7779_p10 }
  0x59   : > { %p4958_p7 = pneg %p4957_p6 }
  0x5b   : > { %p4963_p9 = pnand %p4961_p11, %p4958_p7 }
  0x5d   : > { %4966 = shalt.err (!%p4963_p9)
}
  0x5e   : > { %s4967_s8 = scalar_lea.vmem %s250_s19, 16  ;;  %p7780_p4 = pmov %p7779_p10 }
  0x5f   : > { %p4968_p0 = scmp.ne.s32.totalorder %s250_s19, %s4967_s8  ;;  %s4974_s10 = scalar_lea.vmem %s250_s19, 32 }
  0x60   : > { %p4975_p3 = scmp.lt.s32.totalorder %s250_s19, %s250_s19  ;;  %p4976_p2 = scmp.lt.s32.totalorder %s4974_s10, %s4967_s8 }
  0x61   : > { %p4970_p8 = pnand %p4968_p0, %p7780_p4 }
  0x62   : > { %p4977_p5 = por %p4976_p2, %p4975_p3 }
  0x63   : > { %p4971_p13 = pneg %p4970_p8 }
  0x65   : > { %p4978_p10 = pnand %p4977_p5, %p4971_p13 }
  0x67   : > { %4981 = shalt.err (!%p4978_p10)
}
  0x68   : > { %4138 = dma.hbm_to_vmem [thread:$0]  (!%p7778_p1), %s7553_s6, 16, %s250_s19, [#allocation13]  }
  0x69   : > { %s7781_s5 = smul.u32 12288, %s5122_s27  ;;  %s261_s2 = scalar_lea.sflag [#allocation5], %s5237_s16 }
  0x6a   : > { %s7782_s17 = smul.u32 768, %s5237_s16  ;;  %p7783_p5 = scmp.ne.s32.totalorder %s7777_s24, 0 }
  0x6b   : > { %s5346_s14 = scalar_lea.hbm %s7548_s1, %s7781_s5  ;;  %s4110_s10 = smul.u32 6, %s5237_s16 }
  0x6c   : > { %s264_s15 = scalar_lea.vmem [#allocation4], %s7782_s17  ;;  %s4111_s13 = smul.u32 96, %s5122_s27 }
  0x6d   : > { %s271_s8 = sshll.u32 %s264_s15, 4  ;;  %s4982_s18 = scalar_lea.hbm %s5346_s14, 12288  ;;  %s5351_s8 = int_to_ptr.vmem [resolvable:$true] %s271_s8 }
  0x6e   : > { %p4983_p2 = scmp.ne.s32.totalorder %s5346_s14, %s4982_s18  ;;  %s4987_s30 = scalar_lea.hbm %s7548_s1, 36864 }
  0x6f   : > { %p4988_p6 = scmp.lt.u32.totalorder %s5346_s14, %s7548_s1  ;;  %p4989_p7 = scmp.lt.u32.totalorder %s4987_s30, %s4982_s18 }
  0x70   : > { %p4985_p12 = pnand %p4983_p2, %p7783_p5  ;;  %p4991_p9 = scmp.lt.u32.totalorder %s4982_s18, %s5346_s14 }
  0x71   : > { %p4990_p11 = por %p4989_p7, %p4988_p6 }
  0x72   : > { %p4986_p1 = pneg %p4985_p12 }
  0x73   : > { %p4992_p0 = por %p4991_p9, %p4990_p11 }
  0x75   : > { %p4993_p4 = pnand %p4992_p0, %p4986_p1 }
  0x77   : > { %4996 = shalt.err (!%p4993_p4)
}
  0x78   : > { %s4997_s17 = scalar_lea.vmem %s5351_s8, 12288  ;;  %s5131_s15 = smov [#allocation4]  }
  0x79   : > { %p4998_p8 = scmp.ne.s32.totalorder %s5351_s8, %s4997_s17  ;;  %s5002_s19 = sshll.u32 %s5131_s15, 4  ;;  %s5003_s19 = int_to_ptr.vmem [resolvable:$false] %s5002_s19 }
  0x7a   : > { %s5004_s21 = scalar_lea.vmem %s5003_s19, 24576  ;;  %p5005_p10 = scmp.lt.s32.totalorder %s5351_s8, %s5003_s19 }
  0x7b   : > { %p5000_p13 = pnand %p4998_p8, %p7783_p5  ;;  %p5006_p2 = scmp.lt.s32.totalorder %s5004_s21, %s4997_s17 }
  0x7d   : > { %p5001_p3 = pneg %p5000_p13  ;;  %p5007_p12 = por %p5006_p2, %p5005_p10 }
  0x7f   : > { %p5008_p6 = pnand %p5007_p12, %p5001_p3 }
  0x81   : > { %5011 = shalt.err (!%p5008_p6)
}
  0x82   : > { %p7784_p1 = scmp.ne.s32.totalorder %s7775_s22, 0  ;;  %s7785_s18 = smov 24  }
  0x83   : > { %s7786_s5 = smov 384   ;;  %s5386_s17 = scalar_lea.hbm %s7550_s3, %s4111_s13 }
  0x84   : > { %4142 = dma.hbm_to_vmem [thread:$0]  (!%p7784_p1), %s5346_s14, 12288, %s5351_s8, %s261_s2, %s7786_s5, %s7786_s5, %s7785_s18  }
  0x85   : > { %s306_s15 = scalar_lea.vmem [#allocation8], %s4110_s10  ;;  %s5012_s21 = scalar_lea.hbm %s5386_s17, 96 }
  0x86   : > { %s314_s19 = sshll.u32 %s306_s15, 4  ;;  %p5013_p7 = scmp.ne.s32.totalorder %s5386_s17, %s5012_s21  ;;  %s315_s19 = int_to_ptr.vmem [resolvable:$true] %s314_s19 }
  0x87   : > { %s5017_s2 = scalar_lea.hbm %s7550_s3, 288  ;;  %p5018_p0 = scmp.lt.u32.totalorder %s5386_s17, %s7550_s3 }
  0x88   : > { %p5015_p11 = pnand %p5013_p7, %p7783_p5  ;;  %p5019_p4 = scmp.lt.u32.totalorder %s5017_s2, %s5012_s21 }
  0x89   : > { %p5021_p13 = scmp.lt.u32.totalorder %s5012_s21, %s5386_s17 }
  0x8a   : > { %p5016_p9 = pneg %p5015_p11  ;;  %p5020_p8 = por %p5019_p4, %p5018_p0 }
  0x8c   : > { %p5022_p3 = por %p5021_p13, %p5020_p8 }
  0x8e   : > { %p5023_p10 = pnand %p5022_p3, %p5016_p9 }
  0x90   : > { %5026 = shalt.err (!%p5023_p10)
}
  0x91   : > { %s5027_s30 = scalar_lea.vmem %s315_s19, 96  ;;  %s5132_s23 = smov [#allocation8]  }
  0x92   : > { %p5028_p2 = scmp.ne.s32.totalorder %s315_s19, %s5027_s30  ;;  %s5032_s15 = sshll.u32 %s5132_s23, 4  ;;  %s5033_s15 = int_to_ptr.vmem [resolvable:$false] %s5032_s15 }
  0x93   : > { %s5034_s14 = scalar_lea.vmem %s5033_s15, 192  ;;  %p5035_p7 = scmp.lt.s32.totalorder %s315_s19, %s5033_s15 }
  0x94   : > { %p5030_p12 = pnand %p5028_p2, %p7783_p5  ;;  %p5036_p11 = scmp.lt.s32.totalorder %s5034_s14, %s5027_s30 }
  0x96   : > { %p5031_p6 = pneg %p5030_p12  ;;  %p5037_p1 = por %p5036_p11, %p5035_p7 }
  0x98   : > { %p5038_p0 = pnand %p5037_p1, %p5031_p6 }
  0x9a   : > { %5041 = shalt.err (!%p5038_p0)
}
  0x9b   : > { %p7787_p4 = scmp.ne.s32.totalorder %s7775_s22, 0  ;;  %s5413_s2 = scalar_lea.hbm %s7551_s4, %s4111_s13 }
  0x9c   : > { %s325_s18 = scalar_lea.vmem [#allocation9], %s4110_s10  ;;  %s7788_s30 = sand.u32 1, %s5122_s27  }
  0x9d   : > { %4148 = dma.hbm_to_vmem [thread:$0]  (!%p7787_p4), %s5386_s17, 96, %s315_s19, %s5287_s20  }
  0x9e   : > { %s333_s5 = sshll.u32 %s325_s18, 4  ;;  %s322_s23 = scalar_lea.sflag [#allocation10], %s7788_s30  ;;  %s334_s5 = int_to_ptr.vmem [resolvable:$true] %s333_s5 }
  0x9f   : > { %s5042_s15 = scalar_lea.hbm %s5413_s2, 96  ;;  %s5047_s13 = scalar_lea.hbm %s7551_s4, 288 }
  0xa0   : > { %p5043_p1 = scmp.ne.s32.totalorder %s5413_s2, %s5042_s15  ;;  %p5048_p13 = scmp.lt.u32.totalorder %s5413_s2, %s7551_s4 }
  0xa1   : > { %p5049_p3 = scmp.lt.u32.totalorder %s5047_s13, %s5042_s15  ;;  %p5051_p2 = scmp.lt.u32.totalorder %s5042_s15, %s5413_s2 }
  0xa2   : > { %p5045_p9 = pnand %p5043_p1, %p7783_p5 }
  0xa3   : > { %p5050_p10 = por %p5049_p3, %p5048_p13 }
  0xa4   : > { %p5046_p8 = pneg %p5045_p9 }
  0xa5   : > { %p5052_p12 = por %p5051_p2, %p5050_p10 }
  0xa7   : > { %p5053_p6 = pnand %p5052_p12, %p5046_p8 }
  0xa9   : > { %5056 = shalt.err (!%p5053_p6)
}
  0xaa   : > { %s5057_s27 = scalar_lea.vmem %s334_s5, 96  ;;  %s5133_s10 = smov [#allocation9]  }
  0xab   : > { %p5058_p7 = scmp.ne.s32.totalorder %s334_s5, %s5057_s27  ;;  %s5062_s14 = sshll.u32 %s5133_s10, 4  ;;  %s5063_s14 = int_to_ptr.vmem [resolvable:$false] %s5062_s14 }
  0xac   : > { %s5064_s21 = scalar_lea.vmem %s5063_s14, 192  ;;  %p5065_p1 = scmp.lt.s32.totalorder %s334_s5, %s5063_s14 }
  0xad   : > { %p5060_p11 = pnand %p5058_p7, %p7783_p5  ;;  %p5066_p9 = scmp.lt.s32.totalorder %s5064_s21, %s5057_s27 }
  0xaf   : > { %p5061_p0 = pneg %p5060_p11  ;;  %p5067_p4 = por %p5066_p9, %p5065_p1 }
  0xb1   : > { %p5068_p3 = pnand %p5067_p4, %p5061_p0 }
  0xb3   : > { %5071 = shalt.err (!%p5068_p3)
}
  0xb4   : > { %p7789_p13 = scmp.ne.s32.totalorder %s7775_s22, 0  ;;  %p7790_p8 = scmp.ne.s32.totalorder %s7770_s12, 0 }
  0xb6   : > { %4151 = dma.hbm_to_vmem [thread:$0]  (!%p7789_p13), %s5413_s2, 96, %s334_s5, %s322_s23  }
  0xb7   : > { %342 = sbr.rel (%p7790_p8) target bundleno = 3132 (0xc3c), region = 48 }
  0xbe   : > { %s344_s24 = sand.u32 1, %s5114_s25   ;;  %p7791_p5 = scmp.ne.s32.totalorder %s7769_s11, 0 }
  0xbf   : > { %s4114_s8 = smul.u32 768, %s344_s24  ;;  %s345_s18 = scalar_lea.sflag [#allocation5], %s344_s24 }
  0xc1   : > { %s5439_s30 = scalar_lea.vmem [#allocation4], %s4114_s8 }
  0xc2   : > { %5089 = dma.done.wait (%p7791_p5), %s345_s18, 12288  }
  0xc3   : > { %5091 = vsyncadd (%p7791_p5), %s345_s18, 4294955008  ;;  %s353_s22 = sand.u32 1, %s5194_s28   ;;  %s5446_s2 = scalar_lea.vmem [#allocation6], %s4114_s8 }
  0xc4   : > { %s354_s15 = scalar_lea.sflag [#allocation7], %s353_s22 }
  0xc5   : > { %5093 = dma.done.wait (%p7791_p5), %s354_s15, 12384  }
  0xc6   : > { %5095 = vsyncadd (%p7791_p5), %s354_s15, 4294954912  ;;  %s4115_s12 = smul.u32 6, %s344_s24  ;;  %s372_s23 = scalar_lea.sflag [#allocation10], %s353_s22 }
  0xc8   : > { %s5452_s5 = scalar_lea.vmem [#allocation8], %s4115_s12  ;;  %s5454_s20 = scalar_lea.vmem [#allocation9], %s4115_s12 }
  0xc9   : > { %5097 = dma.done.wait (%p7791_p5), %s372_s23, 96  }
  0xca   : > { %5099 = vsyncadd (%p7791_p5), %s372_s23, 4294967200  ;;  %p7792_p4 = scmp.eq.s32.totalorder %s5194_s28, 0 }
  0xcc   : > { %5101 = dma.done.wait (%p7792_p4), [#allocation10], 2048   ;;  %p7793_p10 = pmov %p7792_p4 }
  0xcd   : > { %p7794_p2 = pmov %p7792_p4 }
  0xce   : > { %5103 = vsyncadd (%p7793_p10), [#allocation10], 4294965248 }
  0xcf   : > { %5105 = dma.done.wait (%p7794_p2), [#allocation13], 16   ;;  %p7795_p12 = pmov %p7794_p2 }
  0xd0   : > { %p7796_p6 = scmp.ne.s32.totalorder %s5194_s28, 0 }
  0xd1   : > { %5107 = vsyncadd (%p7795_p12), [#allocation13], 4294967280  ;;  %v4196_v0 = vld [vmem:[%s7547_s0] ss:$8 sps:$4 sm:$0xff] (!%p7796_p6)   ;;  %v4198_v1 = vld [vmem:[%s7547_s0 + $0x4] ss:$8 sps:$4 sm:$0xff] (!%p7796_p6)  }
  0xd2   : > { %428 = sbr.rel (%p7796_p6) target bundleno = 217 (0xd9), region = 76  ;;  %477 = vst [vmem:[#allocation2] sm:$0xff] (!%p7796_p6), %v4196_v0  ;;  %v4199_v2 = vld [vmem:[%s7547_s0 + $0x10] ss:$8 sps:$4 sm:$0xff] (!%p7796_p6)   ;;  %v4201_v3 = vld [vmem:[%s7547_s0 + $0x14] ss:$8 sps:$4 sm:$0xff] (!%p7796_p6)  }
  0xd3   : > { %478 = vst [vmem:[#allocation2 + $0x8] sm:$0xff] (!%p7796_p6), %v4198_v1  ;;  %v4202_v4 = vld [vmem:[%s7547_s0 + $0x20] ss:$8 sps:$4 sm:$0xff] (!%p7796_p6)   ;;  %v4204_v5 = vld [vmem:[%s7547_s0 + $0x24] ss:$8 sps:$4 sm:$0xff] (!%p7796_p6)   ;;  %479 = vst [vmem:[#allocation2 + $0x10] sm:$0xff] (!%p7796_p6), %v4199_v2 }
  0xd4   : > { %480 = vst [vmem:[#allocation2 + $0x18] sm:$0xff] (!%p7796_p6), %v4201_v3  ;;  %v4205_v6 = vld [vmem:[%s7547_s0 + $0x30] ss:$8 sps:$4 sm:$0xff] (!%p7796_p6)   ;;  %481 = vst [vmem:[#allocation2 + $0x20] sm:$0xff] (!%p7796_p6), %v4202_v4  ;;  %v4207_v7 = vld [vmem:[%s7547_s0 + $0x34] ss:$8 sps:$4 sm:$0xff] (!%p7796_p6)  }
  0xd5   : > { %482 = vst [vmem:[#allocation2 + $0x28] sm:$0xff] (!%p7796_p6), %v4204_v5  ;;  %483 = vst [vmem:[#allocation2 + $0x30] sm:$0xff] (!%p7796_p6), %v4205_v6 }
  0xd6   : > { %484 = vst [vmem:[#allocation2 + $0x38] sm:$0xff] (!%p7796_p6), %v4207_v7 }
  0xd9 PF: > { %v4208_v8 = vld [vmem:[%s5439_s30 + $0x4] ss:$24 sps:$4 sm:$0xff]   ;;  %v4212_v10 = vld [vmem:[%s5439_s30] ss:$24 sps:$4 sm:$0xff]   ;;  %v4214_v12 = vld [vmem:[%s5439_s30 + $0x34] ss:$24 sps:$4 sm:$0xff]  }
  0xda   : > { %v4210_v9 = vld [vmem:[%s5439_s30 + $0xc] ss:$24 sps:$4 sm:$0xff]   ;;  %1101 = vmatprep.subr.bf16.mxu0 %v4208_v8  ;;  %v4213_v11 = vld [vmem:[%s5439_s30 + $0x8] ss:$24 sps:$4 sm:$0xff]   ;;  %v4216_v13 = vld [vmem:[%s5439_s30 + $0x3c] ss:$24 sps:$4 sm:$0xff]  }
  0xdb   : > { %1174 = vmatprep.subr.bf16.mxu1 %v4210_v9  ;;  %1102 = vmatpush1.bf16.msra.mxu0 %v4212_v10  ;;  %v4218_v14 = vld [vmem:[%s5439_s30 + $0x30] ss:$24 sps:$4 sm:$0xff]   ;;  %v4220_v16 = vld [vmem:[%s5439_s30 + $0x64] ss:$24 sps:$4 sm:$0xff]   ;;  %v4224_v18 = vld [vmem:[%s5439_s30 + $0x60] ss:$24 sps:$4 sm:$0xff]  }
  0xdc   : > { %1175 = vmatpush1.bf16.msra.mxu1 %v4213_v11  ;;  %1103 = vmatprep.subr.bf16.mxu0 %v4214_v12  ;;  %v4219_v15 = vld [vmem:[%s5439_s30 + $0x38] ss:$24 sps:$4 sm:$0xff]   ;;  %v4222_v17 = vld [vmem:[%s5439_s30 + $0x6c] ss:$24 sps:$4 sm:$0xff]   ;;  %v4225_v19 = vld [vmem:[%s5439_s30 + $0x68] ss:$24 sps:$4 sm:$0xff]  }
  0xdd   : > { %1176 = vmatprep.subr.bf16.mxu1 %v4216_v13  ;;  %v4226_v20 = vld [vmem:[%s5439_s30 + $0x94] ss:$24 sps:$4 sm:$0xff]   ;;  %v4230_v22 = vld [vmem:[%s5439_s30 + $0x90] ss:$24 sps:$4 sm:$0xff]   ;;  %v4232_v24 = vld [vmem:[%s5439_s30 + $0xc4] ss:$24 sps:$4 sm:$0xff]  }
  0xde   : > { %v4228_v21 = vld [vmem:[%s5439_s30 + $0x9c] ss:$24 sps:$4 sm:$0xff]   ;;  %v4231_v23 = vld [vmem:[%s5439_s30 + $0x98] ss:$24 sps:$4 sm:$0xff]   ;;  %v4234_v25 = vld [vmem:[%s5439_s30 + $0xcc] ss:$24 sps:$4 sm:$0xff]  }
  0xdf   : > { %1104 = vmatpush1.bf16.msra.mxu0 %v4218_v14  ;;  %v4236_v26 = vld [vmem:[%s5439_s30 + $0xc0] ss:$24 sps:$4 sm:$0xff]   ;;  %v4238_v28 = vld [vmem:[%s5439_s30 + $0xf4] ss:$24 sps:$4 sm:$0xff]   ;;  %v4242_v30 = vld [vmem:[%s5439_s30 + $0xf0] ss:$24 sps:$4 sm:$0xff]  }
  0xe0   : > { %1177 = vmatpush1.bf16.msra.mxu1 %v4219_v15  ;;  %1105 = vmatprep.subr.bf16.mxu0 %v4220_v16  ;;  %v4237_v27 = vld [vmem:[%s5439_s30 + $0xc8] ss:$24 sps:$4 sm:$0xff]   ;;  %v4240_v29 = vld [vmem:[%s5439_s30 + $0xfc] ss:$24 sps:$4 sm:$0xff]   ;;  %v4243_v31 = vld [vmem:[%s5439_s30 + $0xf8] ss:$24 sps:$4 sm:$0xff]  }
  0xe1   : > { %1178 = vmatprep.subr.bf16.mxu1 %v4222_v17  ;;  %v4244_v32 = vld [vmem:[%s5439_s30 + $0x124] ss:$24 sps:$4 sm:$0xff]   ;;  %v4248_v34 = vld [vmem:[%s5439_s30 + $0x120] ss:$24 sps:$4 sm:$0xff]   ;;  %v4250_v36 = vld [vmem:[%s5439_s30 + $0x154] ss:$24 sps:$4 sm:$0xff]  }
  0xe2   : > { %v4246_v33 = vld [vmem:[%s5439_s30 + $0x12c] ss:$24 sps:$4 sm:$0xff]   ;;  %v4249_v35 = vld [vmem:[%s5439_s30 + $0x128] ss:$24 sps:$4 sm:$0xff]   ;;  %v4252_v37 = vld [vmem:[%s5439_s30 + $0x15c] ss:$24 sps:$4 sm:$0xff]  }
  0xe3   : > { %1106 = vmatpush1.bf16.msra.mxu0 %v4224_v18  ;;  %v4254_v38 = vld [vmem:[%s5439_s30 + $0x150] ss:$24 sps:$4 sm:$0xff]   ;;  %v4256_v40 = vld [vmem:[%s5439_s30 + $0x184] ss:$24 sps:$4 sm:$0xff]   ;;  %v4260_v42 = vld [vmem:[%s5439_s30 + $0x180] ss:$24 sps:$4 sm:$0xff]  }
  0xe4   : > { %1179 = vmatpush1.bf16.msra.mxu1 %v4225_v19  ;;  %1107 = vmatprep.subr.bf16.mxu0 %v4226_v20  ;;  %v4255_v39 = vld [vmem:[%s5439_s30 + $0x158] ss:$24 sps:$4 sm:$0xff]   ;;  %v4258_v41 = vld [vmem:[%s5439_s30 + $0x18c] ss:$24 sps:$4 sm:$0xff]   ;;  %v4261_v43 = vld [vmem:[%s5439_s30 + $0x188] ss:$24 sps:$4 sm:$0xff]  }
  0xe5   : > { %1180 = vmatprep.subr.bf16.mxu1 %v4228_v21  ;;  %v4262_v44 = vld [vmem:[%s5439_s30 + $0x1b4] ss:$24 sps:$4 sm:$0xff]   ;;  %v4266_v46 = vld [vmem:[%s5439_s30 + $0x1b0] ss:$24 sps:$4 sm:$0xff]   ;;  %v4268_v48 = vld [vmem:[%s5439_s30 + $0x1e4] ss:$24 sps:$4 sm:$0xff]  }
  0xe6   : > { %v4264_v45 = vld [vmem:[%s5439_s30 + $0x1bc] ss:$24 sps:$4 sm:$0xff]   ;;  %v4267_v47 = vld [vmem:[%s5439_s30 + $0x1b8] ss:$24 sps:$4 sm:$0xff]   ;;  %v4270_v49 = vld [vmem:[%s5439_s30 + $0x1ec] ss:$24 sps:$4 sm:$0xff]  }
  0xe7   : > { %1108 = vmatpush1.bf16.msra.mxu0 %v4230_v22  ;;  %v4272_v50 = vld [vmem:[%s5439_s30 + $0x1e0] ss:$24 sps:$4 sm:$0xff]   ;;  %v4274_v52 = vld [vmem:[%s5439_s30 + $0x214] ss:$24 sps:$4 sm:$0xff]   ;;  %v4278_v55 = vld [vmem:[%s5439_s30 + $0x210] ss:$24 sps:$4 sm:$0xff]  }
  0xe8   : > { %1181 = vmatpush1.bf16.msra.mxu1 %v4231_v23  ;;  %1109 = vmatprep.subr.bf16.mxu0 %v4232_v24  ;;  %v4273_v51 = vld [vmem:[%s5439_s30 + $0x1e8] ss:$24 sps:$4 sm:$0xff]   ;;  %v4276_v53 = vld [vmem:[%s5439_s30 + $0x21c] ss:$24 sps:$4 sm:$0xff]   ;;  %v4279_v56 = vld [vmem:[%s5439_s30 + $0x218] ss:$24 sps:$4 sm:$0xff]  }
  0xe9   : > { %1182 = vmatprep.subr.bf16.mxu1 %v4234_v25  ;;  %v5540_v54 = vld [vmem:[#allocation2 + $0x8] sm:$0xff]  ;;  %v4280_v57 = vld [vmem:[%s5439_s30 + $0x244] ss:$24 sps:$4 sm:$0xff]   ;;  %v4284_v59 = vld [vmem:[%s5439_s30 + $0x240] ss:$24 sps:$4 sm:$0xff]   ;;  %p4022_p7 = scmp.ne.s32.totalorder %s5194_s28, 2 }
  0xea   : > { %1133 = vmatprep.mubr.bf16.mxu0 %v5540_v54  ;;  %1206 = vmatprep.mubr.bf16.mxu1 %v5540_v54  ;;  %v4282_v58 = vld [vmem:[%s5439_s30 + $0x24c] ss:$24 sps:$4 sm:$0xff]   ;;  %v4285_v60 = vld [vmem:[%s5439_s30 + $0x248] ss:$24 sps:$4 sm:$0xff]   ;;  %v4288_v62 = vld [vmem:[%s5439_s30 + $0x27c] ss:$24 sps:$4 sm:$0xff]  }
  0xeb   : > { %1110 = vmatpush1.bf16.msra.mxu0 %v4236_v26  ;;  %v4286_v61 = vld [vmem:[%s5439_s30 + $0x274] ss:$24 sps:$4 sm:$0xff]   ;;  %v4290_v63 = vld [vmem:[%s5439_s30 + $0x270] ss:$24 sps:$4 sm:$0xff]   ;;  %v4292_v1 = vld [vmem:[%s5439_s30 + $0x2a4] ss:$24 sps:$4 sm:$0xff]  }
  0xec   : > { %1183 = vmatpush1.bf16.msra.mxu1 %v4237_v27  ;;  %1111 = vmatprep.subr.bf16.mxu0 %v4238_v28  ;;  %v4291_v0 = vld [vmem:[%s5439_s30 + $0x278] ss:$24 sps:$4 sm:$0xff]   ;;  %v4294_v2 = vld [vmem:[%s5439_s30 + $0x2ac] ss:$24 sps:$4 sm:$0xff]   ;;  %v4297_v4 = vld [vmem:[%s5439_s30 + $0x2a8] ss:$24 sps:$4 sm:$0xff]  }
  0xed   : > { %1184 = vmatprep.subr.bf16.mxu1 %v4240_v29  ;;  %v4296_v3 = vld [vmem:[%s5439_s30 + $0x2a0] ss:$24 sps:$4 sm:$0xff]   ;;  %v4298_v5 = vld [vmem:[%s5439_s30 + $0x2d4] ss:$24 sps:$4 sm:$0xff]   ;;  %v4302_v7 = vld [vmem:[%s5439_s30 + $0x2d0] ss:$24 sps:$4 sm:$0xff]  }
  0xee   : > { %v4300_v6 = vld [vmem:[%s5439_s30 + $0x2dc] ss:$24 sps:$4 sm:$0xff]   ;;  %v4303_v8 = vld [vmem:[%s5439_s30 + $0x2d8] ss:$24 sps:$4 sm:$0xff]   ;;  %v5566_v11 = vld [vmem:[#allocation2] sm:$0xff] }
  0xef   : > { %1112 = vmatpush1.bf16.msra.mxu0 %v4242_v30  ;;  %v4306_v9 = vld [vmem:[%s5439_s30 + $0x14] ss:$24 sps:$4 sm:$0xff]   ;;  %v5564_v10 = vld [vmem:[%s5446_s2 + $0x4] ss:$24 sps:$4 sm:$0xff]   ;;  %v4304_v12 = vld [vmem:[%s5439_s30 + $0x10] ss:$24 sps:$4 sm:$0xff]  }
  0xf0   : > { %1185 = vmatpush1.bf16.msra.mxu1 %v4243_v31  ;;  %1113 = vmatprep.subr.bf16.mxu0 %v4244_v32  ;;  %v5570_v13 = vld [vmem:[%s5446_s2] ss:$24 sps:$4 sm:$0xff]   ;;  %v4312_v14 = vld [vmem:[%s5439_s30 + $0x44] ss:$24 sps:$4 sm:$0xff]   ;;  %v5575_v15 = vld [vmem:[%s5446_s2 + $0x34] ss:$24 sps:$4 sm:$0xff]  }
  0xf1   : > { %1186 = vmatprep.subr.bf16.mxu1 %v4246_v33  ;;  %v4310_v16 = vld [vmem:[%s5439_s30 + $0x40] ss:$24 sps:$4 sm:$0xff]   ;;  %v5582_v17 = vld [vmem:[%s5446_s2 + $0x30] ss:$24 sps:$4 sm:$0xff]   ;;  %v4318_v18 = vld [vmem:[%s5439_s30 + $0x74] ss:$24 sps:$4 sm:$0xff]  }
  0xf2   : > { %v5587_v19 = vld [vmem:[%s5446_s2 + $0x64] ss:$24 sps:$4 sm:$0xff]   ;;  %v4316_v21 = vld [vmem:[%s5439_s30 + $0x70] ss:$24 sps:$4 sm:$0xff]   ;;  %v5595_v22 = vld [vmem:[%s5446_s2 + $0x60] ss:$24 sps:$4 sm:$0xff]  }
  0xf3   : > { %1114 = vmatpush1.bf16.msra.mxu0 %v4248_v34  ;;  %v5589_v20 = vld [vmem:[#allocation2 + $0x18] sm:$0xff]  ;;  %v5599_v24 = vld [vmem:[#allocation2 + $0x10] sm:$0xff]  ;;  %v5607_v26 = vld [vmem:[#allocation2 + $0x28] sm:$0xff] }
  0xf4   : > { %1187 = vmatpush1.bf16.msra.mxu1 %v4249_v35  ;;  %1115 = vmatprep.subr.bf16.mxu0 %v4250_v36  ;;  %v4324_v23 = vld [vmem:[%s5439_s30 + $0xa4] ss:$24 sps:$4 sm:$0xff]   ;;  %v5603_v25 = vld [vmem:[%s5446_s2 + $0x94] ss:$24 sps:$4 sm:$0xff]   ;;  %v4322_v27 = vld [vmem:[%s5439_s30 + $0xa0] ss:$24 sps:$4 sm:$0xff]  }
  0xf5   : > { %1188 = vmatprep.subr.bf16.mxu1 %v4252_v37  ;;  %v5612_v28 = vld [vmem:[%s5446_s2 + $0x90] ss:$24 sps:$4 sm:$0xff]   ;;  %v4330_v29 = vld [vmem:[%s5439_s30 + $0xd4] ss:$24 sps:$4 sm:$0xff]   ;;  %v5617_v30 = vld [vmem:[%s5446_s2 + $0xc4] ss:$24 sps:$4 sm:$0xff]  }
  0xf6   : > { %v4328_v31 = vld [vmem:[%s5439_s30 + $0xd0] ss:$24 sps:$4 sm:$0xff]   ;;  %v5624_v32 = vld [vmem:[%s5446_s2 + $0xc0] ss:$24 sps:$4 sm:$0xff]   ;;  %v4336_v34 = vld [vmem:[%s5439_s30 + $0x104] ss:$24 sps:$4 sm:$0xff]  }
  0xf7   : > { %1116 = vmatpush1.bf16.msra.mxu0 %v4254_v38  ;;  %v5626_v33 = vld [vmem:[#allocation2 + $0x20] sm:$0xff]  ;;  %v5631_v35 = vld [vmem:[%s5446_s2 + $0xf4] ss:$24 sps:$4 sm:$0xff]   ;;  %v5635_v37 = vld [vmem:[%s5446_s2 + $0xf0] ss:$24 sps:$4 sm:$0xff]  }
  0xf8   : > { %1189 = vmatpush1.bf16.msra.mxu1 %v4255_v39  ;;  %1117 = vmatprep.subr.bf16.mxu0 %v4256_v40  ;;  %v4334_v36 = vld [vmem:[%s5439_s30 + $0x100] ss:$24 sps:$4 sm:$0xff]   ;;  %v4342_v39 = vld [vmem:[%s5439_s30 + $0x134] ss:$24 sps:$4 sm:$0xff]   ;;  %v5645_v40 = vld [vmem:[%s5446_s2 + $0x124] ss:$24 sps:$4 sm:$0xff]  }
  0xf9   : > { %1190 = vmatprep.subr.bf16.mxu1 %v4258_v41  ;;  %v5639_v38 = vld [vmem:[#allocation2 + $0x38] sm:$0xff]  ;;  %v4340_v41 = vld [vmem:[%s5439_s30 + $0x130] ss:$24 sps:$4 sm:$0xff]  }
  0xfb   : > { %1118 = vmatpush1.bf16.msra.mxu0 %v4260_v42  ;;  %v5651_v42 = vld [vmem:[%s5446_s2 + $0x120] ss:$24 sps:$4 sm:$0xff]  }
  0xfc   : > { %1191 = vmatpush1.bf16.msra.mxu1 %v4261_v43  ;;  %1119 = vmatprep.subr.bf16.mxu0 %v4262_v44  ;;  %v4348_v43 = vld [vmem:[%s5439_s30 + $0x164] ss:$24 sps:$4 sm:$0xff]   ;;  %v5655_v44 = vld [vmem:[#allocation2 + $0x30] sm:$0xff] }
  0xfd   : > { %1192 = vmatprep.subr.bf16.mxu1 %v4264_v45  ;;  %v5659_v45 = vld [vmem:[%s5446_s2 + $0x154] ss:$24 sps:$4 sm:$0xff]  }
  0xff   : > { %1120 = vmatpush1.bf16.msra.mxu0 %v4266_v46  ;;  %v4346_v46 = vld [vmem:[%s5439_s30 + $0x160] ss:$24 sps:$4 sm:$0xff]  }
 0x100   : > { %1193 = vmatpush1.bf16.msra.mxu1 %v4267_v47  ;;  %1121 = vmatprep.subr.bf16.mxu0 %v4268_v48  ;;  %v5666_v47 = vld [vmem:[%s5446_s2 + $0x150] ss:$24 sps:$4 sm:$0xff]   ;;  %v4354_v48 = vld [vmem:[%s5439_s30 + $0x194] ss:$24 sps:$4 sm:$0xff]  }
 0x101   : > { %1194 = vmatprep.subr.bf16.mxu1 %v4270_v49  ;;  %v5671_v49 = vld [vmem:[%s5446_s2 + $0x184] ss:$24 sps:$4 sm:$0xff]  }
 0x103   : > { %1122 = vmatpush1.bf16.msra.mxu0 %v4272_v50  ;;  %v7570_v50 = vmov 0.0|0.0  }
 0x104   : > { %1195 = vmatpush1.bf16.msra.mxu1 %v4273_v51  ;;  %1123 = vmatprep.subr.bf16.mxu0 %v4274_v52  ;;  %v4352_v51 = vld [vmem:[%s5439_s30 + $0x190] ss:$24 sps:$4 sm:$0xff]   ;;  %v5677_v52 = vld [vmem:[%s5446_s2 + $0x180] ss:$24 sps:$4 sm:$0xff]  }
 0x105   : > { %1196 = vmatprep.subr.bf16.mxu1 %v4276_v53  ;;  %v4360_v53 = vld [vmem:[%s5439_s30 + $0x1c4] ss:$24 sps:$4 sm:$0xff]  }
 0x107   : > { %1124 = vmatpush1.bf16.msra.mxu0 %v4278_v55  ;;  %v5683_v55 = vld [vmem:[%s5446_s2 + $0x1b4] ss:$24 sps:$4 sm:$0xff]  }
 0x108   : > { %1197 = vmatpush1.bf16.msra.mxu1 %v4279_v56  ;;  %1125 = vmatprep.subr.bf16.mxu0 %v4280_v57  ;;  %v5688_v56 = vld [vmem:[%s5446_s2 + $0x1b0] ss:$24 sps:$4 sm:$0xff]   ;;  %v4366_v57 = vld [vmem:[%s5439_s30 + $0x1f4] ss:$24 sps:$4 sm:$0xff]  }
 0x109   : > { %1198 = vmatprep.subr.bf16.mxu1 %v4282_v58  ;;  %v5693_v58 = vld [vmem:[%s5446_s2 + $0x1e4] ss:$24 sps:$4 sm:$0xff]  }
 0x10b   : > { %1126 = vmatpush1.bf16.msra.mxu0 %v4284_v59  ;;  %v4364_v59 = vld [vmem:[%s5439_s30 + $0x1f0] ss:$24 sps:$4 sm:$0xff]  }
 0x10c   : > { %1199 = vmatpush1.bf16.msra.mxu1 %v4285_v60  ;;  %1127 = vmatprep.subr.bf16.mxu0 %v4286_v61  ;;  %v5697_v60 = vld [vmem:[%s5446_s2 + $0x1e0] ss:$24 sps:$4 sm:$0xff]   ;;  %v4372_v61 = vld [vmem:[%s5439_s30 + $0x224] ss:$24 sps:$4 sm:$0xff]  }
 0x10d   : > { %1200 = vmatprep.subr.bf16.mxu1 %v4288_v62  ;;  %v5703_v62 = vld [vmem:[%s5446_s2 + $0x214] ss:$24 sps:$4 sm:$0xff]  }
 0x10f   : > { %1128 = vmatpush1.bf16.msra.mxu0 %v4290_v63  ;;  %v4370_v63 = vld [vmem:[%s5439_s30 + $0x220] ss:$24 sps:$4 sm:$0xff]  }
 0x110   : > { %1201 = vmatpush1.bf16.msra.mxu1 %v4291_v0  ;;  %1129 = vmatprep.subr.bf16.mxu0 %v4292_v1  ;;  %v5708_v0 = vld [vmem:[%s5446_s2 + $0x210] ss:$24 sps:$4 sm:$0xff]   ;;  %v4378_v1 = vld [vmem:[%s5439_s30 + $0x254] ss:$24 sps:$4 sm:$0xff]  }
 0x111   : > { %1202 = vmatprep.subr.bf16.mxu1 %v4294_v2  ;;  %v5713_v2 = vld [vmem:[%s5446_s2 + $0x244] ss:$24 sps:$4 sm:$0xff]  }
 0x113   : > { %1130 = vmatpush1.bf16.msra.mxu0 %v4296_v3  ;;  %v4376_v3 = vld [vmem:[%s5439_s30 + $0x250] ss:$24 sps:$4 sm:$0xff]  }
 0x114   : > { %1203 = vmatpush1.bf16.msra.mxu1 %v4297_v4  ;;  %1131 = vmatprep.subr.bf16.mxu0 %v4298_v5  ;;  %v5717_v4 = vld [vmem:[%s5446_s2 + $0x240] ss:$24 sps:$4 sm:$0xff]   ;;  %v4384_v5 = vld [vmem:[%s5439_s30 + $0x284] ss:$24 sps:$4 sm:$0xff]  }
 0x115   : > { %1204 = vmatprep.subr.bf16.mxu1 %v4300_v6  ;;  %v5723_v6 = vld [vmem:[%s5446_s2 + $0x274] ss:$24 sps:$4 sm:$0xff]  }
 0x117   : > { %1132 = vmatpush1.bf16.msra.mxu0 %v4302_v7  ;;  %v4382_v7 = vld [vmem:[%s5439_s30 + $0x280] ss:$24 sps:$4 sm:$0xff]  }
 0x118   : > { %1205 = vmatpush1.bf16.msra.mxu1 %v4303_v8  ;;  %1247 = vmatprep.subr.bf16.mxu0 %v4306_v9  ;;  %v5728_v8 = vld [vmem:[%s5446_s2 + $0x270] ss:$24 sps:$4 sm:$0xff]   ;;  %v4390_v9 = vld [vmem:[%s5439_s30 + $0x2b4] ss:$24 sps:$4 sm:$0xff]  }
 0x119   : > { %1977 = vmatprep.subr.bf16.mxu1 %v5564_v10  ;;  %7797 = vst [vmem:[#allocation19_spill] sm:$0xff] %v5728_v8 }
 0x11a   : > { %1134 = vmatmul.mubr.bf16.vlgmr.msra.gmra.mrb[0].mxu0 %v5566_v11 }
 0x11b   : > { %1207 = vmatmul.mubr.bf16.vlgmr.msra.gmra.mrb[0].mxu1 %v5566_v11  ;;  %1248 = vmatpush1.bf16.msra.mxu0 %v4304_v12  ;;  %v5733_v12 = vld [vmem:[%s5446_s2 + $0x2a4] ss:$24 sps:$4 sm:$0xff]  }
 0x11c   : > { %1978 = vmatpush1.bf16.msra.mxu1 %v5570_v13  ;;  %1249 = vmatprep.subr.bf16.mxu0 %v4312_v14  ;;  %7798 = vst [vmem:[#allocation20_spill] sm:$0xff] %v5733_v12  ;;  %v4388_v14 = vld [vmem:[%s5439_s30 + $0x2b0] ss:$24 sps:$4 sm:$0xff]  }
 0x11d   : > { %1979 = vmatprep.subr.bf16.mxu1 %v5575_v15  ;;  %1143 = vmatprep.mubr.bf16.mxu0 %v5589_v20 }
 0x11e   : > { %1216 = vmatprep.mubr.bf16.mxu1 %v5589_v20 }
 0x11f   : > { %1250 = vmatpush1.bf16.msra.mxu0 %v4310_v16  ;;  %v5737_v16 = vld [vmem:[%s5446_s2 + $0x2a0] ss:$24 sps:$4 sm:$0xff]  }
 0x120   : > { %1980 = vmatpush1.bf16.msra.mxu1 %v5582_v17  ;;  %1251 = vmatprep.subr.bf16.mxu0 %v4318_v18  ;;  %7799 = vst [vmem:[#allocation21_spill] sm:$0xff] %v5737_v16  ;;  %v4396_v18 = vld [vmem:[%s5439_s30 + $0x2e4] ss:$24 sps:$4 sm:$0xff]  }
 0x121   : > { %1981 = vmatprep.subr.bf16.mxu1 %v5587_v19 }
 0x122   : > { %1144 = vmatmul.mubr.bf16.gmra.mrb[4].mxu0 %v5599_v24 }
 0x123   : > { %1217 = vmatmul.mubr.bf16.gmra.mrb[4].mxu1 %v5599_v24  ;;  %1252 = vmatpush1.bf16.msra.mxu0 %v4316_v21  ;;  %v5743_v21 = vld [vmem:[%s5446_s2 + $0x2d4] ss:$24 sps:$4 sm:$0xff]  }
 0x124   : > { %1982 = vmatpush1.bf16.msra.mxu1 %v5595_v22  ;;  %1253 = vmatprep.subr.bf16.mxu0 %v4324_v23  ;;  %7800 = vst [vmem:[#allocation22_spill] sm:$0xff] %v5743_v21  ;;  %v4394_v23 = vld [vmem:[%s5439_s30 + $0x2e0] ss:$24 sps:$4 sm:$0xff]  }
 0x125   : > { %1983 = vmatprep.subr.bf16.mxu1 %v5603_v25  ;;  %1153 = vmatprep.mubr.bf16.mxu0 %v5607_v26 }
 0x126   : > { %1226 = vmatprep.mubr.bf16.mxu1 %v5607_v26 }
 0x127   : > { %1254 = vmatpush1.bf16.msra.mxu0 %v4322_v27  ;;  %v5748_v27 = vld [vmem:[%s5446_s2 + $0x2d0] ss:$24 sps:$4 sm:$0xff]  }
 0x128   : > { %1984 = vmatpush1.bf16.msra.mxu1 %v5612_v28  ;;  %1255 = vmatprep.subr.bf16.mxu0 %v4330_v29  ;;  %7801 = vst [vmem:[#allocation23_spill] sm:$0xff] %v5748_v27  ;;  %v5751_v29 = vld [vmem:[%s5446_s2 + $0xc] ss:$24 sps:$4 sm:$0xff]  }
 0x129   : > { %1985 = vmatprep.subr.bf16.mxu1 %v5617_v30 }
 0x12a   : > { %1154 = vmatmul.mubr.bf16.gmra.mrb[8].mxu0 %v5626_v33 }
 0x12b   : > { %1227 = vmatmul.mubr.bf16.gmra.mrb[8].mxu1 %v5626_v33  ;;  %1256 = vmatpush1.bf16.msra.mxu0 %v4328_v31  ;;  %v5755_v31 = vld [vmem:[%s5446_s2 + $0x14] ss:$24 sps:$4 sm:$0xff]  }
 0x12c   : > { %1986 = vmatpush1.bf16.msra.mxu1 %v5624_v32  ;;  %1257 = vmatprep.subr.bf16.mxu0 %v4336_v34  ;;  %7802 = vst [vmem:[#allocation24_spill] sm:$0xff] %v5755_v31  ;;  %v5758_v34 = vld [vmem:[%s5446_s2 + $0x8] ss:$24 sps:$4 sm:$0xff]  }
 0x12d   : > { %1987 = vmatprep.subr.bf16.mxu1 %v5631_v35  ;;  %1163 = vmatprep.mubr.bf16.mxu0 %v5639_v38 }
 0x12e   : > { %1236 = vmatprep.mubr.bf16.mxu1 %v5639_v38 }
 0x12f   : > { %1258 = vmatpush1.bf16.msra.mxu0 %v4334_v36  ;;  %v5761_v36 = vld [vmem:[%s5446_s2 + $0x10] ss:$24 sps:$4 sm:$0xff]  }
 0x130   : > { %1988 = vmatpush1.bf16.msra.mxu1 %v5635_v37  ;;  %1259 = vmatprep.subr.bf16.mxu0 %v4342_v39  ;;  %7803 = vst [vmem:[#allocation25_spill] sm:$0xff] %v5761_v36  ;;  %v5765_v39 = vld [vmem:[%s5446_s2 + $0x3c] ss:$24 sps:$4 sm:$0xff]  }
 0x131   : > { %1989 = vmatprep.subr.bf16.mxu1 %v5645_v40 }
 0x132   : > { %1164 = vmatmul.mubr.bf16.gmra.mrb[12].mxu0 %v5655_v44 }
 0x133   : > { %1237 = vmatmul.mubr.bf16.gmra.mrb[12].mxu1 %v5655_v44  ;;  %1260 = vmatpush1.bf16.msra.mxu0 %v4340_v41  ;;  %v5770_v41 = vld [vmem:[%s5446_s2 + $0x44] ss:$24 sps:$4 sm:$0xff]  }
 0x134   : > { %1990 = vmatpush1.bf16.msra.mxu1 %v5651_v42  ;;  %1261 = vmatprep.subr.bf16.mxu0 %v4348_v43  ;;  %7804 = vst [vmem:[#allocation26_spill] sm:$0xff] %v5770_v41  ;;  %v5777_v43 = vld [vmem:[%s5446_s2 + $0x38] ss:$24 sps:$4 sm:$0xff]  }
 0x135   : > { %1991 = vmatprep.subr.bf16.mxu1 %v5659_v45  ;;  %1279 = vmatprep.mubr.bf16.mxu0 %v5540_v54  ;;  %v4358_v54 = vld [vmem:[%s5439_s30 + $0x1c0] ss:$24 sps:$4 sm:$0xff]  }
 0x136   : > { %2009 = vmatprep.mubr.bf16.mxu1 %v7570_v50 }
 0x137   : > { %1262 = vmatpush1.bf16.msra.mxu0 %v4346_v46  ;;  %v5780_v46 = vld [vmem:[%s5446_s2 + $0x40] ss:$24 sps:$4 sm:$0xff]  }
 0x138   : > { %1992 = vmatpush1.bf16.msra.mxu1 %v5666_v47  ;;  %1263 = vmatprep.subr.bf16.mxu0 %v4354_v48  ;;  %7805 = vst [vmem:[#allocation27_spill] sm:$0xff] %v5780_v46  ;;  %v5785_v48 = vld [vmem:[%s5446_s2 + $0x6c] ss:$24 sps:$4 sm:$0xff]  }
 0x139   : > { %1993 = vmatprep.subr.bf16.mxu1 %v5671_v49 }
 0x13b   : > { %1264 = vmatpush1.bf16.msra.mxu0 %v4352_v51  ;;  %v5795_v51 = vld [vmem:[%s5446_s2 + $0x68] ss:$24 sps:$4 sm:$0xff]  }
 0x13c   : > { %1994 = vmatpush1.bf16.msra.mxu1 %v5677_v52  ;;  %1265 = vmatprep.subr.bf16.mxu0 %v4360_v53  ;;  %v5798_v53 = vld [vmem:[%s5446_s2 + $0x70] ss:$24 sps:$4 sm:$0xff]  }
 0x13d   : > { %1995 = vmatprep.subr.bf16.mxu1 %v5683_v55  ;;  %7807 = vst [vmem:[#allocation29_spill] sm:$0xff] %v5798_v53 }
 0x13f   : > { %1266 = vmatpush1.bf16.msra.mxu0 %v4358_v54  ;;  %v5803_v54 = vld [vmem:[%s5446_s2 + $0x9c] ss:$24 sps:$4 sm:$0xff]  }
 0x140   : > { %1996 = vmatpush1.bf16.msra.mxu1 %v5688_v56  ;;  %1267 = vmatprep.subr.bf16.mxu0 %v4366_v57  ;;  %v5812_v57 = vld [vmem:[%s5446_s2 + $0x98] ss:$24 sps:$4 sm:$0xff]  }
 0x141   : > { %1997 = vmatprep.subr.bf16.mxu1 %v5693_v58 }
 0x143   : > { %1268 = vmatpush1.bf16.msra.mxu0 %v4364_v59  ;;  %v5815_v59 = vld [vmem:[%s5446_s2 + $0xa0] ss:$24 sps:$4 sm:$0xff]  }
 0x144   : > { %1998 = vmatpush1.bf16.msra.mxu1 %v5697_v60  ;;  %1269 = vmatprep.subr.bf16.mxu0 %v4372_v61  ;;  %7809 = vst [vmem:[#allocation31_spill] sm:$0xff] %v5815_v59  ;;  %v5820_v61 = vld [vmem:[%s5446_s2 + $0xcc] ss:$24 sps:$4 sm:$0xff]  }
 0x145   : > { %1999 = vmatprep.subr.bf16.mxu1 %v5703_v62 }
 0x147   : > { %1270 = vmatpush1.bf16.msra.mxu0 %v4370_v63  ;;  %v5823_v63 = vld [vmem:[%s5446_s2 + $0xd4] ss:$24 sps:$4 sm:$0xff]  }
 0x148   : > { %2000 = vmatpush1.bf16.msra.mxu1 %v5708_v0  ;;  %1271 = vmatprep.subr.bf16.mxu0 %v4378_v1  ;;  %7810 = vst [vmem:[#allocation32_spill] sm:$0xff] %v5823_v63  ;;  %v5832_v1 = vld [vmem:[%s5446_s2 + $0xd0] ss:$24 sps:$4 sm:$0xff]  }
 0x149   : > { %2001 = vmatprep.subr.bf16.mxu1 %v5713_v2  ;;  %7811 = vst [vmem:[#allocation33_spill] sm:$0xff] %v5832_v1 }
 0x14b   : > { %1272 = vmatpush1.bf16.msra.mxu0 %v4376_v3  ;;  %v5837_v3 = vld [vmem:[%s5446_s2 + $0xfc] ss:$24 sps:$4 sm:$0xff]  }
 0x14c   : > { %2002 = vmatpush1.bf16.msra.mxu1 %v5717_v4  ;;  %1273 = vmatprep.subr.bf16.mxu0 %v4384_v5  ;;  %v5840_v5 = vld [vmem:[%s5446_s2 + $0x104] ss:$24 sps:$4 sm:$0xff]  }
 0x14d   : > { %2003 = vmatprep.subr.bf16.mxu1 %v5723_v6  ;;  %7812 = vst [vmem:[#allocation34_spill] sm:$0xff] %v5840_v5 }
 0x14f   : > { %1274 = vmatpush1.bf16.msra.mxu0 %v4382_v7  ;;  %v5849_v7 = vld [vmem:[%s5446_s2 + $0x100] ss:$24 sps:$4 sm:$0xff]  }
 0x150   : > { %2004 = vmatpush1.bf16.msra.mxu1 %v5728_v8  ;;  %1275 = vmatprep.subr.bf16.mxu0 %v4390_v9  ;;  %7813 = vst [vmem:[#allocation35_spill] sm:$0xff] %v5849_v7  ;;  %v5854_v9 = vld [vmem:[%s5446_s2 + $0x12c] ss:$24 sps:$4 sm:$0xff]  }
 0x151   : > { %2005 = vmatprep.subr.bf16.mxu1 %v5733_v12  ;;  %v6001_v12 = vld [vmem:[%s5446_s2 + $0x2dc] ss:$24 sps:$4 sm:$0xff]  }
 0x152   : > { %7841 = vst [vmem:[#allocation62_spill] sm:$0xff] %v6001_v12  ;;  %v6004_v8 = vld [vmem:[%s5446_s2 + $0x2e4] ss:$24 sps:$4 sm:$0xff]  }
 0x153   : > { %1276 = vmatpush1.bf16.msra.mxu0 %v4388_v14  ;;  %v5857_v14 = vld [vmem:[%s5446_s2 + $0x134] ss:$24 sps:$4 sm:$0xff]  }
 0x154   : > { %2006 = vmatpush1.bf16.msra.mxu1 %v5737_v16  ;;  %1277 = vmatprep.subr.bf16.mxu0 %v4396_v18  ;;  %7814 = vst [vmem:[#allocation36_spill] sm:$0xff] %v5857_v14  ;;  %v5866_v18 = vld [vmem:[%s5446_s2 + $0x130] ss:$24 sps:$4 sm:$0xff]  }
 0x155   : > { %2007 = vmatprep.subr.bf16.mxu1 %v5743_v21  ;;  %7815 = vst [vmem:[#allocation37_spill] sm:$0xff] %v5866_v18  ;;  %v5988_v21 = vld [vmem:[%s5446_s2 + $0x2b4] ss:$24 sps:$4 sm:$0xff]   ;;  %v5993_v16 = vld [vmem:[%s5446_s2 + $0x2a8] ss:$24 sps:$4 sm:$0xff]  }
 0x156   : > { %7840 = vst [vmem:[#allocation61_spill] sm:$0xff] %v5993_v16 }
 0x157   : > { %1278 = vmatpush1.bf16.msra.mxu0 %v4394_v23  ;;  %v5871_v23 = vld [vmem:[%s5446_s2 + $0x15c] ss:$24 sps:$4 sm:$0xff]  }
 0x158   : > { %2008 = vmatpush1.bf16.msra.mxu1 %v5748_v27  ;;  %2018 = vmatprep.subr.bf16.mxu0 %v5751_v29  ;;  %v5980_v27 = vld [vmem:[%s5446_s2 + $0x280] ss:$24 sps:$4 sm:$0xff]  }
 0x159   : > { %2059 = vmatprep.subr.bf16.mxu1 %v5755_v31  ;;  %v5972_v31 = vld [vmem:[%s5446_s2 + $0x284] ss:$24 sps:$4 sm:$0xff]  }
 0x15a   : > { %1280 = vmatmul.mubr.bf16.vlgmr.msra.gmra.mrb[16].mxu0 %v5566_v11  ;;  %v5788_v11 = vld [vmem:[%s5446_s2 + $0x74] ss:$24 sps:$4 sm:$0xff]   ;;  %7837 = vst [vmem:[#allocation58_spill] sm:$0xff] %v5972_v31 }
 0x15b   : > { %2010 = vmatmul.mubr.bf16.vlgmr.msra.gmra.mrb[16].mxu1 %v7570_v50  ;;  %2019 = vmatpush1.bf16.msra.mxu0 %v5758_v34  ;;  %7806 = vst [vmem:[#allocation28_spill] sm:$0xff] %v5788_v11 }
 0x15c   : > { %2060 = vmatpush1.bf16.msra.mxu1 %v5761_v36  ;;  %2020 = vmatprep.subr.bf16.mxu0 %v5765_v39  ;;  %v5964_v36 = vld [vmem:[%s5446_s2 + $0x250] ss:$24 sps:$4 sm:$0xff]  }
 0x15d   : > { %2061 = vmatprep.subr.bf16.mxu1 %v5770_v41  ;;  %1289 = vmatprep.mubr.bf16.mxu0 %v5589_v20  ;;  %v5806_v20 = vld [vmem:[%s5446_s2 + $0xa4] ss:$24 sps:$4 sm:$0xff]   ;;  %v5956_v41 = vld [vmem:[%s5446_s2 + $0x254] ss:$24 sps:$4 sm:$0xff]   ;;  %7835 = vst [vmem:[#allocation56_spill] sm:$0xff] %v5964_v36 }
 0x15e   : > { %2091 = vmatprep.mubr.bf16.mxu1 %v7570_v50  ;;  %7808 = vst [vmem:[#allocation30_spill] sm:$0xff] %v5806_v20  ;;  %v5874_v50 = vld [vmem:[%s5446_s2 + $0x164] ss:$24 sps:$4 sm:$0xff]   ;;  %7833 = vst [vmem:[#allocation54_spill] sm:$0xff] %v5956_v41 }
 0x15f   : > { %2021 = vmatpush1.bf16.msra.mxu0 %v5777_v43  ;;  %7816 = vst [vmem:[#allocation38_spill] sm:$0xff] %v5874_v50 }
 0x160   : > { %2062 = vmatpush1.bf16.msra.mxu1 %v5780_v46  ;;  %2022 = vmatprep.subr.bf16.mxu0 %v5785_v48  ;;  %v5948_v46 = vld [vmem:[%s5446_s2 + $0x220] ss:$24 sps:$4 sm:$0xff]  }
 0x161   : > { %2063 = vmatprep.subr.bf16.mxu1 %v5788_v11  ;;  %v5940_v11 = vld [vmem:[%s5446_s2 + $0x224] ss:$24 sps:$4 sm:$0xff]   ;;  %7831 = vst [vmem:[#allocation52_spill] sm:$0xff] %v5948_v46 }
 0x162   : > { %1290 = vmatmul.mubr.bf16.gmra.mrb[20].mxu0 %v5599_v24  ;;  %v5829_v24 = vld [vmem:[%s5446_s2 + $0xc8] ss:$24 sps:$4 sm:$0xff]   ;;  %7829 = vst [vmem:[#allocation50_spill] sm:$0xff] %v5940_v11 }
 0x163   : > { %2023 = vmatpush1.bf16.msra.mxu0 %v5795_v51  ;;  %1299 = vmatprep.mubr.bf16.mxu0 %v5607_v26  ;;  %v5846_v26 = vld [vmem:[%s5446_s2 + $0xf8] ss:$24 sps:$4 sm:$0xff]  }
 0x164   : > { %2064 = vmatpush1.bf16.msra.mxu1 %v5798_v53  ;;  %2024 = vmatprep.subr.bf16.mxu0 %v5803_v54  ;;  %v5932_v53 = vld [vmem:[%s5446_s2 + $0x1f0] ss:$24 sps:$4 sm:$0xff]  }
 0x165   : > { %2065 = vmatprep.subr.bf16.mxu1 %v5806_v20  ;;  %v5924_v20 = vld [vmem:[%s5446_s2 + $0x1f4] ss:$24 sps:$4 sm:$0xff]   ;;  %7827 = vst [vmem:[#allocation48_spill] sm:$0xff] %v5932_v53 }
 0x166   : > { %7825 = vst [vmem:[#allocation46_spill] sm:$0xff] %v5924_v20 }
 0x167   : > { %2025 = vmatpush1.bf16.msra.mxu0 %v5812_v57 }
 0x168   : > { %2066 = vmatpush1.bf16.msra.mxu1 %v5815_v59  ;;  %2026 = vmatprep.subr.bf16.mxu0 %v5820_v61  ;;  %v5916_v59 = vld [vmem:[%s5446_s2 + $0x1c0] ss:$24 sps:$4 sm:$0xff]  }
 0x169   : > { %2067 = vmatprep.subr.bf16.mxu1 %v5823_v63  ;;  %v5908_v63 = vld [vmem:[%s5446_s2 + $0x1c4] ss:$24 sps:$4 sm:$0xff]   ;;  %7823 = vst [vmem:[#allocation44_spill] sm:$0xff] %v5916_v59 }
 0x16a   : > { %1300 = vmatmul.mubr.bf16.gmra.mrb[24].mxu0 %v5626_v33  ;;  %v5863_v33 = vld [vmem:[%s5446_s2 + $0x128] ss:$24 sps:$4 sm:$0xff]   ;;  %7821 = vst [vmem:[#allocation42_spill] sm:$0xff] %v5908_v63 }
 0x16b   : > { %2027 = vmatpush1.bf16.msra.mxu0 %v5829_v24  ;;  %1309 = vmatprep.mubr.bf16.mxu0 %v5639_v38  ;;  %v5880_v38 = vld [vmem:[%s5446_s2 + $0x158] ss:$24 sps:$4 sm:$0xff]  }
 0x16c   : > { %2068 = vmatpush1.bf16.msra.mxu1 %v5832_v1  ;;  %2028 = vmatprep.subr.bf16.mxu0 %v5837_v3  ;;  %v5900_v1 = vld [vmem:[%s5446_s2 + $0x190] ss:$24 sps:$4 sm:$0xff]  }
 0x16d   : > { %2069 = vmatprep.subr.bf16.mxu1 %v5840_v5  ;;  %v5891_v5 = vld [vmem:[%s5446_s2 + $0x194] ss:$24 sps:$4 sm:$0xff]   ;;  %7820 = vst [vmem:[#allocation41_spill] sm:$0xff] %v5900_v1 }
 0x16e   : > { %7818 = vst [vmem:[#allocation40_spill] sm:$0xff] %v5891_v5 }
 0x16f   : > { %2029 = vmatpush1.bf16.msra.mxu0 %v5846_v26 }
 0x170   : > { %2070 = vmatpush1.bf16.msra.mxu1 %v5849_v7  ;;  %2030 = vmatprep.subr.bf16.mxu0 %v5854_v9  ;;  %v5883_v7 = vld [vmem:[%s5446_s2 + $0x160] ss:$24 sps:$4 sm:$0xff]  }
 0x171   : > { %2071 = vmatprep.subr.bf16.mxu1 %v5857_v14  ;;  %7817 = vst [vmem:[#allocation39_spill] sm:$0xff] %v5883_v7  ;;  %v5888_v14 = vld [vmem:[%s5446_s2 + $0x18c] ss:$24 sps:$4 sm:$0xff]  }
 0x172   : > { %1310 = vmatmul.mubr.bf16.gmra.mrb[28].mxu0 %v5655_v44  ;;  %v7819_v44 = vmov 0.0|0.0  }
 0x173   : > { %2031 = vmatpush1.bf16.msra.mxu0 %v5863_v33  ;;  %2050 = vmatprep.mubr.bf16.mxu0 %v7819_v44 }
 0x174   : > { %2072 = vmatpush1.bf16.msra.mxu1 %v5866_v18  ;;  %2032 = vmatprep.subr.bf16.mxu0 %v5871_v23  ;;  %v5897_v18 = vld [vmem:[%s5446_s2 + $0x188] ss:$24 sps:$4 sm:$0xff]  }
 0x175   : > { %2073 = vmatprep.subr.bf16.mxu1 %v5874_v50  ;;  %v5905_v50 = vld [vmem:[%s5446_s2 + $0x1bc] ss:$24 sps:$4 sm:$0xff]  }
 0x177   : > { %2033 = vmatpush1.bf16.msra.mxu0 %v5880_v38 }
 0x178   : > { %2074 = vmatpush1.bf16.msra.mxu1 %v5883_v7  ;;  %2034 = vmatprep.subr.bf16.mxu0 %v5888_v14  ;;  %v5913_v7 = vld [vmem:[%s5446_s2 + $0x1b8] ss:$24 sps:$4 sm:$0xff]  }
 0x179   : > { %2075 = vmatprep.subr.bf16.mxu1 %v5891_v5  ;;  %7822 = vst [vmem:[#allocation43_spill] sm:$0xff] %v5913_v7  ;;  %v5921_v5 = vld [vmem:[%s5446_s2 + $0x1ec] ss:$24 sps:$4 sm:$0xff]  }
 0x17a   : > { %7824 = vst [vmem:[#allocation45_spill] sm:$0xff] %v5921_v5 }
 0x17b   : > { %2035 = vmatpush1.bf16.msra.mxu0 %v5897_v18 }
 0x17c   : > { %2076 = vmatpush1.bf16.msra.mxu1 %v5900_v1  ;;  %2036 = vmatprep.subr.bf16.mxu0 %v5905_v50  ;;  %v5929_v1 = vld [vmem:[%s5446_s2 + $0x1e8] ss:$24 sps:$4 sm:$0xff]  }
 0x17d   : > { %2077 = vmatprep.subr.bf16.mxu1 %v5908_v63  ;;  %7826 = vst [vmem:[#allocation47_spill] sm:$0xff] %v5929_v1  ;;  %v5937_v63 = vld [vmem:[%s5446_s2 + $0x21c] ss:$24 sps:$4 sm:$0xff]  }
 0x17e   : > { %7828 = vst [vmem:[#allocation49_spill] sm:$0xff] %v5937_v63 }
 0x17f   : > { %2037 = vmatpush1.bf16.msra.mxu0 %v5913_v7 }
 0x180   : > { %2078 = vmatpush1.bf16.msra.mxu1 %v5916_v59  ;;  %2038 = vmatprep.subr.bf16.mxu0 %v5921_v5  ;;  %v5945_v59 = vld [vmem:[%s5446_s2 + $0x218] ss:$24 sps:$4 sm:$0xff]  }
 0x181   : > { %2079 = vmatprep.subr.bf16.mxu1 %v5924_v20  ;;  %7830 = vst [vmem:[#allocation51_spill] sm:$0xff] %v5945_v59  ;;  %v5953_v20 = vld [vmem:[%s5446_s2 + $0x24c] ss:$24 sps:$4 sm:$0xff]  }
 0x182   : > { %7832 = vst [vmem:[#allocation53_spill] sm:$0xff] %v5953_v20 }
 0x183   : > { %2039 = vmatpush1.bf16.msra.mxu0 %v5929_v1 }
 0x184   : > { %2080 = vmatpush1.bf16.msra.mxu1 %v5932_v53  ;;  %2040 = vmatprep.subr.bf16.mxu0 %v5937_v63  ;;  %v5961_v53 = vld [vmem:[%s5446_s2 + $0x248] ss:$24 sps:$4 sm:$0xff]  }
 0x185   : > { %2081 = vmatprep.subr.bf16.mxu1 %v5940_v11  ;;  %7834 = vst [vmem:[#allocation55_spill] sm:$0xff] %v5961_v53  ;;  %v5969_v11 = vld [vmem:[%s5446_s2 + $0x27c] ss:$24 sps:$4 sm:$0xff]  }
 0x186   : > { %7836 = vst [vmem:[#allocation57_spill] sm:$0xff] %v5969_v11 }
 0x187   : > { %2041 = vmatpush1.bf16.msra.mxu0 %v5945_v59 }
 0x188   : > { %2082 = vmatpush1.bf16.msra.mxu1 %v5948_v46  ;;  %2042 = vmatprep.subr.bf16.mxu0 %v5953_v20  ;;  %v5977_v46 = vld [vmem:[%s5446_s2 + $0x278] ss:$24 sps:$4 sm:$0xff]  }
 0x189   : > { %2083 = vmatprep.subr.bf16.mxu1 %v5956_v41  ;;  %7838 = vst [vmem:[#allocation59_spill] sm:$0xff] %v5977_v46  ;;  %v5985_v41 = vld [vmem:[%s5446_s2 + $0x2ac] ss:$24 sps:$4 sm:$0xff]  }
 0x18a   : > { %7839 = vst [vmem:[#allocation60_spill] sm:$0xff] %v5985_v41 }
 0x18b   : > { %2043 = vmatpush1.bf16.msra.mxu0 %v5961_v53 }
 0x18c   : > { %2084 = vmatpush1.bf16.msra.mxu1 %v5964_v36  ;;  %2044 = vmatprep.subr.bf16.mxu0 %v5969_v11  ;;  %v5996_v36 = vld [vmem:[%s5446_s2 + $0x2b0] ss:$24 sps:$4 sm:$0xff]  }
 0x18d   : > { %2085 = vmatprep.subr.bf16.mxu1 %v5972_v31  ;;  %v6009_v31 = vld [vmem:[%s5446_s2 + $0x2d8] ss:$24 sps:$4 sm:$0xff]  }
 0x18e   : > { %7842 = vst [vmem:[#allocation63_spill] sm:$0xff] %v6009_v31 }
 0x18f   : > { %2045 = vmatpush1.bf16.msra.mxu0 %v5977_v46  ;;  %v6012_v46 = vld [vmem:[%s5446_s2 + $0x2e0] ss:$24 sps:$4 sm:$0xff]  }
 0x190   : > { %2086 = vmatpush1.bf16.msra.mxu1 %v5980_v27  ;;  %2046 = vmatprep.subr.bf16.mxu0 %v5985_v41 }
 0x191   : > { %2087 = vmatprep.subr.bf16.mxu1 %v5988_v21 }
 0x193   : > { %2047 = vmatpush1.bf16.msra.mxu0 %v5993_v16 }
 0x194   : > { %2088 = vmatpush1.bf16.msra.mxu1 %v5996_v36  ;;  %2048 = vmatprep.subr.bf16.mxu0 %v6001_v12 }
 0x195   : > { %2089 = vmatprep.subr.bf16.mxu1 %v6004_v8 }
 0x197   : > { %2049 = vmatpush1.bf16.msra.mxu0 %v6009_v31 }
 0x198   : > { %2090 = vmatpush1.bf16.msra.mxu1 %v6012_v46  ;;  %2153 = vmatprep.subr.bf16.mxu0 %v5564_v10 }
 0x199   : > { %2194 = vmatprep.subr.bf16.mxu1 %v5751_v29 }
 0x19a   : > { %2051 = vmatmul.mubr.bf16.vlgmr.msra.gmra.mrb[32].mxu0 %v7819_v44 }
 0x19b   : > { %2092 = vmatmul.mubr.bf16.vlgmr.msra.gmra.mrb[20].mxu1 %v7819_v44  ;;  %2154 = vmatpush1.bf16.msra.mxu0 %v5570_v13  ;;  %v7843_v13 = vld [vmem:[#allocation19_spill] sm:$0xff] }
 0x19c   : > { %2195 = vmatpush1.bf16.msra.mxu1 %v5758_v34  ;;  %2155 = vmatprep.subr.bf16.mxu0 %v5575_v15  ;;  %v7844_v15 = vld [vmem:[#allocation59_spill] sm:$0xff] }
 0x19d   : > { %2196 = vmatprep.subr.bf16.mxu1 %v5765_v39 }
 0x19f   : > { %2156 = vmatpush1.bf16.msra.mxu0 %v5582_v17  ;;  %v7845_v17 = vld [vmem:[#allocation20_spill] sm:$0xff] }
 0x1a0   : > { %2197 = vmatpush1.bf16.msra.mxu1 %v5777_v43  ;;  %2157 = vmatprep.subr.bf16.mxu0 %v5587_v19  ;;  %v7846_v19 = vld [vmem:[#allocation21_spill] sm:$0xff] }
 0x1a1   : > { %2198 = vmatprep.subr.bf16.mxu1 %v5785_v48 }
 0x1a3   : > { %2158 = vmatpush1.bf16.msra.mxu0 %v5595_v22  ;;  %v7847_v22 = vld [vmem:[#allocation22_spill] sm:$0xff] }
 0x1a4   : > { %2199 = vmatpush1.bf16.msra.mxu1 %v5795_v51  ;;  %2159 = vmatprep.subr.bf16.mxu0 %v5603_v25  ;;  %v7848_v25 = vld [vmem:[#allocation23_spill] sm:$0xff] }
 0x1a5   : > { %2200 = vmatprep.subr.bf16.mxu1 %v5803_v54 }
 0x1a7   : > { %2160 = vmatpush1.bf16.msra.mxu0 %v5612_v28  ;;  %v7849_v28 = vld [vmem:[#allocation24_spill] sm:$0xff] }
 0x1a8   : > { %2201 = vmatpush1.bf16.msra.mxu1 %v5812_v57  ;;  %2161 = vmatprep.subr.bf16.mxu0 %v5617_v30  ;;  %v591_v30 = vlaneseq }
 0x1a9   : > { %2202 = vmatprep.subr.bf16.mxu1 %v5820_v61 }
 0x1ab   : > { %2162 = vmatpush1.bf16.msra.mxu0 %v5624_v32  ;;  %v6086_v32 = vshrl.u32 %v591_v30, 7 }
 0x1ac   : > { %2203 = vmatpush1.bf16.msra.mxu1 %v5829_v24  ;;  %2163 = vmatprep.subr.bf16.mxu0 %v5631_v35 }
 0x1ad   : > { %2204 = vmatprep.subr.bf16.mxu1 %v5837_v3  ;;  %v7619_v35 = vsub.s32 3, %v6086_v32 }
 0x1af   : > { %2164 = vmatpush1.bf16.msra.mxu0 %v5635_v37  ;;  %v7621_v37 = vsub.s32 0, %v6086_v32 }
 0x1b0   : > { %2205 = vmatpush1.bf16.msra.mxu1 %v5846_v26  ;;  %2165 = vmatprep.subr.bf16.mxu0 %v5645_v40  ;;  %v7620_v40 = vsub.s32 2, %v6086_v32 }
 0x1b1   : > { %2206 = vmatprep.subr.bf16.mxu1 %v5854_v9 }
 0x1b3   : > { %2166 = vmatpush1.bf16.msra.mxu0 %v5651_v42  ;;  %v6092_v42 = vld [vmem:[%s5452_s5] sm:$0x3f] }
 0x1b4   : > { %2207 = vmatpush1.bf16.msra.mxu1 %v5863_v33  ;;  %2167 = vmatprep.subr.bf16.mxu0 %v5659_v45  ;;  %v7625_v45 = vsub.s32 1, %v6086_v32 }
 0x1b5   : > { %2208 = vmatprep.subr.bf16.mxu1 %v5871_v23 }
 0x1b7   : > { %2168 = vmatpush1.bf16.msra.mxu0 %v5666_v47  ;;  %v6098_v47 = vrot.slane %v6092_v42, %v7619_v35 }
 0x1b8   : > { %2209 = vmatpush1.bf16.msra.mxu1 %v5880_v38  ;;  %2169 = vmatprep.subr.bf16.mxu0 %v5671_v49  ;;  %v6108_v49 = vrot.slane %v6092_v42, %v7620_v40 }
 0x1b9   : > { %2210 = vmatprep.subr.bf16.mxu1 %v5888_v14 }
 0x1bb   : > { %2170 = vmatpush1.bf16.msra.mxu0 %v5677_v52 }
 0x1bc   : > { %2211 = vmatpush1.bf16.msra.mxu1 %v5897_v18  ;;  %2171 = vmatprep.subr.bf16.mxu0 %v5683_v55 }
 0x1bd   : > { %2212 = vmatprep.subr.bf16.mxu1 %v5905_v50 }
 0x1bf   : > { %2172 = vmatpush1.bf16.msra.mxu0 %v5688_v56 }
 0x1c0   : > { %2213 = vmatpush1.bf16.msra.mxu1 %v5913_v7  ;;  %2173 = vmatprep.subr.bf16.mxu0 %v5693_v58 }
 0x1c1   : > { %2214 = vmatprep.subr.bf16.mxu1 %v5921_v5 }
 0x1c3   : > { %2174 = vmatpush1.bf16.msra.mxu0 %v5697_v60  ;;  %v6119_v60 = vrot.slane %v6092_v42, %v7625_v45 }
 0x1c4   : > { %2215 = vmatpush1.bf16.msra.mxu1 %v5929_v1  ;;  %2175 = vmatprep.subr.bf16.mxu0 %v5703_v62 }
 0x1c5   : > { %2216 = vmatprep.subr.bf16.mxu1 %v5937_v63 }
 0x1c7   : > { %2176 = vmatpush1.bf16.msra.mxu0 %v5708_v0 }
 0x1c8   : > { %2217 = vmatpush1.bf16.msra.mxu1 %v5945_v59  ;;  %2177 = vmatprep.subr.bf16.mxu0 %v5713_v2 }
 0x1c9   : > { %2218 = vmatprep.subr.bf16.mxu1 %v5953_v20 }
 0x1cb   : > { %2178 = vmatpush1.bf16.msra.mxu0 %v5717_v4 }
 0x1cc   : > { %2219 = vmatpush1.bf16.msra.mxu1 %v5961_v53  ;;  %2179 = vmatprep.subr.bf16.mxu0 %v5723_v6 }
 0x1cd   : > { %2220 = vmatprep.subr.bf16.mxu1 %v5969_v11 }
 0x1cf   : > { %2180 = vmatpush1.bf16.msra.mxu0 %v7843_v13 }
 0x1d0   : > { %2221 = vmatpush1.bf16.msra.mxu1 %v7844_v15  ;;  %2181 = vmatprep.subr.bf16.mxu0 %v7845_v17 }
 0x1d1   : > { %2222 = vmatprep.subr.bf16.mxu1 %v5985_v41 }
 0x1d3   : > { %2182 = vmatpush1.bf16.msra.mxu0 %v7846_v19 }
 0x1d4   : > { %2223 = vmatpush1.bf16.msra.mxu1 %v5993_v16  ;;  %2183 = vmatprep.subr.bf16.mxu0 %v7847_v22 }
 0x1d5   : > { %2224 = vmatprep.subr.bf16.mxu1 %v6001_v12 }
 0x1d7   : > { %2184 = vmatpush1.bf16.msra.mxu0 %v7848_v25 }
 0x1d8   : > { %2225 = vmatpush1.bf16.msra.mxu1 %v6009_v31  ;;  %2235 = vmatprep.subr.bf16.mxu0 %v7849_v28 }
 0x1d9   : > { %2329 = vmatprep.subr.bf16.mxu1 %v5564_v10  ;;  %v6103_v10 = vrot.slane %v6092_v42, %v7621_v37 }
 0x1ed   : > { %v6110_v52 = vpop.f32.mrb[0].mxu0 }
 0x1ee   : > { %v6112_v55 = vpop.f32.mrb[0].mxu1  ;;  %v6114_v56 = vpop.f32.mrb[1].mxu0  ;;  %v1136_v15 = vadd.f32 %v6110_v52, %v6103_v10 }
 0x1ef   : > { %v1210_v58 = vpop.f32.mrb[1].mxu1  ;;  %v1139_v62 = vpop.f32.mrb[2].mxu0 }
 0x1f0   : > { %v6122_v44 = vadd.f32 %v1210_v58, %v6098_v47  ;;  %v1212_v30 = vpop.f32.mrb[2].mxu1  ;;  %v6125_v35 = vadd.f32 %v1139_v62, %v6103_v10  ;;  %v1141_v40 = vpop.f32.mrb[3].mxu0 }
 0x1f1   : > { %v6128_v37 = vadd.f32 %v1212_v30, %v6108_v49  ;;  %v1214_v31 = vpop.f32.mrb[3].mxu1  ;;  %v6131_v12 = vadd.f32 %v1141_v40, %v6119_v60 }
 0x1f2   : > { %7850 = vst [vmem:[#allocation19_spill] sm:$0xff] %v6122_v44  ;;  %7851 = vst [vmem:[#allocation20_spill] sm:$0xff] %v6125_v35  ;;  %v6134_v16 = vadd.f32 %v1214_v31, %v6098_v47 }
 0x1f3   : > { %7852 = vst [vmem:[#allocation21_spill] sm:$0xff] %v6128_v37  ;;  %7853 = vst [vmem:[#allocation22_spill] sm:$0xff] %v6131_v12 }
 0x1f4   : > { %7854 = vst [vmem:[#allocation23_spill] sm:$0xff] %v6134_v16 }
 0x1f5   : > { %v1145_v45 = vpop.f32.mrb[4].mxu0 }
 0x1f6   : > { %v1218_v41 = vpop.f32.mrb[4].mxu1  ;;  %v6137_v58 = vadd.f32 %v1145_v45, %v6103_v10  ;;  %v1147_v44 = vpop.f32.mrb[5].mxu0 }
 0x1f7   : > { %v6140_v62 = vadd.f32 %v1218_v41, %v6108_v49  ;;  %v1220_v35 = vpop.f32.mrb[5].mxu1  ;;  %v6143_v30 = vadd.f32 %v1147_v44, %v6119_v60  ;;  %v1149_v37 = vpop.f32.mrb[6].mxu0 }
 0x1f8   : > { %7855 = vst [vmem:[#allocation24_spill] sm:$0xff] %v6137_v58  ;;  %v6146_v40 = vadd.f32 %v1220_v35, %v6098_v47  ;;  %v1222_v12 = vpop.f32.mrb[6].mxu1  ;;  %v6149_v31 = vadd.f32 %v1149_v37, %v6103_v10  ;;  %v1151_v16 = vpop.f32.mrb[7].mxu0 }
 0x1f9   : > { %7856 = vst [vmem:[#allocation64_spill] sm:$0xff] %v6140_v62  ;;  %7857 = vst [vmem:[#allocation65_spill] sm:$0xff] %v6143_v30  ;;  %v6152_v45 = vadd.f32 %v1222_v12, %v6108_v49  ;;  %v1224_v58 = vpop.f32.mrb[7].mxu1  ;;  %v6155_v41 = vadd.f32 %v1151_v16, %v6119_v60 }
 0x1fa   : > { %7858 = vst [vmem:[#allocation66_spill] sm:$0xff] %v6146_v40  ;;  %7859 = vst [vmem:[#allocation67_spill] sm:$0xff] %v6149_v31  ;;  %v6158_v62 = vadd.f32 %v1224_v58, %v6098_v47 }
 0x1fb   : > { %7860 = vst [vmem:[#allocation68_spill] sm:$0xff] %v6152_v45  ;;  %7861 = vst [vmem:[#allocation69_spill] sm:$0xff] %v6155_v41 }
 0x1fc   : > { %7862 = vst [vmem:[#allocation70_spill] sm:$0xff] %v6158_v62 }
 0x1fd   : > { %v1155_v44 = vpop.f32.mrb[8].mxu0 }
 0x1fe   : > { %v1228_v30 = vpop.f32.mrb[8].mxu1  ;;  %v6161_v35 = vadd.f32 %v1155_v44, %v6103_v10  ;;  %v1157_v40 = vpop.f32.mrb[9].mxu0 }
 0x1ff   : > { %v6164_v37 = vadd.f32 %v1228_v30, %v6108_v49  ;;  %v1230_v31 = vpop.f32.mrb[9].mxu1  ;;  %v6167_v12 = vadd.f32 %v1157_v40, %v6119_v60  ;;  %v1159_v45 = vpop.f32.mrb[10].mxu0 }
 0x200   : > { %7863 = vst [vmem:[#allocation71_spill] sm:$0xff] %v6161_v35  ;;  %v6170_v16 = vadd.f32 %v1230_v31, %v6098_v47  ;;  %v1232_v41 = vpop.f32.mrb[10].mxu1  ;;  %v6173_v58 = vadd.f32 %v1159_v45, %v6103_v10  ;;  %v1161_v62 = vpop.f32.mrb[11].mxu0 }
 0x201   : > { %7864 = vst [vmem:[#allocation72_spill] sm:$0xff] %v6164_v37  ;;  %7865 = vst [vmem:[#allocation73_spill] sm:$0xff] %v6167_v12  ;;  %v6176_v44 = vadd.f32 %v1232_v41, %v6108_v49  ;;  %v1234_v35 = vpop.f32.mrb[11].mxu1  ;;  %v6179_v30 = vadd.f32 %v1161_v62, %v6119_v60 }
 0x202   : > { %7866 = vst [vmem:[#allocation74_spill] sm:$0xff] %v6170_v16  ;;  %7867 = vst [vmem:[#allocation75_spill] sm:$0xff] %v6173_v58  ;;  %v6182_v37 = vadd.f32 %v1234_v35, %v6098_v47 }
 0x203   : > { %7868 = vst [vmem:[#allocation76_spill] sm:$0xff] %v6176_v44  ;;  %7869 = vst [vmem:[#allocation77_spill] sm:$0xff] %v6179_v30 }
 0x204   : > { %7870 = vst [vmem:[#allocation78_spill] sm:$0xff] %v6182_v37 }
 0x205   : > { %v1165_v40 = vpop.f32.mrb[12].mxu0 }
 0x206   : > { %v1238_v12 = vpop.f32.mrb[12].mxu1  ;;  %v6185_v31 = vadd.f32 %v1165_v40, %v6103_v10  ;;  %v1167_v16 = vpop.f32.mrb[13].mxu0 }
 0x207   : > { %v6188_v45 = vadd.f32 %v1238_v12, %v6108_v49  ;;  %v1240_v58 = vpop.f32.mrb[13].mxu1  ;;  %v6191_v41 = vadd.f32 %v1167_v16, %v6119_v60  ;;  %v1169_v44 = vpop.f32.mrb[14].mxu0  ;;  %v609_v16 = vsub.s32 4, %v6086_v32 }
 0x208   : > { %7871 = vst [vmem:[#allocation79_spill] sm:$0xff] %v6185_v31  ;;  %v6194_v62 = vadd.f32 %v1240_v58, %v6098_v47  ;;  %v1242_v35 = vpop.f32.mrb[14].mxu1  ;;  %v6197_v30 = vadd.f32 %v1169_v44, %v6103_v10  ;;  %v1171_v37 = vpop.f32.mrb[15].mxu0  ;;  %v7630_v58 = vsub.s32 5, %v6086_v32  ;;  %v7878_v44 = vsub.s32 0, %v6086_v32 }
 0x209   : > { %7872 = vst [vmem:[#allocation80_spill] sm:$0xff] %v6188_v45  ;;  %7873 = vst [vmem:[#allocation81_spill] sm:$0xff] %v6191_v41  ;;  %v6200_v40 = vadd.f32 %v1242_v35, %v6108_v49  ;;  %v6202_v31 = vpop.f32.mrb[15].mxu1  ;;  %v6205_v12 = vadd.f32 %v1171_v37, %v6119_v60  ;;  %v6209_v45 = vld [vmem:[%s5454_s20] sm:$0x3f]  ;;  %v610_v41 = vrot.slane %v6092_v42, %v609_v16  ;;  %v7880_v37 = vsub.s32 1, %v6086_v32 }
 0x20a   : > { %7874 = vst [vmem:[#allocation82_spill] sm:$0xff] %v6194_v62  ;;  %7875 = vst [vmem:[#allocation83_spill] sm:$0xff] %v6197_v30  ;;  %v6216_v30 = vrot.slane %v6209_v45, %v7878_v44  ;;  %v6221_v35 = vrot.slane %v6092_v42, %v7630_v58  ;;  %v1138_v42 = vadd.f32 %v6114_v56, %v6119_v60 }
 0x20b   : > { %7876 = vst [vmem:[#allocation84_spill] sm:$0xff] %v6200_v40  ;;  %7877 = vst [vmem:[#allocation85_spill] sm:$0xff] %v6205_v12  ;;  %v6226_v40 = vrot.slane %v6209_v45, %v7880_v37 }
 0x20c   : > { %7879 = vst [vmem:[#allocation86_spill] sm:$0xff] %v6216_v30 }
 0x20d   : > { %7881 = vst [vmem:[#allocation87_spill] sm:$0xff] %v6226_v40 }
 0x22d   : > { %v1281_v12 = vpop.f32.mrb[16].mxu0 }
 0x22e   : > { %v2011_v62 = vpop.f32.mrb[16].mxu1  ;;  %v6230_v11 = vadd.f32 %v1281_v12, %v610_v41  ;;  %v1283_v53 = vpop.f32.mrb[17].mxu0 }
 0x22f   : > { %v2012_v44 = vadd.f32 %v2011_v62, %v6216_v30  ;;  %v2013_v20 = vpop.f32.mrb[17].mxu1  ;;  %v6236_v58 = vadd.f32 %v1283_v53, %v6221_v35  ;;  %v1285_v59 = vpop.f32.mrb[18].mxu0 }
 0x230   : > { %7882 = vst [vmem:[#allocation88_spill] sm:$0xff] %v6230_v11  ;;  %v2014_v37 = vadd.f32 %v2013_v20, %v6226_v40  ;;  %v2015_v63 = vpop.f32.mrb[18].mxu1  ;;  %v6239_v5 = vadd.f32 %v1285_v59, %v610_v41  ;;  %v1287_v10 = vpop.f32.mrb[19].mxu0 }
 0x231   : > { %7883 = vst [vmem:[#allocation89_spill] sm:$0xff] %v6236_v58  ;;  %v2106_v1 = vadd.f32 %v2012_v44, %v1136_v15  ;;  %v2016_v52 = vpop.f32.mrb[19].mxu1  ;;  %v6242_v62 = vadd.f32 %v1287_v10, %v6221_v35 }
 0x232   : > { %7884 = vst [vmem:[#allocation90_spill] sm:$0xff] %v6239_v5  ;;  %v2107_v12 = vadd.f32 %v2014_v37, %v1138_v42 }
 0x233   : > { %7885 = vst [vmem:[#allocation91_spill] sm:$0xff] %v6242_v62 }
 0x235   : > { %v1291_v11 = vpop.f32.mrb[20].mxu0 }
 0x236   : > { %v6244_v30 = vadd.f32 %v1291_v11, %v610_v41  ;;  %v1293_v56 = vpop.f32.mrb[21].mxu0 }
 0x237   : > { %v6247_v53 = vadd.f32 %v1293_v56, %v6221_v35  ;;  %v1295_v60 = vpop.f32.mrb[22].mxu0 }
 0x238   : > { %7886 = vst [vmem:[#allocation92_spill] sm:$0xff] %v6244_v30  ;;  %v6249_v20 = vadd.f32 %v1295_v60, %v610_v41  ;;  %v1297_v63 = vpop.f32.mrb[23].mxu0  ;;  %v3991_v30 = vmul.f32 -1.442695, %v2107_v12 }
 0x239   : > { %7887 = vst [vmem:[#allocation93_spill] sm:$0xff] %v6247_v53  ;;  %v6252_v59 = vadd.f32 %v1297_v63, %v6221_v35  ;;  %v3990_v53 = vmul.f32 -1.442695, %v2106_v1 }
 0x23a   : > { %7888 = vst [vmem:[#allocation94_spill] sm:$0xff] %v6249_v20 }
 0x23b   : > { %7889 = vst [vmem:[#allocation95_spill] sm:$0xff] %v6252_v59  ;;  %4496 = vpow2.f32 %v3990_v53 }
 0x23c   : > { %4498 = vpow2.f32 %v3991_v30 }
 0x23d   : > { %v1301_v15 = vpop.f32.mrb[24].mxu0 }
 0x23e   : > { %v6254_v44 = vadd.f32 %v1301_v15, %v610_v41  ;;  %v1303_v42 = vpop.f32.mrb[25].mxu0 }
 0x23f   : > { %v6257_v37 = vadd.f32 %v1303_v42, %v6221_v35  ;;  %v1305_v11 = vpop.f32.mrb[26].mxu0 }
 0x240   : > { %7890 = vst [vmem:[#allocation96_spill] sm:$0xff] %v6254_v44  ;;  %v6259_v10 = vadd.f32 %v1305_v11, %v610_v41  ;;  %v1307_v52 = vpop.f32.mrb[27].mxu0  ;;  %v7896_v11 = vsub.s32 2, %v6086_v32 }
 0x241   : > { %7891 = vst [vmem:[#allocation97_spill] sm:$0xff] %v6257_v37  ;;  %v6262_v56 = vadd.f32 %v1307_v52, %v6221_v35 }
 0x242   : > { %7892 = vst [vmem:[#allocation98_spill] sm:$0xff] %v6259_v10  ;;  %v6272_v52 = vrot.slane %v6209_v45, %v7896_v11 }
 0x243   : > { %7893 = vst [vmem:[#allocation99_spill] sm:$0xff] %v6262_v56 }
 0x244   : > { %7897 = vst [vmem:[#allocation102_spill] sm:$0xff] %v6272_v52 }
 0x245   : > { %v1311_v60 = vpop.f32.mrb[28].mxu0  ;;  %v4497_v42 = vpop.eup %4496 }
 0x246   : > { %v6264_v58 = vadd.f32 %v1311_v60, %v610_v41  ;;  %v1313_v62 = vpop.f32.mrb[29].mxu0  ;;  %v2114_v59 = vadd.f32 1.0, %v4497_v42  ;;  %v6275_v60 = vrot.slane %v6209_v45, %v609_v16  ;;  %v4499_v37 = vpop.eup %4498  ;;  %v1245_v16 = vadd.f32 %v6202_v31, %v6098_v47 }
 0x247   : > { %v6267_v63 = vadd.f32 %v1313_v62, %v6221_v35  ;;  %v1315_v15 = vpop.f32.mrb[30].mxu0  ;;  %v7899_v62 = vsub.s32 3, %v6086_v32 }
 0x248   : > { %7894 = vst [vmem:[#allocation100_spill] sm:$0xff] %v6264_v58  ;;  %v1317_v5 = vpop.f32.mrb[31].mxu0  ;;  %4500 = vrcp.f32 %v2114_v59  ;;  %7898 = vst [vmem:[#allocation103_spill] sm:$0xff] %v6275_v60  ;;  %v1316_v12 = vadd.f32 %v1315_v15, %v610_v41 }
 0x249   : > { %7895 = vst [vmem:[#allocation101_spill] sm:$0xff] %v6267_v63  ;;  %v6280_v20 = vrot.slane %v6209_v45, %v7899_v62  ;;  %v1209_v62 = vadd.f32 %v6112_v55, %v6108_v49 }
 0x24b   : > { %7900 = vst [vmem:[#allocation104_spill] sm:$0xff] %v6280_v20 }
 0x252   : > { %v4501_v11 = vpop.eup %4500 }
 0x26d   : > { %v2052_v1 = vpop.f32.mrb[32].mxu0 }
 0x26e   : > { %v2093_v53 = vpop.f32.mrb[20].mxu1  ;;  %v2053_v30 = vadd.f32 %v2052_v1, %v6272_v52  ;;  %v2054_v42 = vpop.f32.mrb[33].mxu0  ;;  %v2115_v1 = vadd.f32 1.0, %v4499_v37 }
 0x26f   : > { %v2094_v59 = vadd.f32 %v2093_v53, %v6275_v60  ;;  %v2095_v44 = vpop.f32.mrb[21].mxu1  ;;  %v2055_v56 = vadd.f32 %v2054_v42, %v6280_v20  ;;  %v2056_v10 = vpop.f32.mrb[34].mxu0 }
 0x270   : > { %v2097_v63 = vpop.f32.mrb[22].mxu1  ;;  %v2120_v58 = vmul.f32 %v4501_v11, %v2053_v30  ;;  %v2057_v41 = vpop.f32.mrb[35].mxu0 }
 0x271   : > { %v2127_v40 = vadd.f32 %v2094_v59, %v1316_v12  ;;  %v2098_v15 = vpop.f32.mrb[23].mxu1  ;;  %v2126_v52 = vadd.f32 %v2055_v56, %v1245_v16  ;;  %v6316_v41 = vld [vmem:[%s5446_s2 + $0x34] ss:$24 sps:$4 sm:$0xff]  }
 0x272   : > { %v2121_v53 = vadd.f32 %v2120_v58, %v1209_v62  ;;  %v7901_v58 = vsub.s32 5, %v6086_v32  ;;  %v6312_v62 = vld [vmem:[%s5446_s2] ss:$24 sps:$4 sm:$0xff]  }
 0x273   : > { %v3992_v60 = vmul.f32 -1.442695, %v2126_v52  ;;  %v3993_v47 = vmul.f32 -1.442695, %v2127_v40  ;;  %v7904_v15 = vld [vmem:[#allocation27_spill] sm:$0xff] }
 0x274   : > { %4502 = vtanh.f32 %v2121_v53  ;;  %v6299_v37 = vrot.slane %v6209_v45, %v7901_v58  ;;  %v6322_v53 = vld [vmem:[%s5446_s2 + $0x30] ss:$24 sps:$4 sm:$0xff]   ;;  %v7908_v58 = vld [vmem:[#allocation31_spill] sm:$0xff] }
 0x275   : > { %4504 = vrcp.f32 %v2115_v1  ;;  %v7905_v1 = vld [vmem:[#allocation28_spill] sm:$0xff] }
 0x276   : > { %4506 = vpow2.f32 %v3992_v60  ;;  %v2096_v56 = vadd.f32 %v2095_v44, %v6299_v37  ;;  %v1318_v60 = vadd.f32 %v1317_v5, %v6221_v35  ;;  %v7902_v5 = vld [vmem:[#allocation25_spill] sm:$0xff]  ;;  %v7903_v35 = vld [vmem:[#allocation26_spill] sm:$0xff] }
 0x277   : > { %4508 = vpow2.f32 %v3993_v47  ;;  %v6326_v47 = vld [vmem:[%s5446_s2 + $0x64] ss:$24 sps:$4 sm:$0xff]  }
 0x27e   : > { %v4503_v7 = vpop.eup %4502 }
 0x27f   : > { %v4505_v31 = vpop.eup %4504  ;;  %v2123_v42 = vsub.f32 0.0, %v4503_v7 }
 0x280   : > { %v4507_v10 = vpop.eup %4506 }
 0x281   : > { %v2134_v63 = vadd.f32 1.0, %v4507_v10  ;;  %v2124_v20 = vmul.f32 %v4505_v31, %v2123_v42  ;;  %v4509_v40 = vpop.eup %4508  ;;  %v7906_v31 = vld [vmem:[#allocation29_spill] sm:$0xff]  ;;  %v7907_v42 = vld [vmem:[#allocation30_spill] sm:$0xff] }
 0x282   : > { %v6332_v10 = vld [vmem:[%s5446_s2 + $0x60] ss:$24 sps:$4 sm:$0xff]  }
 0x283   : > { %4510 = vrcp.f32 %v2134_v63  ;;  %v6289_v49 = vadd.f32 %v4503_v7, %v2124_v20  ;;  %v2135_v7 = vadd.f32 1.0, %v4509_v40  ;;  %v6336_v63 = vld [vmem:[%s5446_s2 + $0x94] ss:$24 sps:$4 sm:$0xff]   ;;  %v7909_v40 = vld [vmem:[#allocation32_spill] sm:$0xff] }
 0x285   : > { %v6293_v55 = vpack.c.bf16 %v6289_v49, %v6289_v49 }
 0x287   : > { %2147 = vst [vmem:[#allocation2] sm:$0xf] %v6293_v55 }
 0x28d   : > { %v4511_v52 = vpop.eup %4510 }
 0x28e   : > { %v2140_v12 = vmul.f32 %v4511_v52, %v2096_v56  ;;  %v6342_v56 = vld [vmem:[%s5446_s2 + $0x90] ss:$24 sps:$4 sm:$0xff]   ;;  %v6346_v52 = vld [vmem:[%s5446_s2 + $0xc4] ss:$24 sps:$4 sm:$0xff]  }
 0x290   : > { %v2141_v20 = vadd.f32 %v2140_v12, %v1318_v60  ;;  %v7910_v60 = vld [vmem:[#allocation33_spill] sm:$0xff]  ;;  %v7911_v12 = vld [vmem:[#allocation34_spill] sm:$0xff] }
 0x292   : > { %4512 = vtanh.f32 %v2141_v20  ;;  %v6356_v20 = vld [vmem:[%s5446_s2 + $0xf4] ss:$24 sps:$4 sm:$0xff]  }
 0x293   : > { %4514 = vrcp.f32 %v2135_v7  ;;  %v6352_v7 = vld [vmem:[%s5446_s2 + $0xc0] ss:$24 sps:$4 sm:$0xff]  }
 0x29c   : > { %v4513_v30 = vpop.eup %4512 }
 0x29d   : > { %v2143_v59 = vsub.f32 0.0, %v4513_v30  ;;  %v4515_v11 = vpop.eup %4514 }
 0x29f   : > { %v2144_v32 = vmul.f32 %v4515_v11, %v2143_v59  ;;  %v7913_v59 = vld [vmem:[#allocation36_spill] sm:$0xff] }
 0x2a0   : > { %v6362_v11 = vld [vmem:[%s5446_s2 + $0xf0] ss:$24 sps:$4 sm:$0xff]  }
 0x2a1   : > { %v6303_v16 = vadd.f32 %v4513_v30, %v2144_v32  ;;  %v7912_v30 = vld [vmem:[#allocation35_spill] sm:$0xff] }
 0x2a2   : > { %v6366_v32 = vld [vmem:[%s5446_s2 + $0x124] ss:$24 sps:$4 sm:$0xff]  }
 0x2a3   : > { %v2148_v45 = vpack.c.bf16 %v6303_v16, %v6303_v16 }
 0x2a5   : > { %v2150_v44 = vrot.slane %v2148_v45, 4  ;;  %2185 = vmatprep.mubr.bf16.mxu0 %v2148_v45  ;;  %2226 = vmatprep.mubr.bf16.mxu1 %v2148_v45 }
 0x2a6   : > { %2186 = vmatmul.mubr.bf16.vlgmr.msra.gmra.mrb[36].mxu0 %v6293_v55  ;;  %2227 = vmatmul.mubr.bf16.vlgmr.msra.gmra.mrb[24].mxu1 %v6293_v55 }
 0x2a7   : > { %2152 = vst [vmem:[#allocation2 + $0x38] sm:$0xf0] %v2150_v44  ;;  %2236 = vmatpush1.bf16.msra.mxu0 %v7902_v5  ;;  %2267 = vmatprep.mubr.bf16.mxu0 %v2148_v45  ;;  %v7914_v45 = vld [vmem:[#allocation37_spill] sm:$0xff]  ;;  %v7915_v44 = vld [vmem:[#allocation38_spill] sm:$0xff] }
 0x2a8   : > { %2237 = vmatprep.subr.bf16.mxu0 %v7903_v35  ;;  %2330 = vmatpush1.bf16.msra.mxu1 %v6312_v62  ;;  %v6372_v5 = vld [vmem:[%s5446_s2 + $0x120] ss:$24 sps:$4 sm:$0xff]   ;;  %v6376_v35 = vld [vmem:[%s5446_s2 + $0x154] ss:$24 sps:$4 sm:$0xff]  }
 0x2a9   : > { %2331 = vmatprep.subr.bf16.mxu1 %v6316_v41 }
 0x2ab   : > { %2238 = vmatpush1.bf16.msra.mxu0 %v7904_v15  ;;  %v7916_v15 = vld [vmem:[#allocation39_spill] sm:$0xff] }
 0x2ac   : > { %2239 = vmatprep.subr.bf16.mxu0 %v7905_v1  ;;  %2332 = vmatpush1.bf16.msra.mxu1 %v6322_v53  ;;  %v7917_v1 = vld [vmem:[#allocation40_spill] sm:$0xff] }
 0x2ad   : > { %2333 = vmatprep.subr.bf16.mxu1 %v6326_v47 }
 0x2af   : > { %2240 = vmatpush1.bf16.msra.mxu0 %v7906_v31  ;;  %v6382_v31 = vld [vmem:[%s5446_s2 + $0x150] ss:$24 sps:$4 sm:$0xff]  }
 0x2b0   : > { %2241 = vmatprep.subr.bf16.mxu0 %v7907_v42  ;;  %2334 = vmatpush1.bf16.msra.mxu1 %v6332_v10  ;;  %v6386_v42 = vld [vmem:[%s5446_s2 + $0x184] ss:$24 sps:$4 sm:$0xff]  }
 0x2b1   : > { %2335 = vmatprep.subr.bf16.mxu1 %v6336_v63 }
 0x2b3   : > { %2242 = vmatpush1.bf16.msra.mxu0 %v7908_v58  ;;  %v7918_v58 = vld [vmem:[#allocation41_spill] sm:$0xff] }
 0x2b4   : > { %2243 = vmatprep.subr.bf16.mxu0 %v7909_v40  ;;  %2336 = vmatpush1.bf16.msra.mxu1 %v6342_v56  ;;  %v7919_v40 = vld [vmem:[#allocation42_spill] sm:$0xff] }
 0x2b5   : > { %2337 = vmatprep.subr.bf16.mxu1 %v6346_v52 }
 0x2b7   : > { %2244 = vmatpush1.bf16.msra.mxu0 %v7910_v60  ;;  %v6392_v60 = vld [vmem:[%s5446_s2 + $0x180] ss:$24 sps:$4 sm:$0xff]  }
 0x2b8   : > { %2245 = vmatprep.subr.bf16.mxu0 %v7911_v12  ;;  %2338 = vmatpush1.bf16.msra.mxu1 %v6352_v7  ;;  %v6396_v12 = vld [vmem:[%s5446_s2 + $0x1b4] ss:$24 sps:$4 sm:$0xff]  }
 0x2b9   : > { %2339 = vmatprep.subr.bf16.mxu1 %v6356_v20 }
 0x2bb   : > { %2246 = vmatpush1.bf16.msra.mxu0 %v7912_v30  ;;  %v7920_v30 = vld [vmem:[#allocation44_spill] sm:$0xff] }
 0x2bc   : > { %2247 = vmatprep.subr.bf16.mxu0 %v7913_v59  ;;  %2340 = vmatpush1.bf16.msra.mxu1 %v6362_v11  ;;  %v7921_v59 = vld [vmem:[#allocation46_spill] sm:$0xff] }
 0x2bd   : > { %2341 = vmatprep.subr.bf16.mxu1 %v6366_v32 }
 0x2bf   : > { %2248 = vmatpush1.bf16.msra.mxu0 %v7914_v45  ;;  %v6402_v45 = vld [vmem:[%s5446_s2 + $0x1b0] ss:$24 sps:$4 sm:$0xff]  }
 0x2c0   : > { %2249 = vmatprep.subr.bf16.mxu0 %v7915_v44  ;;  %2342 = vmatpush1.bf16.msra.mxu1 %v6372_v5  ;;  %7922 = vst [vmem:[#allocation25_spill] sm:$0xff] %v6402_v45  ;;  %v6406_v44 = vld [vmem:[%s5446_s2 + $0x1e4] ss:$24 sps:$4 sm:$0xff]  }
 0x2c1   : > { %2343 = vmatprep.subr.bf16.mxu1 %v6376_v35  ;;  %7923 = vst [vmem:[#allocation26_spill] sm:$0xff] %v6406_v44 }
 0x2c3   : > { %2250 = vmatpush1.bf16.msra.mxu0 %v7916_v15  ;;  %v7924_v15 = vld [vmem:[#allocation48_spill] sm:$0xff] }
 0x2c4   : > { %2251 = vmatprep.subr.bf16.mxu0 %v7917_v1  ;;  %2344 = vmatpush1.bf16.msra.mxu1 %v6382_v31  ;;  %v7925_v1 = vld [vmem:[#allocation50_spill] sm:$0xff] }
 0x2c5   : > { %2345 = vmatprep.subr.bf16.mxu1 %v6386_v42 }
 0x2c7   : > { %2252 = vmatpush1.bf16.msra.mxu0 %v7918_v58  ;;  %v6412_v58 = vld [vmem:[%s5446_s2 + $0x1e0] ss:$24 sps:$4 sm:$0xff]  }
 0x2c8   : > { %2253 = vmatprep.subr.bf16.mxu0 %v7919_v40  ;;  %2346 = vmatpush1.bf16.msra.mxu1 %v6392_v60  ;;  %7926 = vst [vmem:[#allocation27_spill] sm:$0xff] %v6412_v58  ;;  %v6416_v40 = vld [vmem:[%s5446_s2 + $0x214] ss:$24 sps:$4 sm:$0xff]  }
 0x2c9   : > { %2347 = vmatprep.subr.bf16.mxu1 %v6396_v12  ;;  %7927 = vst [vmem:[#allocation28_spill] sm:$0xff] %v6416_v40 }
 0x2cb   : > { %2254 = vmatpush1.bf16.msra.mxu0 %v7920_v30  ;;  %v7928_v30 = vld [vmem:[#allocation52_spill] sm:$0xff] }
 0x2cc   : > { %2255 = vmatprep.subr.bf16.mxu0 %v7921_v59  ;;  %2348 = vmatpush1.bf16.msra.mxu1 %v6402_v45  ;;  %v7929_v59 = vld [vmem:[#allocation54_spill] sm:$0xff] }
 0x2cd   : > { %2349 = vmatprep.subr.bf16.mxu1 %v6406_v44  ;;  %v7930_v44 = vld [vmem:[#allocation56_spill] sm:$0xff] }
 0x2cf   : > { %2256 = vmatpush1.bf16.msra.mxu0 %v7924_v15  ;;  %v7931_v15 = vld [vmem:[#allocation58_spill] sm:$0xff] }
 0x2d0   : > { %2257 = vmatprep.subr.bf16.mxu0 %v7925_v1  ;;  %2350 = vmatpush1.bf16.msra.mxu1 %v6412_v58 }
 0x2d1   : > { %2351 = vmatprep.subr.bf16.mxu1 %v6416_v40 }
 0x2d3   : > { %2258 = vmatpush1.bf16.msra.mxu0 %v7928_v30 }
 0x2d4   : > { %2259 = vmatprep.subr.bf16.mxu0 %v7929_v59  ;;  %2352 = vmatpush1.bf16.msra.mxu1 %v5708_v0  ;;  %v7932_v0 = vld [vmem:[#allocation43_spill] sm:$0xff] }
 0x2d5   : > { %2353 = vmatprep.subr.bf16.mxu1 %v5713_v2  ;;  %v7933_v2 = vld [vmem:[#allocation45_spill] sm:$0xff] }
 0x2d7   : > { %2260 = vmatpush1.bf16.msra.mxu0 %v7930_v44 }
 0x2d8   : > { %2261 = vmatprep.subr.bf16.mxu0 %v7931_v15  ;;  %2354 = vmatpush1.bf16.msra.mxu1 %v5717_v4  ;;  %v7934_v4 = vld [vmem:[#allocation47_spill] sm:$0xff] }
 0x2d9   : > { %2355 = vmatprep.subr.bf16.mxu1 %v5723_v6  ;;  %v7935_v6 = vld [vmem:[#allocation49_spill] sm:$0xff] }
 0x2db   : > { %2262 = vmatpush1.bf16.msra.mxu0 %v5980_v27 }
 0x2dc   : > { %2263 = vmatprep.subr.bf16.mxu0 %v5988_v21  ;;  %2356 = vmatpush1.bf16.msra.mxu1 %v7843_v13 }
 0x2dd   : > { %2357 = vmatprep.subr.bf16.mxu1 %v7845_v17 }
 0x2df   : > { %2264 = vmatpush1.bf16.msra.mxu0 %v5996_v36 }
 0x2e0   : > { %2265 = vmatprep.subr.bf16.mxu0 %v6004_v8  ;;  %2358 = vmatpush1.bf16.msra.mxu1 %v7846_v19 }
 0x2e1   : > { %2359 = vmatprep.subr.bf16.mxu1 %v7847_v22  ;;  %v7949_v22 = vld [vmem:[#allocation20_spill] sm:$0xff] }
 0x2e3   : > { %2266 = vmatpush1.bf16.msra.mxu0 %v6012_v46 }
 0x2e4   : > { %2370 = vmatprep.subr.bf16.mxu0 %v5751_v29  ;;  %2360 = vmatpush1.bf16.msra.mxu1 %v7848_v25  ;;  %v7936_v29 = vld [vmem:[#allocation51_spill] sm:$0xff] }
 0x2e5   : > { %2411 = vmatprep.subr.bf16.mxu1 %v7849_v28 }
 0x2e6   : > { %2268 = vmatmul.mubr.bf16.vlgmr.msra.gmra.mrb[40].mxu0 %v6293_v55 }
 0x2e7   : > { %2371 = vmatpush1.bf16.msra.mxu0 %v5758_v34  ;;  %v7937_v34 = vld [vmem:[#allocation53_spill] sm:$0xff] }
 0x2e8   : > { %2372 = vmatprep.subr.bf16.mxu0 %v5765_v39  ;;  %v7938_v39 = vld [vmem:[#allocation55_spill] sm:$0xff] }
 0x2eb   : > { %2373 = vmatpush1.bf16.msra.mxu0 %v5777_v43  ;;  %v7939_v43 = vld [vmem:[#allocation57_spill] sm:$0xff] }
 0x2ec   : > { %2374 = vmatprep.subr.bf16.mxu0 %v5785_v48  ;;  %v7940_v48 = vld [vmem:[#allocation59_spill] sm:$0xff] }
 0x2ef   : > { %2375 = vmatpush1.bf16.msra.mxu0 %v5795_v51  ;;  %v7941_v51 = vld [vmem:[#allocation60_spill] sm:$0xff] }
 0x2f0   : > { %2376 = vmatprep.subr.bf16.mxu0 %v5803_v54  ;;  %v7943_v54 = vld [vmem:[#allocation62_spill] sm:$0xff] }
 0x2f3   : > { %2377 = vmatpush1.bf16.msra.mxu0 %v5812_v57  ;;  %v7944_v57 = vld [vmem:[#allocation63_spill] sm:$0xff] }
 0x2f4   : > { %2378 = vmatprep.subr.bf16.mxu0 %v5820_v61  ;;  %v6472_v61 = vld [vmem:[%s5446_s2 + $0x4] ss:$24 sps:$4 sm:$0xff]  }
 0x2f5   : > { %7945 = vst [vmem:[#allocation29_spill] sm:$0xff] %v6472_v61 }
 0x2f7   : > { %2379 = vmatpush1.bf16.msra.mxu0 %v5829_v24 }
 0x2f8   : > { %2380 = vmatprep.subr.bf16.mxu0 %v5837_v3 }
 0x2fb   : > { %2381 = vmatpush1.bf16.msra.mxu0 %v5846_v26  ;;  %v7946_v26 = vld [vmem:[#allocation86_spill] sm:$0xff] }
 0x2fc   : > { %2382 = vmatprep.subr.bf16.mxu0 %v5854_v9 }
 0x2ff   : > { %2383 = vmatpush1.bf16.msra.mxu0 %v5863_v33 }
 0x300   : > { %2384 = vmatprep.subr.bf16.mxu0 %v5871_v23 }
 0x303   : > { %2385 = vmatpush1.bf16.msra.mxu0 %v5880_v38  ;;  %v7948_v38 = vld [vmem:[#allocation104_spill] sm:$0xff] }
 0x304   : > { %2386 = vmatprep.subr.bf16.mxu0 %v5888_v14 }
 0x307   : > { %2387 = vmatpush1.bf16.msra.mxu0 %v5897_v18  ;;  %v7947_v18 = vld [vmem:[#allocation87_spill] sm:$0xff] }
 0x308   : > { %2388 = vmatprep.subr.bf16.mxu0 %v5905_v50  ;;  %v7942_v50 = vld [vmem:[#allocation61_spill] sm:$0xff] }
 0x30b   : > { %2389 = vmatpush1.bf16.msra.mxu0 %v7932_v0  ;;  %v7950_v0 = vld [vmem:[#allocation22_spill] sm:$0xff] }
 0x30c   : > { %2390 = vmatprep.subr.bf16.mxu0 %v7933_v2 }
 0x30f   : > { %2391 = vmatpush1.bf16.msra.mxu0 %v7934_v4  ;;  %v7951_v4 = vld [vmem:[#allocation82_spill] sm:$0xff] }
 0x310   : > { %2392 = vmatprep.subr.bf16.mxu0 %v7935_v6 }
 0x313   : > { %2393 = vmatpush1.bf16.msra.mxu0 %v7936_v29 }
 0x314   : > { %2394 = vmatprep.subr.bf16.mxu0 %v7937_v34 }
 0x317   : > { %2395 = vmatpush1.bf16.msra.mxu0 %v7938_v39 }
 0x318   : > { %2396 = vmatprep.subr.bf16.mxu0 %v7939_v43 }
 0x31b   : > { %2397 = vmatpush1.bf16.msra.mxu0 %v7940_v48 }
 0x31c   : > { %2398 = vmatprep.subr.bf16.mxu0 %v7941_v51  ;;  %v7952_v51 = vld [vmem:[#allocation102_spill] sm:$0xff] }
 0x31f   : > { %2399 = vmatpush1.bf16.msra.mxu0 %v7942_v50 }
 0x320   : > { %2400 = vmatprep.subr.bf16.mxu0 %v7943_v54 }
 0x323   : > { %2401 = vmatpush1.bf16.msra.mxu0 %v7944_v57 }
 0x324   : > { %2505 = vmatprep.subr.bf16.mxu0 %v6472_v61 }
 0x379   : > { %v2187_v24 = vpop.f32.mrb[36].mxu0  ;;  %v2228_v3 = vpop.f32.mrb[24].mxu1 }
 0x37a   : > { %v2188_v9 = vadd.f32 %v2187_v24, %v7946_v26  ;;  %v2189_v14 = vpop.f32.mrb[37].mxu0  ;;  %v2230_v33 = vpop.f32.mrb[25].mxu1  ;;  %v2229_v50 = vadd.f32 %v2228_v3, %v7952_v51  ;;  %v7953_v24 = vld [vmem:[#allocation21_spill] sm:$0xff] }
 0x37b   : > { %v2190_v23 = vadd.f32 %v2189_v14, %v7947_v18  ;;  %v2231_v13 = vadd.f32 %v2230_v33, %v7948_v38  ;;  %v2191_v17 = vpop.f32.mrb[38].mxu0  ;;  %v2232_v19 = vpop.f32.mrb[26].mxu1 }
 0x37c   : > { %v2282_v25 = vadd.f32 %v2188_v9, %v7949_v22  ;;  %v2192_v28 = vpop.f32.mrb[39].mxu0  ;;  %v2233_v55 = vpop.f32.mrb[27].mxu1 }
 0x37d   : > { %v2283_v2 = vadd.f32 %v2190_v23, %v7950_v0  ;;  %v2302_v6 = vadd.f32 %v2231_v13, %v7951_v4 }
 0x37e   : > { %v3994_v29 = vmul.f32 -1.442695, %v2282_v25 }
 0x37f   : > { %v3995_v34 = vmul.f32 -1.442695, %v2283_v2  ;;  %v3996_v33 = vmul.f32 -1.442695, %v2302_v6  ;;  %v7954_v2 = vld [vmem:[#allocation103_spill] sm:$0xff] }
 0x380   : > { %4516 = vpow2.f32 %v3994_v29 }
 0x381   : > { %4518 = vpow2.f32 %v3995_v34 }
 0x38a   : > { %v4517_v39 = vpop.eup %4516 }
 0x38b   : > { %v2290_v43 = vadd.f32 1.0, %v4517_v39  ;;  %v4519_v48 = vpop.eup %4518  ;;  %v7955_v39 = vld [vmem:[#allocation100_spill] sm:$0xff] }
 0x38c   : > { %v2291_v14 = vadd.f32 1.0, %v4519_v48 }
 0x38d   : > { %4520 = vrcp.f32 %v2290_v43 }
 0x397   : > { %v4521_v54 = vpop.eup %4520 }
 0x398   : > { %v2296_v57 = vmul.f32 %v4521_v54, %v2229_v50 }
 0x39a   : > { %v2297_v9 = vadd.f32 %v2296_v57, %v7953_v24  ;;  %v7956_v57 = vld [vmem:[#allocation101_spill] sm:$0xff] }
 0x39c   : > { %4522 = vtanh.f32 %v2297_v9 }
 0x39d   : > { %4524 = vrcp.f32 %v2291_v14 }
 0x39e   : > { %4526 = vpow2.f32 %v3996_v33 }
 0x3a6   : > { %v4523_v23 = vpop.eup %4522 }
 0x3a7   : > { %v2299_v13 = vsub.f32 %v6289_v49, %v4523_v23  ;;  %v4525_v17 = vpop.eup %4524 }
 0x3a8   : > { %v4527_v22 = vpop.eup %4526 }
 0x3a9   : > { %v2300_v19 = vmul.f32 %v4525_v17, %v2299_v13  ;;  %v2310_v28 = vadd.f32 1.0, %v4527_v22 }
 0x3ab   : > { %v6484_v25 = vadd.f32 %v4523_v23, %v2300_v19  ;;  %4528 = vrcp.f32 %v2310_v28  ;;  %v6503_v28 = vld [vmem:[%s5446_s2 + $0x10] ss:$24 sps:$4 sm:$0xff]  }
 0x3ad   : > { %v6488_v3 = vpack.c.bf16 %v6484_v25, %v6484_v25 }
 0x3af   : > { %v2324_v55 = vrot.slane %v6488_v3, 4 }
 0x3b1   : > { %2326 = vst [vmem:[#allocation2] sm:$0xf0] %v2324_v55  ;;  %v6513_v55 = vld [vmem:[%s5446_s2 + $0x40] ss:$24 sps:$4 sm:$0xff]  }
 0x3b5   : > { %v4529_v34 = vpop.eup %4528 }
 0x3b9   : > { %v2269_v0 = vpop.f32.mrb[40].mxu0 }
 0x3ba   : > { %v2270_v4 = vadd.f32 %v2269_v0, %v7954_v2  ;;  %v2271_v6 = vpop.f32.mrb[41].mxu0  ;;  %v6517_v0 = vld [vmem:[%s5446_s2 + $0x74] ss:$24 sps:$4 sm:$0xff]  }
 0x3bb   : > { %v2272_v49 = vadd.f32 %v2271_v6, %v6299_v37  ;;  %v2273_v29 = vpop.f32.mrb[42].mxu0  ;;  %v6527_v6 = vld [vmem:[%s5446_s2 + $0xa4] ss:$24 sps:$4 sm:$0xff]  }
 0x3bc   : > { %v2303_v43 = vadd.f32 %v2270_v4, %v7955_v39  ;;  %v2274_v48 = vpop.f32.mrb[43].mxu0  ;;  %v6523_v4 = vld [vmem:[%s5446_s2 + $0x70] ss:$24 sps:$4 sm:$0xff]   ;;  %v6537_v29 = vld [vmem:[%s5446_s2 + $0xd4] ss:$24 sps:$4 sm:$0xff]  }
 0x3bd   : > { %v2316_v50 = vmul.f32 %v4529_v34, %v2272_v49  ;;  %v6533_v49 = vld [vmem:[%s5446_s2 + $0xa0] ss:$24 sps:$4 sm:$0xff]   ;;  %v6543_v34 = vld [vmem:[%s5446_s2 + $0xd0] ss:$24 sps:$4 sm:$0xff]   ;;  %v6547_v39 = vld [vmem:[%s5446_s2 + $0x104] ss:$24 sps:$4 sm:$0xff]  }
 0x3be   : > { %v3997_v54 = vmul.f32 -1.442695, %v2303_v43  ;;  %v6553_v43 = vld [vmem:[%s5446_s2 + $0x100] ss:$24 sps:$4 sm:$0xff]   ;;  %v6557_v48 = vld [vmem:[%s5446_s2 + $0x134] ss:$24 sps:$4 sm:$0xff]  }
 0x3bf   : > { %v2317_v24 = vadd.f32 %v2316_v50, %v7956_v57  ;;  %v6563_v50 = vld [vmem:[%s5446_s2 + $0x130] ss:$24 sps:$4 sm:$0xff]   ;;  %v6573_v57 = vld [vmem:[%s5446_s2 + $0x160] ss:$24 sps:$4 sm:$0xff]  }
 0x3c0   : > { %4530 = vpow2.f32 %v3997_v54  ;;  %v6567_v54 = vld [vmem:[%s5446_s2 + $0x164] ss:$24 sps:$4 sm:$0xff]  }
 0x3c1   : > { %4532 = vtanh.f32 %v2317_v24  ;;  %v6577_v24 = vld [vmem:[%s5446_s2 + $0x194] ss:$24 sps:$4 sm:$0xff]  }
 0x3ca   : > { %v4531_v9 = vpop.eup %4530 }
 0x3cb   : > { %v2311_v14 = vadd.f32 1.0, %v4531_v9  ;;  %v4533_v33 = vpop.eup %4532  ;;  %v6583_v9 = vld [vmem:[%s5446_s2 + $0x190] ss:$24 sps:$4 sm:$0xff]  }
 0x3cc   : > { %v2319_v23 = vsub.f32 %v6303_v16, %v4533_v33  ;;  %v6507_v16 = vld [vmem:[%s5446_s2 + $0x44] ss:$24 sps:$4 sm:$0xff]  }
 0x3cd   : > { %4534 = vrcp.f32 %v2311_v14  ;;  %v6587_v14 = vld [vmem:[%s5446_s2 + $0x1c4] ss:$24 sps:$4 sm:$0xff]  }
 0x3d7   : > { %v4535_v13 = vpop.eup %4534 }
 0x3d8   : > { %v2320_v17 = vmul.f32 %v4535_v13, %v2319_v23  ;;  %v7957_v23 = vld [vmem:[#allocation46_spill] sm:$0xff] }
 0x3d9   : > { %v7958_v13 = vld [vmem:[#allocation26_spill] sm:$0xff] }
 0x3da   : > { %v6496_v19 = vadd.f32 %v4533_v33, %v2320_v17  ;;  %v6593_v33 = vld [vmem:[%s5446_s2 + $0x1c0] ss:$24 sps:$4 sm:$0xff]  }
 0x3db   : > { %v7959_v17 = vld [vmem:[#allocation48_spill] sm:$0xff] }
 0x3dc   : > { %v2327_v22 = vpack.c.bf16 %v6496_v19, %v6496_v19 }
 0x3de   : > { %2328 = vst [vmem:[#allocation2 + $0x38] sm:$0xf] %v2327_v22  ;;  %2361 = vmatprep.mubr.bf16.mxu1 %v2327_v22  ;;  %2402 = vmatprep.mubr.bf16.mxu0 %v2327_v22 }
 0x3df   : > { %2362 = vmatmul.mubr.bf16.vlgmr.msra.gmra.mrb[28].mxu1 %v6488_v3  ;;  %2403 = vmatmul.mubr.bf16.vlgmr.msra.gmra.mrb[44].mxu0 %v6488_v3 }
 0x3e0   : > { %2412 = vmatpush1.bf16.msra.mxu1 %v6503_v28  ;;  %2443 = vmatprep.mubr.bf16.mxu1 %v2327_v22  ;;  %v6606_v22 = vld [vmem:[%s5446_s2 + $0x210] ss:$24 sps:$4 sm:$0xff]  }
 0x3e1   : > { %2413 = vmatprep.subr.bf16.mxu1 %v6507_v16  ;;  %2506 = vmatpush1.bf16.msra.mxu0 %v6312_v62  ;;  %7960 = vst [vmem:[#allocation30_spill] sm:$0xff] %v6606_v22 }
 0x3e2   : > { %2507 = vmatprep.subr.bf16.mxu0 %v6316_v41 }
 0x3e4   : > { %2414 = vmatpush1.bf16.msra.mxu1 %v6513_v55 }
 0x3e5   : > { %2415 = vmatprep.subr.bf16.mxu1 %v6517_v0  ;;  %2508 = vmatpush1.bf16.msra.mxu0 %v6322_v53 }
 0x3e6   : > { %2509 = vmatprep.subr.bf16.mxu0 %v6326_v47 }
 0x3e8   : > { %2416 = vmatpush1.bf16.msra.mxu1 %v6523_v4 }
 0x3e9   : > { %2417 = vmatprep.subr.bf16.mxu1 %v6527_v6  ;;  %2510 = vmatpush1.bf16.msra.mxu0 %v6332_v10 }
 0x3ea   : > { %2511 = vmatprep.subr.bf16.mxu0 %v6336_v63 }
 0x3ec   : > { %2418 = vmatpush1.bf16.msra.mxu1 %v6533_v49 }
 0x3ed   : > { %2419 = vmatprep.subr.bf16.mxu1 %v6537_v29  ;;  %2512 = vmatpush1.bf16.msra.mxu0 %v6342_v56 }
 0x3ee   : > { %2513 = vmatprep.subr.bf16.mxu0 %v6346_v52 }
 0x3f0   : > { %2420 = vmatpush1.bf16.msra.mxu1 %v6543_v34 }
 0x3f1   : > { %2421 = vmatprep.subr.bf16.mxu1 %v6547_v39  ;;  %2514 = vmatpush1.bf16.msra.mxu0 %v6352_v7 }
 0x3f2   : > { %2515 = vmatprep.subr.bf16.mxu0 %v6356_v20 }
 0x3f4   : > { %2422 = vmatpush1.bf16.msra.mxu1 %v6553_v43 }
 0x3f5   : > { %2423 = vmatprep.subr.bf16.mxu1 %v6557_v48  ;;  %2516 = vmatpush1.bf16.msra.mxu0 %v6362_v11 }
 0x3f6   : > { %2517 = vmatprep.subr.bf16.mxu0 %v6366_v32 }
 0x3f8   : > { %2424 = vmatpush1.bf16.msra.mxu1 %v6563_v50 }
 0x3f9   : > { %2425 = vmatprep.subr.bf16.mxu1 %v6567_v54  ;;  %2518 = vmatpush1.bf16.msra.mxu0 %v6372_v5 }
 0x3fa   : > { %2519 = vmatprep.subr.bf16.mxu0 %v6376_v35 }
 0x3fc   : > { %2426 = vmatpush1.bf16.msra.mxu1 %v6573_v57 }
 0x3fd   : > { %2427 = vmatprep.subr.bf16.mxu1 %v6577_v24  ;;  %2520 = vmatpush1.bf16.msra.mxu0 %v6382_v31 }
 0x3fe   : > { %2521 = vmatprep.subr.bf16.mxu0 %v6386_v42 }
 0x400   : > { %2428 = vmatpush1.bf16.msra.mxu1 %v6583_v9 }
 0x401   : > { %2429 = vmatprep.subr.bf16.mxu1 %v6587_v14  ;;  %2522 = vmatpush1.bf16.msra.mxu0 %v6392_v60 }
 0x402   : > { %2523 = vmatprep.subr.bf16.mxu0 %v6396_v12 }
 0x404   : > { %2430 = vmatpush1.bf16.msra.mxu1 %v6593_v33 }
 0x405   : > { %2431 = vmatprep.subr.bf16.mxu1 %v7957_v23  ;;  %2524 = vmatpush1.bf16.msra.mxu0 %v6402_v45  ;;  %v6610_v23 = vld [vmem:[%s5446_s2 + $0x244] ss:$24 sps:$4 sm:$0xff]  }
 0x406   : > { %2525 = vmatprep.subr.bf16.mxu0 %v7958_v13  ;;  %7961 = vst [vmem:[#allocation31_spill] sm:$0xff] %v6610_v23 }
 0x408   : > { %2432 = vmatpush1.bf16.msra.mxu1 %v7959_v17  ;;  %v6658_v17 = vld [vmem:[%s5446_s2 + $0x8] ss:$24 sps:$4 sm:$0xff]  }
 0x409   : > { %2433 = vmatprep.subr.bf16.mxu1 %v7925_v1  ;;  %2526 = vmatpush1.bf16.msra.mxu0 %v6412_v58  ;;  %v6616_v1 = vld [vmem:[%s5446_s2 + $0x240] ss:$24 sps:$4 sm:$0xff]   ;;  %7971 = vst [vmem:[#allocation41_spill] sm:$0xff] %v6658_v17 }
 0x40a   : > { %2527 = vmatprep.subr.bf16.mxu0 %v6416_v40  ;;  %7962 = vst [vmem:[#allocation32_spill] sm:$0xff] %v6616_v1  ;;  %v8003_v40 = vld [vmem:[#allocation65_spill] sm:$0xff]  ;;  %v8004_v58 = vld [vmem:[#allocation78_spill] sm:$0xff] }
 0x40c   : > { %2434 = vmatpush1.bf16.msra.mxu1 %v7928_v30  ;;  %v6626_v30 = vld [vmem:[%s5446_s2 + $0x270] ss:$24 sps:$4 sm:$0xff]  }
 0x40d   : > { %2435 = vmatprep.subr.bf16.mxu1 %v7929_v59  ;;  %2528 = vmatpush1.bf16.msra.mxu0 %v6606_v22  ;;  %v6620_v59 = vld [vmem:[%s5446_s2 + $0x274] ss:$24 sps:$4 sm:$0xff]   ;;  %7964 = vst [vmem:[#allocation34_spill] sm:$0xff] %v6626_v30 }
 0x40e   : > { %2529 = vmatprep.subr.bf16.mxu0 %v6610_v23  ;;  %7963 = vst [vmem:[#allocation33_spill] sm:$0xff] %v6620_v59 }
 0x410   : > { %2436 = vmatpush1.bf16.msra.mxu1 %v7930_v44  ;;  %v6630_v44 = vld [vmem:[%s5446_s2 + $0x2a4] ss:$24 sps:$4 sm:$0xff]  }
 0x411   : > { %2437 = vmatprep.subr.bf16.mxu1 %v7931_v15  ;;  %2530 = vmatpush1.bf16.msra.mxu0 %v6616_v1  ;;  %7965 = vst [vmem:[#allocation35_spill] sm:$0xff] %v6630_v44  ;;  %v6636_v15 = vld [vmem:[%s5446_s2 + $0x2a0] ss:$24 sps:$4 sm:$0xff]  }
 0x412   : > { %2531 = vmatprep.subr.bf16.mxu0 %v6620_v59  ;;  %7966 = vst [vmem:[#allocation36_spill] sm:$0xff] %v6636_v15  ;;  %v8002_v1 = vld [vmem:[#allocation24_spill] sm:$0xff] }
 0x414   : > { %2438 = vmatpush1.bf16.msra.mxu1 %v5980_v27  ;;  %v6645_v27 = vld [vmem:[%s5446_s2 + $0xc] ss:$24 sps:$4 sm:$0xff]  }
 0x415   : > { %2439 = vmatprep.subr.bf16.mxu1 %v5988_v21  ;;  %2532 = vmatpush1.bf16.msra.mxu0 %v6626_v30  ;;  %v6640_v21 = vld [vmem:[%s5446_s2 + $0x2d4] ss:$24 sps:$4 sm:$0xff]   ;;  %7968 = vst [vmem:[#allocation38_spill] sm:$0xff] %v6645_v27 }
 0x416   : > { %2533 = vmatprep.subr.bf16.mxu0 %v6630_v44  ;;  %7967 = vst [vmem:[#allocation37_spill] sm:$0xff] %v6640_v21 }
 0x418   : > { %2440 = vmatpush1.bf16.msra.mxu1 %v5996_v36  ;;  %v6649_v36 = vld [vmem:[%s5446_s2 + $0x2d0] ss:$24 sps:$4 sm:$0xff]  }
 0x419   : > { %2441 = vmatprep.subr.bf16.mxu1 %v6004_v8  ;;  %2534 = vmatpush1.bf16.msra.mxu0 %v6636_v15  ;;  %7969 = vst [vmem:[#allocation39_spill] sm:$0xff] %v6649_v36  ;;  %v6653_v8 = vld [vmem:[%s5446_s2 + $0x14] ss:$24 sps:$4 sm:$0xff]  }
 0x41a   : > { %2535 = vmatprep.subr.bf16.mxu0 %v6640_v21  ;;  %7970 = vst [vmem:[#allocation40_spill] sm:$0xff] %v6653_v8 }
 0x41c   : > { %2442 = vmatpush1.bf16.msra.mxu1 %v6012_v46  ;;  %v6662_v46 = vld [vmem:[%s5446_s2 + $0x3c] ss:$24 sps:$4 sm:$0xff]  }
 0x41d   : > { %2546 = vmatprep.subr.bf16.mxu1 %v6645_v27  ;;  %2536 = vmatpush1.bf16.msra.mxu0 %v6649_v36  ;;  %7972 = vst [vmem:[#allocation42_spill] sm:$0xff] %v6662_v46  ;;  %v6666_v27 = vld [vmem:[%s5446_s2 + $0x38] ss:$24 sps:$4 sm:$0xff]   ;;  %v6670_v36 = vld [vmem:[%s5446_s2 + $0x6c] ss:$24 sps:$4 sm:$0xff]  }
 0x41e   : > { %2587 = vmatprep.subr.bf16.mxu0 %v6653_v8  ;;  %7973 = vst [vmem:[#allocation44_spill] sm:$0xff] %v6666_v27  ;;  %7974 = vst [vmem:[#allocation50_spill] sm:$0xff] %v6670_v36  ;;  %v6758_v8 = vld [vmem:[%s5446_s2 + $0x27c] ss:$24 sps:$4 sm:$0xff]  }
 0x41f   : > { %2444 = vmatmul.mubr.bf16.vlgmr.msra.gmra.mrb[32].mxu1 %v6488_v3  ;;  %v6674_v3 = vld [vmem:[%s5446_s2 + $0x68] ss:$24 sps:$4 sm:$0xff]   ;;  %7996 = vst [vmem:[#allocation102_spill] sm:$0xff] %v6758_v8 }
 0x420   : > { %2547 = vmatpush1.bf16.msra.mxu1 %v6658_v17  ;;  %7975 = vst [vmem:[#allocation52_spill] sm:$0xff] %v6674_v3  ;;  %v6678_v17 = vld [vmem:[%s5446_s2 + $0x9c] ss:$24 sps:$4 sm:$0xff]  }
 0x421   : > { %2548 = vmatprep.subr.bf16.mxu1 %v6662_v46  ;;  %7976 = vst [vmem:[#allocation54_spill] sm:$0xff] %v6678_v17  ;;  %v6682_v46 = vld [vmem:[%s5446_s2 + $0x98] ss:$24 sps:$4 sm:$0xff]  }
 0x422   : > { %7977 = vst [vmem:[#allocation56_spill] sm:$0xff] %v6682_v46 }
 0x424   : > { %2549 = vmatpush1.bf16.msra.mxu1 %v6666_v27  ;;  %v6686_v27 = vld [vmem:[%s5446_s2 + $0xcc] ss:$24 sps:$4 sm:$0xff]  }
 0x425   : > { %2550 = vmatprep.subr.bf16.mxu1 %v6670_v36  ;;  %7978 = vst [vmem:[#allocation58_spill] sm:$0xff] %v6686_v27  ;;  %v6690_v36 = vld [vmem:[%s5446_s2 + $0xc8] ss:$24 sps:$4 sm:$0xff]  }
 0x426   : > { %7979 = vst [vmem:[#allocation43_spill] sm:$0xff] %v6690_v36 }
 0x428   : > { %2551 = vmatpush1.bf16.msra.mxu1 %v6674_v3  ;;  %v6694_v3 = vld [vmem:[%s5446_s2 + $0xfc] ss:$24 sps:$4 sm:$0xff]  }
 0x429   : > { %2552 = vmatprep.subr.bf16.mxu1 %v6678_v17  ;;  %7980 = vst [vmem:[#allocation45_spill] sm:$0xff] %v6694_v3  ;;  %v6698_v17 = vld [vmem:[%s5446_s2 + $0xf8] ss:$24 sps:$4 sm:$0xff]  }
 0x42a   : > { %7981 = vst [vmem:[#allocation47_spill] sm:$0xff] %v6698_v17 }
 0x42c   : > { %2553 = vmatpush1.bf16.msra.mxu1 %v6682_v46  ;;  %v6702_v46 = vld [vmem:[%s5446_s2 + $0x12c] ss:$24 sps:$4 sm:$0xff]  }
 0x42d   : > { %2554 = vmatprep.subr.bf16.mxu1 %v6686_v27  ;;  %7982 = vst [vmem:[#allocation49_spill] sm:$0xff] %v6702_v46  ;;  %v6706_v27 = vld [vmem:[%s5446_s2 + $0x128] ss:$24 sps:$4 sm:$0xff]  }
 0x42e   : > { %7983 = vst [vmem:[#allocation51_spill] sm:$0xff] %v6706_v27 }
 0x430   : > { %2555 = vmatpush1.bf16.msra.mxu1 %v6690_v36  ;;  %v6710_v36 = vld [vmem:[%s5446_s2 + $0x15c] ss:$24 sps:$4 sm:$0xff]  }
 0x431   : > { %2556 = vmatprep.subr.bf16.mxu1 %v6694_v3  ;;  %7984 = vst [vmem:[#allocation53_spill] sm:$0xff] %v6710_v36  ;;  %v6714_v3 = vld [vmem:[%s5446_s2 + $0x158] ss:$24 sps:$4 sm:$0xff]  }
 0x432   : > { %7985 = vst [vmem:[#allocation55_spill] sm:$0xff] %v6714_v3 }
 0x434   : > { %2557 = vmatpush1.bf16.msra.mxu1 %v6698_v17  ;;  %v6718_v17 = vld [vmem:[%s5446_s2 + $0x18c] ss:$24 sps:$4 sm:$0xff]  }
 0x435   : > { %2558 = vmatprep.subr.bf16.mxu1 %v6702_v46  ;;  %7986 = vst [vmem:[#allocation57_spill] sm:$0xff] %v6718_v17  ;;  %v6722_v46 = vld [vmem:[%s5446_s2 + $0x188] ss:$24 sps:$4 sm:$0xff]  }
 0x436   : > { %7987 = vst [vmem:[#allocation59_spill] sm:$0xff] %v6722_v46 }
 0x438   : > { %2559 = vmatpush1.bf16.msra.mxu1 %v6706_v27  ;;  %v6726_v27 = vld [vmem:[%s5446_s2 + $0x1bc] ss:$24 sps:$4 sm:$0xff]  }
 0x439   : > { %2560 = vmatprep.subr.bf16.mxu1 %v6710_v36  ;;  %7988 = vst [vmem:[#allocation60_spill] sm:$0xff] %v6726_v27  ;;  %v6730_v36 = vld [vmem:[%s5446_s2 + $0x1b8] ss:$24 sps:$4 sm:$0xff]  }
 0x43a   : > { %7989 = vst [vmem:[#allocation61_spill] sm:$0xff] %v6730_v36 }
 0x43c   : > { %2561 = vmatpush1.bf16.msra.mxu1 %v6714_v3  ;;  %v6734_v3 = vld [vmem:[%s5446_s2 + $0x1ec] ss:$24 sps:$4 sm:$0xff]  }
 0x43d   : > { %2562 = vmatprep.subr.bf16.mxu1 %v6718_v17  ;;  %7990 = vst [vmem:[#allocation62_spill] sm:$0xff] %v6734_v3  ;;  %v6738_v17 = vld [vmem:[%s5446_s2 + $0x1e8] ss:$24 sps:$4 sm:$0xff]  }
 0x43e   : > { %7991 = vst [vmem:[#allocation63_spill] sm:$0xff] %v6738_v17 }
 0x440   : > { %2563 = vmatpush1.bf16.msra.mxu1 %v6722_v46  ;;  %v6742_v46 = vld [vmem:[%s5446_s2 + $0x21c] ss:$24 sps:$4 sm:$0xff]  }
 0x441   : > { %2564 = vmatprep.subr.bf16.mxu1 %v6726_v27  ;;  %7992 = vst [vmem:[#allocation87_spill] sm:$0xff] %v6742_v46  ;;  %v6746_v27 = vld [vmem:[%s5446_s2 + $0x218] ss:$24 sps:$4 sm:$0xff]  }
 0x442   : > { %7993 = vst [vmem:[#allocation20_spill] sm:$0xff] %v6746_v27 }
 0x444   : > { %2565 = vmatpush1.bf16.msra.mxu1 %v6730_v36  ;;  %v6750_v36 = vld [vmem:[%s5446_s2 + $0x24c] ss:$24 sps:$4 sm:$0xff]  }
 0x445   : > { %2566 = vmatprep.subr.bf16.mxu1 %v6734_v3  ;;  %7994 = vst [vmem:[#allocation22_spill] sm:$0xff] %v6750_v36  ;;  %v6754_v3 = vld [vmem:[%s5446_s2 + $0x248] ss:$24 sps:$4 sm:$0xff]  }
 0x446   : > { %7995 = vst [vmem:[#allocation82_spill] sm:$0xff] %v6754_v3 }
 0x448   : > { %2567 = vmatpush1.bf16.msra.mxu1 %v6738_v17  ;;  %v6762_v17 = vld [vmem:[%s5446_s2 + $0x278] ss:$24 sps:$4 sm:$0xff]  }
 0x449   : > { %2568 = vmatprep.subr.bf16.mxu1 %v6742_v46  ;;  %7997 = vst [vmem:[#allocation21_spill] sm:$0xff] %v6762_v17  ;;  %v6766_v46 = vld [vmem:[%s5446_s2 + $0x2ac] ss:$24 sps:$4 sm:$0xff]  }
 0x44a   : > { %7998 = vst [vmem:[#allocation103_spill] sm:$0xff] %v6766_v46 }
 0x44c   : > { %2569 = vmatpush1.bf16.msra.mxu1 %v6746_v27  ;;  %v6770_v27 = vld [vmem:[%s5446_s2 + $0x2a8] ss:$24 sps:$4 sm:$0xff]  }
 0x44d   : > { %2570 = vmatprep.subr.bf16.mxu1 %v6750_v36  ;;  %7999 = vst [vmem:[#allocation100_spill] sm:$0xff] %v6770_v27  ;;  %v6774_v36 = vld [vmem:[%s5446_s2 + $0x2dc] ss:$24 sps:$4 sm:$0xff]  }
 0x44e   : > { %8000 = vst [vmem:[#allocation101_spill] sm:$0xff] %v6774_v36 }
 0x450   : > { %2571 = vmatpush1.bf16.msra.mxu1 %v6754_v3  ;;  %v6778_v3 = vld [vmem:[%s5446_s2 + $0x2d8] ss:$24 sps:$4 sm:$0xff]  }
 0x451   : > { %2572 = vmatprep.subr.bf16.mxu1 %v6758_v8  ;;  %8001 = vst [vmem:[#allocation46_spill] sm:$0xff] %v6778_v3 }
 0x454   : > { %2573 = vmatpush1.bf16.msra.mxu1 %v6762_v17 }
 0x455   : > { %2574 = vmatprep.subr.bf16.mxu1 %v6766_v46 }
 0x458   : > { %2575 = vmatpush1.bf16.msra.mxu1 %v6770_v27 }
 0x459   : > { %2576 = vmatprep.subr.bf16.mxu1 %v6774_v36 }
 0x45c   : > { %2577 = vmatpush1.bf16.msra.mxu1 %v6778_v3 }
 0x45d   : > { %2681 = vmatprep.subr.bf16.mxu1 %v6472_v61 }
 0x4b2   : > { %v2363_v8 = vpop.f32.mrb[28].mxu1  ;;  %v2404_v17 = vpop.f32.mrb[44].mxu0 }
 0x4b3   : > { %v2364_v21 = vadd.f32 %v2363_v8, %v7946_v26  ;;  %v2365_v15 = vpop.f32.mrb[29].mxu1  ;;  %v2406_v46 = vpop.f32.mrb[45].mxu0 }
 0x4b4   : > { %v2366_v44 = vadd.f32 %v2365_v15, %v7947_v18  ;;  %v2407_v27 = vadd.f32 %v2406_v46, %v7948_v38  ;;  %v2367_v30 = vpop.f32.mrb[30].mxu1  ;;  %v2408_v59 = vpop.f32.mrb[46].mxu0  ;;  %v2405_v46 = vadd.f32 %v2404_v17, %v7952_v51  ;;  %v8005_v38 = vld [vmem:[#allocation64_spill] sm:$0xff] }
 0x4b5   : > { %v2458_v36 = vadd.f32 %v2364_v21, %v8002_v1  ;;  %v2368_v23 = vpop.f32.mrb[31].mxu1  ;;  %v2409_v22 = vpop.f32.mrb[47].mxu0 }
 0x4b6   : > { %v2459_v3 = vadd.f32 %v2366_v44, %v8003_v40  ;;  %v2478_v61 = vadd.f32 %v2407_v27, %v8004_v58 }
 0x4b7   : > { %v3998_v13 = vmul.f32 -1.442695, %v2458_v36 }
 0x4b8   : > { %v3999_v45 = vmul.f32 -1.442695, %v2459_v3  ;;  %v4000_v22 = vmul.f32 -1.442695, %v2478_v61 }
 0x4b9   : > { %4536 = vpow2.f32 %v3998_v13 }
 0x4ba   : > { %4538 = vpow2.f32 %v3999_v45 }
 0x4c3   : > { %v4537_v8 = vpop.eup %4536 }
 0x4c4   : > { %v2466_v26 = vadd.f32 1.0, %v4537_v8  ;;  %v4539_v15 = vpop.eup %4538  ;;  %v8006_v8 = vld [vmem:[#allocation98_spill] sm:$0xff] }
 0x4c5   : > { %v2467_v23 = vadd.f32 1.0, %v4539_v15 }
 0x4c6   : > { %4540 = vrcp.f32 %v2466_v26 }
 0x4d0   : > { %v4541_v30 = vpop.eup %4540 }
 0x4d1   : > { %v2472_v59 = vmul.f32 %v4541_v30, %v2405_v46 }
 0x4d3   : > { %v2473_v1 = vadd.f32 %v2472_v59, %v8005_v38 }
 0x4d5   : > { %4542 = vtanh.f32 %v2473_v1  ;;  %v8007_v1 = vld [vmem:[#allocation99_spill] sm:$0xff] }
 0x4d6   : > { %4544 = vrcp.f32 %v2467_v23 }
 0x4d7   : > { %4546 = vpow2.f32 %v4000_v22 }
 0x4df   : > { %v4543_v58 = vpop.eup %4542 }
 0x4e0   : > { %v2475_v40 = vsub.f32 %v6484_v25, %v4543_v58  ;;  %v4545_v13 = vpop.eup %4544 }
 0x4e1   : > { %v4547_v21 = vpop.eup %4546 }
 0x4e2   : > { %v2476_v44 = vmul.f32 %v4545_v13, %v2475_v40  ;;  %v2486_v27 = vadd.f32 1.0, %v4547_v21 }
 0x4e4   : > { %v6791_v45 = vadd.f32 %v4543_v58, %v2476_v44  ;;  %4548 = vrcp.f32 %v2486_v27 }
 0x4e6   : > { %v6795_v26 = vpack.c.bf16 %v6791_v45, %v6791_v45 }
 0x4e8   : > { %2499 = vst [vmem:[#allocation2 + $0x10] sm:$0xf] %v6795_v26 }
 0x4ee   : > { %v4549_v3 = vpop.eup %4548 }
 0x4f2   : > { %v2445_v38 = vpop.f32.mrb[32].mxu1 }
 0x4f3   : > { %v2446_v61 = vadd.f32 %v2445_v38, %v7954_v2  ;;  %v2447_v36 = vpop.f32.mrb[33].mxu1 }
 0x4f4   : > { %v2448_v17 = vadd.f32 %v2447_v36, %v6299_v37  ;;  %v2449_v25 = vpop.f32.mrb[34].mxu1  ;;  %v8009_v36 = vld [vmem:[#allocation25_spill] sm:$0xff] }
 0x4f5   : > { %v2479_v15 = vadd.f32 %v2446_v61, %v8006_v8  ;;  %v2450_v46 = vpop.f32.mrb[35].mxu1  ;;  %v6853_v25 = vld [vmem:[%s5446_s2 + $0x1f0] ss:$24 sps:$4 sm:$0xff]   ;;  %v8013_v8 = vld [vmem:[#allocation27_spill] sm:$0xff] }
 0x4f6   : > { %v2492_v30 = vmul.f32 %v4549_v3, %v2448_v17  ;;  %v8010_v17 = vld [vmem:[#allocation26_spill] sm:$0xff]  ;;  %8011 = vst [vmem:[#allocation24_spill] sm:$0xff] %v6853_v25  ;;  %v6857_v3 = vld [vmem:[%s5446_s2 + $0x224] ss:$24 sps:$4 sm:$0xff]  }
 0x4f7   : > { %v4001_v59 = vmul.f32 -1.442695, %v2479_v15  ;;  %8012 = vst [vmem:[#allocation65_spill] sm:$0xff] %v6857_v3  ;;  %v8014_v15 = vld [vmem:[#allocation28_spill] sm:$0xff] }
 0x4f8   : > { %v2493_v23 = vadd.f32 %v2492_v30, %v8007_v1  ;;  %v6863_v46 = vld [vmem:[%s5446_s2 + $0x220] ss:$24 sps:$4 sm:$0xff]   ;;  %v6867_v30 = vld [vmem:[%s5446_s2 + $0x254] ss:$24 sps:$4 sm:$0xff]  }
 0x4f9   : > { %4550 = vpow2.f32 %v4001_v59  ;;  %8015 = vst [vmem:[#allocation78_spill] sm:$0xff] %v6863_v46  ;;  %8016 = vst [vmem:[#allocation64_spill] sm:$0xff] %v6867_v30  ;;  %v8017_v59 = vld [vmem:[#allocation30_spill] sm:$0xff]  ;;  %v8018_v1 = vld [vmem:[#allocation31_spill] sm:$0xff] }
 0x4fa   : > { %4552 = vtanh.f32 %v2493_v23  ;;  %v6873_v23 = vld [vmem:[%s5446_s2 + $0x250] ss:$24 sps:$4 sm:$0xff]  }
 0x4fb   : > { %8019 = vst [vmem:[#allocation98_spill] sm:$0xff] %v6873_v23 }
 0x503   : > { %v4551_v22 = vpop.eup %4550 }
 0x504   : > { %v2487_v58 = vadd.f32 1.0, %v4551_v22  ;;  %v4553_v40 = vpop.eup %4552  ;;  %v6877_v22 = vld [vmem:[%s5446_s2 + $0x284] ss:$24 sps:$4 sm:$0xff]  }
 0x505   : > { %v2495_v13 = vsub.f32 %v6496_v19, %v4553_v40  ;;  %v6847_v19 = vld [vmem:[%s5446_s2 + $0x1f4] ss:$24 sps:$4 sm:$0xff]   ;;  %8020 = vst [vmem:[#allocation99_spill] sm:$0xff] %v6877_v22 }
 0x506   : > { %4554 = vrcp.f32 %v2487_v58  ;;  %8008 = vst [vmem:[#allocation48_spill] sm:$0xff] %v6847_v19  ;;  %v8021_v58 = vld [vmem:[#allocation32_spill] sm:$0xff] }
 0x510   : > { %v4555_v44 = vpop.eup %4554 }
 0x511   : > { %v2496_v21 = vmul.f32 %v4555_v44, %v2495_v13  ;;  %v6883_v13 = vld [vmem:[%s5446_s2 + $0x280] ss:$24 sps:$4 sm:$0xff]   ;;  %v6887_v44 = vld [vmem:[%s5446_s2 + $0x2b4] ss:$24 sps:$4 sm:$0xff]  }
 0x512   : > { %8023 = vst [vmem:[#allocation105_spill] sm:$0xff] %v6883_v13  ;;  %8024 = vst [vmem:[#allocation106_spill] sm:$0xff] %v6887_v44 }
 0x513   : > { %v6803_v27 = vadd.f32 %v4553_v40, %v2496_v21  ;;  %v8022_v40 = vld [vmem:[#allocation33_spill] sm:$0xff]  ;;  %v8025_v21 = vld [vmem:[#allocation34_spill] sm:$0xff] }
 0x515   : > { %v2500_v38 = vpack.c.bf16 %v6803_v27, %v6803_v27 }
 0x517   : > { %v2502_v61 = vrot.slane %v2500_v38, 4  ;;  %2537 = vmatprep.mubr.bf16.mxu0 %v2500_v38  ;;  %2578 = vmatprep.mubr.bf16.mxu1 %v2500_v38 }
 0x518   : > { %2538 = vmatmul.mubr.bf16.vlgmr.msra.gmra.mrb[48].mxu0 %v6795_v26  ;;  %2579 = vmatmul.mubr.bf16.vlgmr.msra.gmra.mrb[36].mxu1 %v6795_v26 }
 0x519   : > { %2504 = vst [vmem:[#allocation2 + $0x28] sm:$0xf0] %v2502_v61  ;;  %2588 = vmatpush1.bf16.msra.mxu0 %v6503_v28  ;;  %2619 = vmatprep.mubr.bf16.mxu0 %v2500_v38  ;;  %v8026_v38 = vld [vmem:[#allocation35_spill] sm:$0xff]  ;;  %v6893_v61 = vld [vmem:[%s5446_s2 + $0x2b0] ss:$24 sps:$4 sm:$0xff]  }
 0x51a   : > { %2589 = vmatprep.subr.bf16.mxu0 %v6507_v16  ;;  %2682 = vmatpush1.bf16.msra.mxu1 %v6312_v62  ;;  %8027 = vst [vmem:[#allocation107_spill] sm:$0xff] %v6893_v61 }
 0x51b   : > { %2683 = vmatprep.subr.bf16.mxu1 %v6316_v41 }
 0x51d   : > { %2590 = vmatpush1.bf16.msra.mxu0 %v6513_v55 }
 0x51e   : > { %2591 = vmatprep.subr.bf16.mxu0 %v6517_v0  ;;  %2684 = vmatpush1.bf16.msra.mxu1 %v6322_v53 }
 0x51f   : > { %2685 = vmatprep.subr.bf16.mxu1 %v6326_v47 }
 0x521   : > { %2592 = vmatpush1.bf16.msra.mxu0 %v6523_v4 }
 0x522   : > { %2593 = vmatprep.subr.bf16.mxu0 %v6527_v6  ;;  %2686 = vmatpush1.bf16.msra.mxu1 %v6332_v10 }
 0x523   : > { %2687 = vmatprep.subr.bf16.mxu1 %v6336_v63 }
 0x525   : > { %2594 = vmatpush1.bf16.msra.mxu0 %v6533_v49 }
 0x526   : > { %2595 = vmatprep.subr.bf16.mxu0 %v6537_v29  ;;  %2688 = vmatpush1.bf16.msra.mxu1 %v6342_v56 }
 0x527   : > { %2689 = vmatprep.subr.bf16.mxu1 %v6346_v52 }
 0x529   : > { %2596 = vmatpush1.bf16.msra.mxu0 %v6543_v34 }
 0x52a   : > { %2597 = vmatprep.subr.bf16.mxu0 %v6547_v39  ;;  %2690 = vmatpush1.bf16.msra.mxu1 %v6352_v7 }
 0x52b   : > { %2691 = vmatprep.subr.bf16.mxu1 %v6356_v20 }
 0x52d   : > { %2598 = vmatpush1.bf16.msra.mxu0 %v6553_v43 }
 0x52e   : > { %2599 = vmatprep.subr.bf16.mxu0 %v6557_v48  ;;  %2692 = vmatpush1.bf16.msra.mxu1 %v6362_v11 }
 0x52f   : > { %2693 = vmatprep.subr.bf16.mxu1 %v6366_v32 }
 0x531   : > { %2600 = vmatpush1.bf16.msra.mxu0 %v6563_v50 }
 0x532   : > { %2601 = vmatprep.subr.bf16.mxu0 %v6567_v54  ;;  %2694 = vmatpush1.bf16.msra.mxu1 %v6372_v5 }
 0x533   : > { %2695 = vmatprep.subr.bf16.mxu1 %v6376_v35 }
 0x535   : > { %2602 = vmatpush1.bf16.msra.mxu0 %v6573_v57 }
 0x536   : > { %2603 = vmatprep.subr.bf16.mxu0 %v6577_v24  ;;  %2696 = vmatpush1.bf16.msra.mxu1 %v6382_v31 }
 0x537   : > { %2697 = vmatprep.subr.bf16.mxu1 %v6386_v42 }
 0x539   : > { %2604 = vmatpush1.bf16.msra.mxu0 %v6583_v9 }
 0x53a   : > { %2605 = vmatprep.subr.bf16.mxu0 %v6587_v14  ;;  %2698 = vmatpush1.bf16.msra.mxu1 %v6392_v60 }
 0x53b   : > { %2699 = vmatprep.subr.bf16.mxu1 %v6396_v12 }
 0x53d   : > { %2606 = vmatpush1.bf16.msra.mxu0 %v6593_v33 }
 0x53e   : > { %2607 = vmatprep.subr.bf16.mxu0 %v6847_v19  ;;  %2700 = vmatpush1.bf16.msra.mxu1 %v8009_v36 }
 0x53f   : > { %2701 = vmatprep.subr.bf16.mxu1 %v8010_v17  ;;  %v8071_v17 = vld [vmem:[#allocation74_spill] sm:$0xff] }
 0x541   : > { %2608 = vmatpush1.bf16.msra.mxu0 %v6853_v25  ;;  %v8070_v25 = vld [vmem:[#allocation69_spill] sm:$0xff] }
 0x542   : > { %2609 = vmatprep.subr.bf16.mxu0 %v6857_v3  ;;  %2702 = vmatpush1.bf16.msra.mxu1 %v8013_v8  ;;  %v8069_v8 = vld [vmem:[#allocation67_spill] sm:$0xff] }
 0x543   : > { %2703 = vmatprep.subr.bf16.mxu1 %v8014_v15 }
 0x545   : > { %2610 = vmatpush1.bf16.msra.mxu0 %v6863_v46  ;;  %v8068_v46 = vld [vmem:[#allocation104_spill] sm:$0xff] }
 0x546   : > { %2611 = vmatprep.subr.bf16.mxu0 %v6867_v30  ;;  %2704 = vmatpush1.bf16.msra.mxu1 %v8017_v59  ;;  %v8067_v59 = vld [vmem:[#allocation86_spill] sm:$0xff] }
 0x547   : > { %2705 = vmatprep.subr.bf16.mxu1 %v8018_v1  ;;  %v8040_v1 = vld [vmem:[#allocation54_spill] sm:$0xff] }
 0x549   : > { %2612 = vmatpush1.bf16.msra.mxu0 %v6873_v23  ;;  %v8036_v23 = vld [vmem:[#allocation42_spill] sm:$0xff] }
 0x54a   : > { %2613 = vmatprep.subr.bf16.mxu0 %v6877_v22  ;;  %2706 = vmatpush1.bf16.msra.mxu1 %v8021_v58  ;;  %v6897_v22 = vld [vmem:[%s5446_s2 + $0x2e4] ss:$24 sps:$4 sm:$0xff]   ;;  %v8030_v58 = vld [vmem:[#allocation37_spill] sm:$0xff] }
 0x54b   : > { %2707 = vmatprep.subr.bf16.mxu1 %v8022_v40  ;;  %8028 = vst [vmem:[#allocation108_spill] sm:$0xff] %v6897_v22  ;;  %v8029_v40 = vld [vmem:[#allocation36_spill] sm:$0xff] }
 0x54d   : > { %2614 = vmatpush1.bf16.msra.mxu0 %v6883_v13  ;;  %v6903_v13 = vld [vmem:[%s5446_s2 + $0x2e0] ss:$24 sps:$4 sm:$0xff]  }
 0x54e   : > { %2615 = vmatprep.subr.bf16.mxu0 %v6887_v44  ;;  %2708 = vmatpush1.bf16.msra.mxu1 %v8025_v21  ;;  %8031 = vst [vmem:[#allocation109_spill] sm:$0xff] %v6903_v13  ;;  %v8032_v44 = vld [vmem:[#allocation38_spill] sm:$0xff]  ;;  %v8033_v21 = vld [vmem:[#allocation39_spill] sm:$0xff] }
 0x54f   : > { %2709 = vmatprep.subr.bf16.mxu1 %v8026_v38  ;;  %v8034_v38 = vld [vmem:[#allocation40_spill] sm:$0xff] }
 0x551   : > { %2616 = vmatpush1.bf16.msra.mxu0 %v6893_v61  ;;  %v8035_v61 = vld [vmem:[#allocation41_spill] sm:$0xff] }
 0x552   : > { %2617 = vmatprep.subr.bf16.mxu0 %v6897_v22  ;;  %2710 = vmatpush1.bf16.msra.mxu1 %v8029_v40  ;;  %v8037_v22 = vld [vmem:[#allocation44_spill] sm:$0xff]  ;;  %v8038_v40 = vld [vmem:[#allocation50_spill] sm:$0xff] }
 0x553   : > { %2711 = vmatprep.subr.bf16.mxu1 %v8030_v58  ;;  %v8039_v58 = vld [vmem:[#allocation52_spill] sm:$0xff] }
 0x555   : > { %2618 = vmatpush1.bf16.msra.mxu0 %v6903_v13  ;;  %v8041_v13 = vld [vmem:[#allocation56_spill] sm:$0xff] }
 0x556   : > { %2722 = vmatprep.subr.bf16.mxu0 %v8032_v44  ;;  %2712 = vmatpush1.bf16.msra.mxu1 %v8033_v21  ;;  %v8042_v44 = vld [vmem:[#allocation58_spill] sm:$0xff]  ;;  %v8043_v21 = vld [vmem:[#allocation43_spill] sm:$0xff] }
 0x557   : > { %2763 = vmatprep.subr.bf16.mxu1 %v8034_v38  ;;  %v8044_v38 = vld [vmem:[#allocation45_spill] sm:$0xff] }
 0x558   : > { %2620 = vmatmul.mubr.bf16.vlgmr.msra.gmra.mrb[52].mxu0 %v6795_v26  ;;  %v8045_v26 = vld [vmem:[#allocation47_spill] sm:$0xff] }
 0x559   : > { %2723 = vmatpush1.bf16.msra.mxu0 %v8035_v61  ;;  %v8046_v61 = vld [vmem:[#allocation49_spill] sm:$0xff] }
 0x55a   : > { %2724 = vmatprep.subr.bf16.mxu0 %v8036_v23  ;;  %v8047_v23 = vld [vmem:[#allocation51_spill] sm:$0xff] }
 0x55d   : > { %2725 = vmatpush1.bf16.msra.mxu0 %v8037_v22  ;;  %v8048_v22 = vld [vmem:[#allocation53_spill] sm:$0xff] }
 0x55e   : > { %2726 = vmatprep.subr.bf16.mxu0 %v8038_v40  ;;  %v8049_v40 = vld [vmem:[#allocation55_spill] sm:$0xff] }
 0x561   : > { %2727 = vmatpush1.bf16.msra.mxu0 %v8039_v58  ;;  %v8050_v58 = vld [vmem:[#allocation57_spill] sm:$0xff] }
 0x562   : > { %2728 = vmatprep.subr.bf16.mxu0 %v8040_v1  ;;  %v8051_v1 = vld [vmem:[#allocation59_spill] sm:$0xff] }
 0x565   : > { %2729 = vmatpush1.bf16.msra.mxu0 %v8041_v13  ;;  %v8052_v13 = vld [vmem:[#allocation60_spill] sm:$0xff] }
 0x566   : > { %2730 = vmatprep.subr.bf16.mxu0 %v8042_v44  ;;  %v8053_v44 = vld [vmem:[#allocation61_spill] sm:$0xff] }
 0x569   : > { %2731 = vmatpush1.bf16.msra.mxu0 %v8043_v21  ;;  %v8054_v21 = vld [vmem:[#allocation62_spill] sm:$0xff] }
 0x56a   : > { %2732 = vmatprep.subr.bf16.mxu0 %v8044_v38  ;;  %v8055_v38 = vld [vmem:[#allocation63_spill] sm:$0xff] }
 0x56d   : > { %2733 = vmatpush1.bf16.msra.mxu0 %v8045_v26  ;;  %v8056_v26 = vld [vmem:[#allocation87_spill] sm:$0xff] }
 0x56e   : > { %2734 = vmatprep.subr.bf16.mxu0 %v8046_v61  ;;  %v8057_v61 = vld [vmem:[#allocation20_spill] sm:$0xff] }
 0x571   : > { %2735 = vmatpush1.bf16.msra.mxu0 %v8047_v23  ;;  %v8058_v23 = vld [vmem:[#allocation22_spill] sm:$0xff] }
 0x572   : > { %2736 = vmatprep.subr.bf16.mxu0 %v8048_v22  ;;  %v8059_v22 = vld [vmem:[#allocation82_spill] sm:$0xff] }
 0x575   : > { %2737 = vmatpush1.bf16.msra.mxu0 %v8049_v40  ;;  %v8060_v40 = vld [vmem:[#allocation102_spill] sm:$0xff] }
 0x576   : > { %2738 = vmatprep.subr.bf16.mxu0 %v8050_v58  ;;  %v8061_v58 = vld [vmem:[#allocation21_spill] sm:$0xff] }
 0x579   : > { %2739 = vmatpush1.bf16.msra.mxu0 %v8051_v1  ;;  %v8062_v1 = vld [vmem:[#allocation103_spill] sm:$0xff] }
 0x57a   : > { %2740 = vmatprep.subr.bf16.mxu0 %v8052_v13  ;;  %v8063_v13 = vld [vmem:[#allocation100_spill] sm:$0xff] }
 0x57d   : > { %2741 = vmatpush1.bf16.msra.mxu0 %v8053_v44  ;;  %v8064_v44 = vld [vmem:[#allocation101_spill] sm:$0xff] }
 0x57e   : > { %2742 = vmatprep.subr.bf16.mxu0 %v8054_v21  ;;  %v8065_v21 = vld [vmem:[#allocation46_spill] sm:$0xff] }
 0x581   : > { %2743 = vmatpush1.bf16.msra.mxu0 %v8055_v38  ;;  %v8066_v38 = vld [vmem:[#allocation29_spill] sm:$0xff] }
 0x582   : > { %2744 = vmatprep.subr.bf16.mxu0 %v8056_v26 }
 0x585   : > { %2745 = vmatpush1.bf16.msra.mxu0 %v8057_v61 }
 0x586   : > { %2746 = vmatprep.subr.bf16.mxu0 %v8058_v23 }
 0x589   : > { %2747 = vmatpush1.bf16.msra.mxu0 %v8059_v22 }
 0x58a   : > { %2748 = vmatprep.subr.bf16.mxu0 %v8060_v40 }
 0x58d   : > { %2749 = vmatpush1.bf16.msra.mxu0 %v8061_v58 }
 0x58e   : > { %2750 = vmatprep.subr.bf16.mxu0 %v8062_v1 }
 0x591   : > { %2751 = vmatpush1.bf16.msra.mxu0 %v8063_v13 }
 0x592   : > { %2752 = vmatprep.subr.bf16.mxu0 %v8064_v44 }
 0x595   : > { %2753 = vmatpush1.bf16.msra.mxu0 %v8065_v21 }
 0x596   : > { %2857 = vmatprep.subr.bf16.mxu0 %v8066_v38 }
 0x5eb   : > { %v2539_v26 = vpop.f32.mrb[48].mxu0  ;;  %v2580_v61 = vpop.f32.mrb[36].mxu1 }
 0x5ec   : > { %v2540_v23 = vadd.f32 %v2539_v26, %v8067_v59  ;;  %v2541_v30 = vpop.f32.mrb[49].mxu0  ;;  %v2582_v22 = vpop.f32.mrb[37].mxu1 }
 0x5ed   : > { %v2542_v40 = vadd.f32 %v2541_v30, %v7947_v18  ;;  %v2583_v58 = vadd.f32 %v2582_v22, %v8068_v46  ;;  %v2543_v15 = vpop.f32.mrb[50].mxu0  ;;  %v2584_v1 = vpop.f32.mrb[38].mxu1  ;;  %v2581_v22 = vadd.f32 %v2580_v61, %v7952_v51  ;;  %v8072_v46 = vld [vmem:[#allocation68_spill] sm:$0xff] }
 0x5ee   : > { %v2634_v13 = vadd.f32 %v2540_v23, %v8069_v8  ;;  %v2544_v3 = vpop.f32.mrb[51].mxu0  ;;  %v2585_v44 = vpop.f32.mrb[39].mxu1 }
 0x5ef   : > { %v2635_v21 = vadd.f32 %v2542_v40, %v8070_v25  ;;  %v2654_v38 = vadd.f32 %v2583_v58, %v8071_v17 }
 0x5f0   : > { %v4002_v36 = vmul.f32 -1.442695, %v2634_v13 }
 0x5f1   : > { %v4003_v19 = vmul.f32 -1.442695, %v2635_v21  ;;  %v4004_v23 = vmul.f32 -1.442695, %v2654_v38 }
 0x5f2   : > { %4556 = vpow2.f32 %v4002_v36 }
 0x5f3   : > { %4558 = vpow2.f32 %v4003_v19 }
 0x5fc   : > { %v4557_v26 = vpop.eup %4556 }
 0x5fd   : > { %v2642_v59 = vadd.f32 1.0, %v4557_v26  ;;  %v4559_v30 = vpop.eup %4558 }
 0x5fe   : > { %v2643_v3 = vadd.f32 1.0, %v4559_v30  ;;  %v8073_v30 = vld [vmem:[#allocation96_spill] sm:$0xff] }
 0x5ff   : > { %4560 = vrcp.f32 %v2642_v59 }
 0x609   : > { %v4561_v15 = vpop.eup %4560 }
 0x60a   : > { %v2648_v1 = vmul.f32 %v4561_v15, %v2581_v22 }
 0x60c   : > { %v2649_v8 = vadd.f32 %v2648_v1, %v8072_v46 }
 0x60e   : > { %4562 = vtanh.f32 %v2649_v8 }
 0x60f   : > { %4564 = vrcp.f32 %v2643_v3  ;;  %v8074_v3 = vld [vmem:[#allocation97_spill] sm:$0xff] }
 0x610   : > { %4566 = vpow2.f32 %v4004_v23 }
 0x618   : > { %v4563_v17 = vpop.eup %4562 }
 0x619   : > { %v2651_v36 = vsub.f32 %v6791_v45, %v4563_v17  ;;  %v4565_v25 = vpop.eup %4564 }
 0x61a   : > { %v4567_v40 = vpop.eup %4566 }
 0x61b   : > { %v2652_v58 = vmul.f32 %v4565_v25, %v2651_v36  ;;  %v2662_v13 = vadd.f32 1.0, %v4567_v40 }
 0x61d   : > { %v6951_v19 = vadd.f32 %v4563_v17, %v2652_v58  ;;  %4568 = vrcp.f32 %v2662_v13 }
 0x61f   : > { %v6955_v59 = vpack.c.bf16 %v6951_v19, %v6951_v19 }
 0x621   : > { %v2676_v46 = vrot.slane %v6955_v59, 4 }
 0x623   : > { %2678 = vst [vmem:[#allocation2 + $0x10] sm:$0xf0] %v2676_v46 }
 0x627   : > { %v4569_v26 = vpop.eup %4568 }
 0x62b   : > { %v2621_v44 = vpop.f32.mrb[52].mxu0 }
 0x62c   : > { %v2622_v21 = vadd.f32 %v2621_v44, %v7954_v2  ;;  %v2623_v38 = vpop.f32.mrb[53].mxu0 }
 0x62d   : > { %v2624_v45 = vadd.f32 %v2623_v38, %v6299_v37  ;;  %v2625_v61 = vpop.f32.mrb[54].mxu0  ;;  %v8095_v38 = vld [vmem:[#allocation108_spill] sm:$0xff] }
 0x62e   : > { %v2655_v22 = vadd.f32 %v2622_v21, %v8073_v30  ;;  %v2626_v15 = vpop.f32.mrb[55].mxu0  ;;  %v8094_v21 = vld [vmem:[#allocation107_spill] sm:$0xff]  ;;  %v8097_v61 = vld [vmem:[#allocation37_spill] sm:$0xff]  ;;  %v8099_v30 = vld [vmem:[#allocation38_spill] sm:$0xff] }
 0x62f   : > { %v2668_v1 = vmul.f32 %v4569_v26, %v2624_v45  ;;  %v8096_v45 = vld [vmem:[#allocation36_spill] sm:$0xff]  ;;  %v8098_v26 = vld [vmem:[#allocation109_spill] sm:$0xff] }
 0x630   : > { %v4005_v8 = vmul.f32 -1.442695, %v2655_v22  ;;  %v8100_v22 = vld [vmem:[#allocation39_spill] sm:$0xff]  ;;  %v8101_v15 = vld [vmem:[#allocation40_spill] sm:$0xff] }
 0x631   : > { %v2669_v23 = vadd.f32 %v2668_v1, %v8074_v3  ;;  %v8102_v1 = vld [vmem:[#allocation41_spill] sm:$0xff]  ;;  %v8104_v3 = vld [vmem:[#allocation44_spill] sm:$0xff] }
 0x632   : > { %4570 = vpow2.f32 %v4005_v8  ;;  %v8103_v8 = vld [vmem:[#allocation42_spill] sm:$0xff] }
 0x633   : > { %4572 = vtanh.f32 %v2669_v23  ;;  %v8105_v23 = vld [vmem:[#allocation50_spill] sm:$0xff] }
 0x63c   : > { %v4571_v17 = vpop.eup %4570 }
 0x63d   : > { %v2663_v36 = vadd.f32 1.0, %v4571_v17  ;;  %v4573_v25 = vpop.eup %4572  ;;  %v8106_v17 = vld [vmem:[#allocation52_spill] sm:$0xff] }
 0x63e   : > { %v2671_v58 = vsub.f32 %v6803_v27, %v4573_v25  ;;  %v8093_v27 = vld [vmem:[#allocation35_spill] sm:$0xff] }
 0x63f   : > { %4574 = vrcp.f32 %v2663_v36  ;;  %v8107_v36 = vld [vmem:[#allocation54_spill] sm:$0xff] }
 0x649   : > { %v4575_v40 = vpop.eup %4574 }
 0x64a   : > { %v2672_v13 = vmul.f32 %v4575_v40, %v2671_v58  ;;  %v8109_v58 = vld [vmem:[#allocation58_spill] sm:$0xff]  ;;  %v8110_v40 = vld [vmem:[#allocation43_spill] sm:$0xff] }
 0x64c   : > { %v6963_v46 = vadd.f32 %v4573_v25, %v2672_v13  ;;  %v8108_v25 = vld [vmem:[#allocation56_spill] sm:$0xff]  ;;  %v8111_v13 = vld [vmem:[#allocation45_spill] sm:$0xff] }
 0x64e   : > { %v2679_v44 = vpack.c.bf16 %v6963_v46, %v6963_v46 }
 0x650   : > { %2680 = vst [vmem:[#allocation2 + $0x28] sm:$0xf] %v2679_v44  ;;  %2713 = vmatprep.mubr.bf16.mxu1 %v2679_v44  ;;  %2754 = vmatprep.mubr.bf16.mxu0 %v2679_v44 }
 0x651   : > { %2714 = vmatmul.mubr.bf16.vlgmr.msra.gmra.mrb[40].mxu1 %v6955_v59  ;;  %2755 = vmatmul.mubr.bf16.vlgmr.msra.gmra.mrb[56].mxu0 %v6955_v59 }
 0x652   : > { %2764 = vmatpush1.bf16.msra.mxu1 %v6503_v28  ;;  %2795 = vmatprep.mubr.bf16.mxu1 %v2679_v44  ;;  %v8113_v44 = vld [vmem:[#allocation49_spill] sm:$0xff] }
 0x653   : > { %2765 = vmatprep.subr.bf16.mxu1 %v6507_v16  ;;  %2858 = vmatpush1.bf16.msra.mxu0 %v6312_v62  ;;  %v8075_v62 = vld [vmem:[#allocation48_spill] sm:$0xff] }
 0x654   : > { %2859 = vmatprep.subr.bf16.mxu0 %v6316_v41  ;;  %v8076_v41 = vld [vmem:[#allocation25_spill] sm:$0xff] }
 0x656   : > { %2766 = vmatpush1.bf16.msra.mxu1 %v6513_v55 }
 0x657   : > { %2767 = vmatprep.subr.bf16.mxu1 %v6517_v0  ;;  %2860 = vmatpush1.bf16.msra.mxu0 %v6322_v53  ;;  %v8077_v53 = vld [vmem:[#allocation26_spill] sm:$0xff] }
 0x658   : > { %2861 = vmatprep.subr.bf16.mxu0 %v6326_v47  ;;  %v8078_v47 = vld [vmem:[#allocation24_spill] sm:$0xff] }
 0x65a   : > { %2768 = vmatpush1.bf16.msra.mxu1 %v6523_v4 }
 0x65b   : > { %2769 = vmatprep.subr.bf16.mxu1 %v6527_v6  ;;  %2862 = vmatpush1.bf16.msra.mxu0 %v6332_v10  ;;  %v8079_v10 = vld [vmem:[#allocation65_spill] sm:$0xff] }
 0x65c   : > { %2863 = vmatprep.subr.bf16.mxu0 %v6336_v63  ;;  %v8080_v63 = vld [vmem:[#allocation27_spill] sm:$0xff] }
 0x65e   : > { %2770 = vmatpush1.bf16.msra.mxu1 %v6533_v49 }
 0x65f   : > { %2771 = vmatprep.subr.bf16.mxu1 %v6537_v29  ;;  %2864 = vmatpush1.bf16.msra.mxu0 %v6342_v56  ;;  %v8081_v56 = vld [vmem:[#allocation28_spill] sm:$0xff] }
 0x660   : > { %2865 = vmatprep.subr.bf16.mxu0 %v6346_v52  ;;  %v8082_v52 = vld [vmem:[#allocation78_spill] sm:$0xff] }
 0x662   : > { %2772 = vmatpush1.bf16.msra.mxu1 %v6543_v34 }
 0x663   : > { %2773 = vmatprep.subr.bf16.mxu1 %v6547_v39  ;;  %2866 = vmatpush1.bf16.msra.mxu0 %v6352_v7  ;;  %v8083_v7 = vld [vmem:[#allocation64_spill] sm:$0xff] }
 0x664   : > { %2867 = vmatprep.subr.bf16.mxu0 %v6356_v20  ;;  %v8084_v20 = vld [vmem:[#allocation30_spill] sm:$0xff] }
 0x666   : > { %2774 = vmatpush1.bf16.msra.mxu1 %v6553_v43 }
 0x667   : > { %2775 = vmatprep.subr.bf16.mxu1 %v6557_v48  ;;  %2868 = vmatpush1.bf16.msra.mxu0 %v6362_v11  ;;  %v8085_v11 = vld [vmem:[#allocation31_spill] sm:$0xff] }
 0x668   : > { %2869 = vmatprep.subr.bf16.mxu0 %v6366_v32  ;;  %v8086_v32 = vld [vmem:[#allocation98_spill] sm:$0xff] }
 0x66a   : > { %2776 = vmatpush1.bf16.msra.mxu1 %v6563_v50 }
 0x66b   : > { %2777 = vmatprep.subr.bf16.mxu1 %v6567_v54  ;;  %2870 = vmatpush1.bf16.msra.mxu0 %v6372_v5  ;;  %v8087_v5 = vld [vmem:[#allocation99_spill] sm:$0xff] }
 0x66c   : > { %2871 = vmatprep.subr.bf16.mxu0 %v6376_v35  ;;  %v8088_v35 = vld [vmem:[#allocation32_spill] sm:$0xff] }
 0x66e   : > { %2778 = vmatpush1.bf16.msra.mxu1 %v6573_v57 }
 0x66f   : > { %2779 = vmatprep.subr.bf16.mxu1 %v6577_v24  ;;  %2872 = vmatpush1.bf16.msra.mxu0 %v6382_v31  ;;  %v8089_v31 = vld [vmem:[#allocation33_spill] sm:$0xff] }
 0x670   : > { %2873 = vmatprep.subr.bf16.mxu0 %v6386_v42  ;;  %v8090_v42 = vld [vmem:[#allocation105_spill] sm:$0xff] }
 0x672   : > { %2780 = vmatpush1.bf16.msra.mxu1 %v6583_v9 }
 0x673   : > { %2781 = vmatprep.subr.bf16.mxu1 %v6587_v14  ;;  %2874 = vmatpush1.bf16.msra.mxu0 %v6392_v60  ;;  %v8091_v60 = vld [vmem:[#allocation106_spill] sm:$0xff] }
 0x674   : > { %2875 = vmatprep.subr.bf16.mxu0 %v6396_v12  ;;  %v8092_v12 = vld [vmem:[#allocation34_spill] sm:$0xff] }
 0x676   : > { %2782 = vmatpush1.bf16.msra.mxu1 %v6593_v33 }
 0x677   : > { %2783 = vmatprep.subr.bf16.mxu1 %v8075_v62  ;;  %2876 = vmatpush1.bf16.msra.mxu0 %v8076_v41  ;;  %v8114_v41 = vld [vmem:[#allocation51_spill] sm:$0xff] }
 0x678   : > { %2877 = vmatprep.subr.bf16.mxu0 %v8077_v53  ;;  %v8115_v53 = vld [vmem:[#allocation53_spill] sm:$0xff] }
 0x67a   : > { %2784 = vmatpush1.bf16.msra.mxu1 %v8078_v47 }
 0x67b   : > { %2785 = vmatprep.subr.bf16.mxu1 %v8079_v10  ;;  %2878 = vmatpush1.bf16.msra.mxu0 %v8080_v63  ;;  %v8116_v63 = vld [vmem:[#allocation55_spill] sm:$0xff] }
 0x67c   : > { %2879 = vmatprep.subr.bf16.mxu0 %v8081_v56  ;;  %v8117_v56 = vld [vmem:[#allocation57_spill] sm:$0xff] }
 0x67e   : > { %2786 = vmatpush1.bf16.msra.mxu1 %v8082_v52 }
 0x67f   : > { %2787 = vmatprep.subr.bf16.mxu1 %v8083_v7  ;;  %2880 = vmatpush1.bf16.msra.mxu0 %v8084_v20 }
 0x680   : > { %2881 = vmatprep.subr.bf16.mxu0 %v8085_v11 }
 0x682   : > { %2788 = vmatpush1.bf16.msra.mxu1 %v8086_v32 }
 0x683   : > { %2789 = vmatprep.subr.bf16.mxu1 %v8087_v5  ;;  %2882 = vmatpush1.bf16.msra.mxu0 %v8088_v35 }
 0x684   : > { %2883 = vmatprep.subr.bf16.mxu0 %v8089_v31 }
 0x686   : > { %2790 = vmatpush1.bf16.msra.mxu1 %v8090_v42 }
 0x687   : > { %2791 = vmatprep.subr.bf16.mxu1 %v8091_v60  ;;  %2884 = vmatpush1.bf16.msra.mxu0 %v8092_v12 }
 0x688   : > { %2885 = vmatprep.subr.bf16.mxu0 %v8093_v27 }
 0x68a   : > { %2792 = vmatpush1.bf16.msra.mxu1 %v8094_v21 }
 0x68b   : > { %2793 = vmatprep.subr.bf16.mxu1 %v8095_v38  ;;  %2886 = vmatpush1.bf16.msra.mxu0 %v8096_v45 }
 0x68c   : > { %2887 = vmatprep.subr.bf16.mxu0 %v8097_v61 }
 0x68e   : > { %2794 = vmatpush1.bf16.msra.mxu1 %v8098_v26 }
 0x68f   : > { %2898 = vmatprep.subr.bf16.mxu1 %v8099_v30  ;;  %2888 = vmatpush1.bf16.msra.mxu0 %v8100_v22  ;;  %v8137_v22 = vld [vmem:[#allocation73_spill] sm:$0xff]  ;;  %v8138_v30 = vld [vmem:[#allocation70_spill] sm:$0xff] }
 0x690   : > { %2939 = vmatprep.subr.bf16.mxu0 %v8101_v15 }
 0x691   : > { %2796 = vmatmul.mubr.bf16.vlgmr.msra.gmra.mrb[44].mxu1 %v6955_v59  ;;  %v8112_v59 = vld [vmem:[#allocation47_spill] sm:$0xff] }
 0x692   : > { %2899 = vmatpush1.bf16.msra.mxu1 %v8102_v1  ;;  %v8136_v1 = vld [vmem:[#allocation71_spill] sm:$0xff] }
 0x693   : > { %2900 = vmatprep.subr.bf16.mxu1 %v8103_v8 }
 0x696   : > { %2901 = vmatpush1.bf16.msra.mxu1 %v8104_v3  ;;  %v8135_v3 = vld [vmem:[#allocation104_spill] sm:$0xff] }
 0x697   : > { %2902 = vmatprep.subr.bf16.mxu1 %v8105_v23 }
 0x69a   : > { %2903 = vmatpush1.bf16.msra.mxu1 %v8106_v17  ;;  %v8134_v17 = vld [vmem:[#allocation86_spill] sm:$0xff] }
 0x69b   : > { %2904 = vmatprep.subr.bf16.mxu1 %v8107_v36  ;;  %v8118_v36 = vld [vmem:[#allocation59_spill] sm:$0xff] }
 0x69e   : > { %2905 = vmatpush1.bf16.msra.mxu1 %v8108_v25  ;;  %v8119_v25 = vld [vmem:[#allocation60_spill] sm:$0xff] }
 0x69f   : > { %2906 = vmatprep.subr.bf16.mxu1 %v8109_v58  ;;  %v8120_v58 = vld [vmem:[#allocation61_spill] sm:$0xff] }
 0x6a2   : > { %2907 = vmatpush1.bf16.msra.mxu1 %v8110_v40  ;;  %v8121_v40 = vld [vmem:[#allocation62_spill] sm:$0xff] }
 0x6a3   : > { %2908 = vmatprep.subr.bf16.mxu1 %v8111_v13  ;;  %v8122_v13 = vld [vmem:[#allocation63_spill] sm:$0xff] }
 0x6a6   : > { %2909 = vmatpush1.bf16.msra.mxu1 %v8112_v59  ;;  %v8123_v59 = vld [vmem:[#allocation87_spill] sm:$0xff] }
 0x6a7   : > { %2910 = vmatprep.subr.bf16.mxu1 %v8113_v44  ;;  %v8124_v44 = vld [vmem:[#allocation20_spill] sm:$0xff] }
 0x6aa   : > { %2911 = vmatpush1.bf16.msra.mxu1 %v8114_v41  ;;  %v8125_v41 = vld [vmem:[#allocation22_spill] sm:$0xff] }
 0x6ab   : > { %2912 = vmatprep.subr.bf16.mxu1 %v8115_v53  ;;  %v8126_v53 = vld [vmem:[#allocation82_spill] sm:$0xff] }
 0x6ae   : > { %2913 = vmatpush1.bf16.msra.mxu1 %v8116_v63  ;;  %v8127_v63 = vld [vmem:[#allocation102_spill] sm:$0xff] }
 0x6af   : > { %2914 = vmatprep.subr.bf16.mxu1 %v8117_v56  ;;  %v8128_v56 = vld [vmem:[#allocation21_spill] sm:$0xff] }
 0x6b2   : > { %2915 = vmatpush1.bf16.msra.mxu1 %v8118_v36  ;;  %v8129_v36 = vld [vmem:[#allocation103_spill] sm:$0xff] }
 0x6b3   : > { %2916 = vmatprep.subr.bf16.mxu1 %v8119_v25  ;;  %v8130_v25 = vld [vmem:[#allocation100_spill] sm:$0xff] }
 0x6b6   : > { %2917 = vmatpush1.bf16.msra.mxu1 %v8120_v58  ;;  %v8131_v58 = vld [vmem:[#allocation101_spill] sm:$0xff] }
 0x6b7   : > { %2918 = vmatprep.subr.bf16.mxu1 %v8121_v40  ;;  %v8132_v40 = vld [vmem:[#allocation46_spill] sm:$0xff] }
 0x6ba   : > { %2919 = vmatpush1.bf16.msra.mxu1 %v8122_v13  ;;  %v8133_v13 = vld [vmem:[#allocation29_spill] sm:$0xff] }
 0x6bb   : > { %2920 = vmatprep.subr.bf16.mxu1 %v8123_v59 }
 0x6be   : > { %2921 = vmatpush1.bf16.msra.mxu1 %v8124_v44 }
 0x6bf   : > { %2922 = vmatprep.subr.bf16.mxu1 %v8125_v41 }
 0x6c2   : > { %2923 = vmatpush1.bf16.msra.mxu1 %v8126_v53 }
 0x6c3   : > { %2924 = vmatprep.subr.bf16.mxu1 %v8127_v63 }
 0x6c6   : > { %2925 = vmatpush1.bf16.msra.mxu1 %v8128_v56 }
 0x6c7   : > { %2926 = vmatprep.subr.bf16.mxu1 %v8129_v36 }
 0x6ca   : > { %2927 = vmatpush1.bf16.msra.mxu1 %v8130_v25 }
 0x6cb   : > { %2928 = vmatprep.subr.bf16.mxu1 %v8131_v58 }
 0x6ce   : > { %2929 = vmatpush1.bf16.msra.mxu1 %v8132_v40 }
 0x6cf   : > { %3033 = vmatprep.subr.bf16.mxu1 %v8133_v13 }
 0x724   : > { %v2715_v59 = vpop.f32.mrb[40].mxu1  ;;  %v2756_v44 = vpop.f32.mrb[56].mxu0 }
 0x725   : > { %v2716_v41 = vadd.f32 %v2715_v59, %v8134_v17  ;;  %v2717_v23 = vpop.f32.mrb[41].mxu1  ;;  %v2758_v53 = vpop.f32.mrb[57].mxu0 }
 0x726   : > { %v2718_v63 = vadd.f32 %v2717_v23, %v7947_v18  ;;  %v2759_v56 = vadd.f32 %v2758_v53, %v8135_v3  ;;  %v2719_v8 = vpop.f32.mrb[42].mxu1  ;;  %v2760_v36 = vpop.f32.mrb[58].mxu0  ;;  %v2757_v53 = vadd.f32 %v2756_v44, %v7952_v51  ;;  %v8139_v3 = vld [vmem:[#allocation72_spill] sm:$0xff] }
 0x727   : > { %v2810_v25 = vadd.f32 %v2716_v41, %v8136_v1  ;;  %v2720_v15 = vpop.f32.mrb[43].mxu1  ;;  %v2761_v58 = vpop.f32.mrb[59].mxu0 }
 0x728   : > { %v2811_v40 = vadd.f32 %v2718_v63, %v8137_v22  ;;  %v2830_v13 = vadd.f32 %v2759_v56, %v8138_v30 }
 0x729   : > { %v4006_v26 = vmul.f32 -1.442695, %v2810_v25 }
 0x72a   : > { %v4007_v61 = vmul.f32 -1.442695, %v2811_v40  ;;  %v4008_v58 = vmul.f32 -1.442695, %v2830_v13 }
 0x72b   : > { %4576 = vpow2.f32 %v4006_v26 }
 0x72c   : > { %4578 = vpow2.f32 %v4007_v61 }
 0x735   : > { %v4577_v59 = vpop.eup %4576 }
 0x736   : > { %v2818_v17 = vadd.f32 1.0, %v4577_v59  ;;  %v4579_v23 = vpop.eup %4578  ;;  %v8140_v59 = vld [vmem:[#allocation94_spill] sm:$0xff] }
 0x737   : > { %v2819_v15 = vadd.f32 1.0, %v4579_v23 }
 0x738   : > { %4580 = vrcp.f32 %v2818_v17 }
 0x742   : > { %v4581_v8 = vpop.eup %4580 }
 0x743   : > { %v2824_v36 = vmul.f32 %v4581_v8, %v2757_v53 }
 0x745   : > { %v2825_v1 = vadd.f32 %v2824_v36, %v8139_v3 }
 0x747   : > { %4582 = vtanh.f32 %v2825_v1  ;;  %v8141_v1 = vld [vmem:[#allocation95_spill] sm:$0xff] }
 0x748   : > { %4584 = vrcp.f32 %v2819_v15 }
 0x749   : > { %4586 = vpow2.f32 %v4008_v58 }
 0x751   : > { %v4583_v30 = vpop.eup %4582 }
 0x752   : > { %v2827_v26 = vsub.f32 %v6951_v19, %v4583_v30  ;;  %v4585_v22 = vpop.eup %4584 }
 0x753   : > { %v4587_v40 = vpop.eup %4586 }
 0x754   : > { %v2828_v25 = vmul.f32 %v4585_v22, %v2827_v26  ;;  %v2838_v44 = vadd.f32 1.0, %v4587_v40 }
 0x756   : > { %v7075_v61 = vadd.f32 %v4583_v30, %v2828_v25  ;;  %4588 = vrcp.f32 %v2838_v44 }
 0x758   : > { %v7079_v17 = vpack.c.bf16 %v7075_v61, %v7075_v61 }
 0x75a   : > { %2851 = vst [vmem:[#allocation2 + $0x20] sm:$0xf] %v7079_v17 }
 0x760   : > { %v4589_v13 = vpop.eup %4588 }
 0x764   : > { %v2797_v3 = vpop.f32.mrb[44].mxu1 }
 0x765   : > { %v2798_v41 = vadd.f32 %v2797_v3, %v7954_v2  ;;  %v2799_v63 = vpop.f32.mrb[45].mxu1 }
 0x766   : > { %v2800_v56 = vadd.f32 %v2799_v63, %v6299_v37  ;;  %v2801_v19 = vpop.f32.mrb[46].mxu1  ;;  %v7100_v63 = vld [vmem:[%s5446_s2 + $0x34] ss:$24 sps:$4 sm:$0xff]  }
 0x767   : > { %v2831_v23 = vadd.f32 %v2798_v41, %v8140_v59  ;;  %v2802_v53 = vpop.f32.mrb[47].mxu1  ;;  %v7200_v19 = vld [vmem:[%s5446_s2 + $0x214] ss:$24 sps:$4 sm:$0xff]  }
 0x768   : > { %v2844_v8 = vmul.f32 %v4589_v13, %v2800_v56  ;;  %v7106_v56 = vld [vmem:[%s5446_s2 + $0x30] ss:$24 sps:$4 sm:$0xff]  }
 0x769   : > { %v4009_v36 = vmul.f32 -1.442695, %v2831_v23  ;;  %v8149_v13 = vld [vmem:[#allocation44_spill] sm:$0xff]  ;;  %v8150_v59 = vld [vmem:[#allocation50_spill] sm:$0xff] }
 0x76a   : > { %v2845_v15 = vadd.f32 %v2844_v8, %v8141_v1  ;;  %v8152_v23 = vld [vmem:[#allocation54_spill] sm:$0xff]  ;;  %v8153_v53 = vld [vmem:[#allocation56_spill] sm:$0xff]  ;;  %v8156_v1 = vld [vmem:[#allocation45_spill] sm:$0xff] }
 0x76b   : > { %4590 = vpow2.f32 %v4009_v36  ;;  %v8154_v8 = vld [vmem:[#allocation58_spill] sm:$0xff]  ;;  %v8155_v36 = vld [vmem:[#allocation43_spill] sm:$0xff] }
 0x76c   : > { %4592 = vtanh.f32 %v2845_v15  ;;  %v8158_v15 = vld [vmem:[#allocation49_spill] sm:$0xff] }
 0x775   : > { %v4591_v58 = vpop.eup %4590 }
 0x776   : > { %v2839_v30 = vadd.f32 1.0, %v4591_v58  ;;  %v4593_v26 = vpop.eup %4592  ;;  %v8159_v58 = vld [vmem:[#allocation51_spill] sm:$0xff] }
 0x777   : > { %v2847_v22 = vsub.f32 %v6963_v46, %v4593_v26  ;;  %v7096_v46 = vld [vmem:[%s5446_s2] ss:$24 sps:$4 sm:$0xff]  }
 0x778   : > { %4594 = vrcp.f32 %v2839_v30  ;;  %v8160_v30 = vld [vmem:[#allocation53_spill] sm:$0xff] }
 0x782   : > { %v4595_v25 = vpop.eup %4594 }
 0x783   : > { %v2848_v40 = vmul.f32 %v4595_v25, %v2847_v22  ;;  %v8162_v22 = vld [vmem:[#allocation57_spill] sm:$0xff]  ;;  %v8163_v25 = vld [vmem:[#allocation59_spill] sm:$0xff] }
 0x785   : > { %v7087_v44 = vadd.f32 %v4593_v26, %v2848_v40  ;;  %v8161_v26 = vld [vmem:[#allocation55_spill] sm:$0xff]  ;;  %v8164_v40 = vld [vmem:[#allocation60_spill] sm:$0xff] }
 0x787   : > { %v2852_v3 = vpack.c.bf16 %v7087_v44, %v7087_v44 }
 0x789   : > { %v2854_v41 = vrot.slane %v2852_v3, 4  ;;  %2889 = vmatprep.mubr.bf16.mxu0 %v2852_v3  ;;  %2930 = vmatprep.mubr.bf16.mxu1 %v2852_v3 }
 0x78a   : > { %2890 = vmatmul.mubr.bf16.vlgmr.msra.gmra.mrb[60].mxu0 %v7079_v17  ;;  %2931 = vmatmul.mubr.bf16.vlgmr.msra.gmra.mrb[48].mxu1 %v7079_v17 }
 0x78b   : > { %2856 = vst [vmem:[#allocation2 + $0x18] sm:$0xf0] %v2854_v41  ;;  %2940 = vmatpush1.bf16.msra.mxu0 %v6503_v28  ;;  %2971 = vmatprep.mubr.bf16.mxu0 %v2852_v3  ;;  %v7110_v28 = vld [vmem:[%s5446_s2 + $0x64] ss:$24 sps:$4 sm:$0xff]   ;;  %v8165_v3 = vld [vmem:[#allocation61_spill] sm:$0xff]  ;;  %v8166_v41 = vld [vmem:[#allocation62_spill] sm:$0xff] }
 0x78c   : > { %2941 = vmatprep.subr.bf16.mxu0 %v6507_v16  ;;  %3034 = vmatpush1.bf16.msra.mxu1 %v7096_v46  ;;  %v7116_v16 = vld [vmem:[%s5446_s2 + $0x60] ss:$24 sps:$4 sm:$0xff]  }
 0x78d   : > { %3035 = vmatprep.subr.bf16.mxu1 %v7100_v63 }
 0x78f   : > { %2942 = vmatpush1.bf16.msra.mxu0 %v6513_v55  ;;  %v7120_v55 = vld [vmem:[%s5446_s2 + $0x94] ss:$24 sps:$4 sm:$0xff]  }
 0x790   : > { %2943 = vmatprep.subr.bf16.mxu0 %v6517_v0  ;;  %3036 = vmatpush1.bf16.msra.mxu1 %v7106_v56  ;;  %v7126_v0 = vld [vmem:[%s5446_s2 + $0x90] ss:$24 sps:$4 sm:$0xff]  }
 0x791   : > { %3037 = vmatprep.subr.bf16.mxu1 %v7110_v28 }
 0x793   : > { %2944 = vmatpush1.bf16.msra.mxu0 %v6523_v4  ;;  %v7130_v4 = vld [vmem:[%s5446_s2 + $0xc4] ss:$24 sps:$4 sm:$0xff]  }
 0x794   : > { %2945 = vmatprep.subr.bf16.mxu0 %v6527_v6  ;;  %3038 = vmatpush1.bf16.msra.mxu1 %v7116_v16  ;;  %v7136_v6 = vld [vmem:[%s5446_s2 + $0xc0] ss:$24 sps:$4 sm:$0xff]  }
 0x795   : > { %3039 = vmatprep.subr.bf16.mxu1 %v7120_v55 }
 0x797   : > { %2946 = vmatpush1.bf16.msra.mxu0 %v6533_v49  ;;  %v7140_v49 = vld [vmem:[%s5446_s2 + $0xf4] ss:$24 sps:$4 sm:$0xff]  }
 0x798   : > { %2947 = vmatprep.subr.bf16.mxu0 %v6537_v29  ;;  %3040 = vmatpush1.bf16.msra.mxu1 %v7126_v0  ;;  %v7146_v29 = vld [vmem:[%s5446_s2 + $0xf0] ss:$24 sps:$4 sm:$0xff]  }
 0x799   : > { %3041 = vmatprep.subr.bf16.mxu1 %v7130_v4 }
 0x79b   : > { %2948 = vmatpush1.bf16.msra.mxu0 %v6543_v34  ;;  %v7150_v34 = vld [vmem:[%s5446_s2 + $0x124] ss:$24 sps:$4 sm:$0xff]  }
 0x79c   : > { %2949 = vmatprep.subr.bf16.mxu0 %v6547_v39  ;;  %3042 = vmatpush1.bf16.msra.mxu1 %v7136_v6  ;;  %v7156_v39 = vld [vmem:[%s5446_s2 + $0x120] ss:$24 sps:$4 sm:$0xff]  }
 0x79d   : > { %3043 = vmatprep.subr.bf16.mxu1 %v7140_v49 }
 0x79f   : > { %2950 = vmatpush1.bf16.msra.mxu0 %v6553_v43  ;;  %v7160_v43 = vld [vmem:[%s5446_s2 + $0x154] ss:$24 sps:$4 sm:$0xff]  }
 0x7a0   : > { %2951 = vmatprep.subr.bf16.mxu0 %v6557_v48  ;;  %3044 = vmatpush1.bf16.msra.mxu1 %v7146_v29  ;;  %v7166_v48 = vld [vmem:[%s5446_s2 + $0x150] ss:$24 sps:$4 sm:$0xff]  }
 0x7a1   : > { %3045 = vmatprep.subr.bf16.mxu1 %v7150_v34 }
 0x7a3   : > { %2952 = vmatpush1.bf16.msra.mxu0 %v6563_v50  ;;  %v7170_v50 = vld [vmem:[%s5446_s2 + $0x184] ss:$24 sps:$4 sm:$0xff]  }
 0x7a4   : > { %2953 = vmatprep.subr.bf16.mxu0 %v6567_v54  ;;  %3046 = vmatpush1.bf16.msra.mxu1 %v7156_v39  ;;  %v7176_v54 = vld [vmem:[%s5446_s2 + $0x180] ss:$24 sps:$4 sm:$0xff]  }
 0x7a5   : > { %3047 = vmatprep.subr.bf16.mxu1 %v7160_v43 }
 0x7a7   : > { %2954 = vmatpush1.bf16.msra.mxu0 %v6573_v57  ;;  %v7180_v57 = vld [vmem:[%s5446_s2 + $0x1b4] ss:$24 sps:$4 sm:$0xff]  }
 0x7a8   : > { %2955 = vmatprep.subr.bf16.mxu0 %v6577_v24  ;;  %3048 = vmatpush1.bf16.msra.mxu1 %v7166_v48  ;;  %v7186_v24 = vld [vmem:[%s5446_s2 + $0x1b0] ss:$24 sps:$4 sm:$0xff]  }
 0x7a9   : > { %3049 = vmatprep.subr.bf16.mxu1 %v7170_v50 }
 0x7ab   : > { %2956 = vmatpush1.bf16.msra.mxu0 %v6583_v9  ;;  %v7190_v9 = vld [vmem:[%s5446_s2 + $0x1e4] ss:$24 sps:$4 sm:$0xff]  }
 0x7ac   : > { %2957 = vmatprep.subr.bf16.mxu0 %v6587_v14  ;;  %3050 = vmatpush1.bf16.msra.mxu1 %v7176_v54  ;;  %v7196_v14 = vld [vmem:[%s5446_s2 + $0x1e0] ss:$24 sps:$4 sm:$0xff]  }
 0x7ad   : > { %3051 = vmatprep.subr.bf16.mxu1 %v7180_v57 }
 0x7af   : > { %2958 = vmatpush1.bf16.msra.mxu0 %v6593_v33  ;;  %v8142_v33 = vld [vmem:[#allocation37_spill] sm:$0xff] }
 0x7b0   : > { %2959 = vmatprep.subr.bf16.mxu0 %v8075_v62  ;;  %3052 = vmatpush1.bf16.msra.mxu1 %v7186_v24 }
 0x7b1   : > { %3053 = vmatprep.subr.bf16.mxu1 %v7190_v9 }
 0x7b3   : > { %2960 = vmatpush1.bf16.msra.mxu0 %v8078_v47 }
 0x7b4   : > { %2961 = vmatprep.subr.bf16.mxu0 %v8079_v10  ;;  %3054 = vmatpush1.bf16.msra.mxu1 %v7196_v14 }
 0x7b5   : > { %3055 = vmatprep.subr.bf16.mxu1 %v7200_v19 }
 0x7b7   : > { %2962 = vmatpush1.bf16.msra.mxu0 %v8082_v52 }
 0x7b8   : > { %2963 = vmatprep.subr.bf16.mxu0 %v8083_v7  ;;  %3056 = vmatpush1.bf16.msra.mxu1 %v8084_v20  ;;  %v8143_v20 = vld [vmem:[#allocation109_spill] sm:$0xff] }
 0x7b9   : > { %3057 = vmatprep.subr.bf16.mxu1 %v8085_v11  ;;  %v8144_v11 = vld [vmem:[#allocation38_spill] sm:$0xff] }
 0x7bb   : > { %2964 = vmatpush1.bf16.msra.mxu0 %v8086_v32 }
 0x7bc   : > { %2965 = vmatprep.subr.bf16.mxu0 %v8087_v5  ;;  %3058 = vmatpush1.bf16.msra.mxu1 %v8088_v35  ;;  %v8145_v35 = vld [vmem:[#allocation39_spill] sm:$0xff] }
 0x7bd   : > { %3059 = vmatprep.subr.bf16.mxu1 %v8089_v31  ;;  %v8146_v31 = vld [vmem:[#allocation40_spill] sm:$0xff] }
 0x7bf   : > { %2966 = vmatpush1.bf16.msra.mxu0 %v8090_v42 }
 0x7c0   : > { %2967 = vmatprep.subr.bf16.mxu0 %v8091_v60  ;;  %3060 = vmatpush1.bf16.msra.mxu1 %v8092_v12  ;;  %v8147_v12 = vld [vmem:[#allocation41_spill] sm:$0xff] }
 0x7c1   : > { %3061 = vmatprep.subr.bf16.mxu1 %v8093_v27  ;;  %v8148_v27 = vld [vmem:[#allocation42_spill] sm:$0xff] }
 0x7c3   : > { %2968 = vmatpush1.bf16.msra.mxu0 %v8094_v21 }
 0x7c4   : > { %2969 = vmatprep.subr.bf16.mxu0 %v8095_v38  ;;  %3062 = vmatpush1.bf16.msra.mxu1 %v8096_v45  ;;  %v8151_v45 = vld [vmem:[#allocation52_spill] sm:$0xff] }
 0x7c5   : > { %3063 = vmatprep.subr.bf16.mxu1 %v8142_v33  ;;  %v8167_v33 = vld [vmem:[#allocation63_spill] sm:$0xff] }
 0x7c7   : > { %2970 = vmatpush1.bf16.msra.mxu0 %v8143_v20 }
 0x7c8   : > { %3074 = vmatprep.subr.bf16.mxu0 %v8144_v11  ;;  %3064 = vmatpush1.bf16.msra.mxu1 %v8145_v35  ;;  %v8168_v11 = vld [vmem:[#allocation87_spill] sm:$0xff]  ;;  %v8169_v35 = vld [vmem:[#allocation20_spill] sm:$0xff] }
 0x7c9   : > { %3115 = vmatprep.subr.bf16.mxu1 %v8146_v31  ;;  %v8170_v31 = vld [vmem:[#allocation22_spill] sm:$0xff] }
 0x7ca   : > { %2972 = vmatmul.mubr.bf16.vlgmr.msra.gmra.mrb[64].mxu0 %v7079_v17  ;;  %v8157_v17 = vld [vmem:[#allocation47_spill] sm:$0xff] }
 0x7cb   : > { %3075 = vmatpush1.bf16.msra.mxu0 %v8147_v12  ;;  %v8171_v12 = vld [vmem:[#allocation82_spill] sm:$0xff] }
 0x7cc   : > { %3076 = vmatprep.subr.bf16.mxu0 %v8148_v27  ;;  %v8172_v27 = vld [vmem:[#allocation102_spill] sm:$0xff] }
 0x7cf   : > { %3077 = vmatpush1.bf16.msra.mxu0 %v8149_v13  ;;  %v8173_v13 = vld [vmem:[#allocation21_spill] sm:$0xff] }
 0x7d0   : > { %3078 = vmatprep.subr.bf16.mxu0 %v8150_v59  ;;  %v8174_v59 = vld [vmem:[#allocation103_spill] sm:$0xff] }
 0x7d3   : > { %3079 = vmatpush1.bf16.msra.mxu0 %v8151_v45  ;;  %v8175_v45 = vld [vmem:[#allocation100_spill] sm:$0xff] }
 0x7d4   : > { %3080 = vmatprep.subr.bf16.mxu0 %v8152_v23  ;;  %v8176_v23 = vld [vmem:[#allocation101_spill] sm:$0xff] }
 0x7d7   : > { %3081 = vmatpush1.bf16.msra.mxu0 %v8153_v53  ;;  %v8177_v53 = vld [vmem:[#allocation46_spill] sm:$0xff] }
 0x7d8   : > { %3082 = vmatprep.subr.bf16.mxu0 %v8154_v8  ;;  %v4774_v8 = vld [vmem:[%s5446_s2 + $0x4] ss:$24 sps:$4 sm:$0xff]  }
 0x7db   : > { %3083 = vmatpush1.bf16.msra.mxu0 %v8155_v36 }
 0x7dc   : > { %3084 = vmatprep.subr.bf16.mxu0 %v8156_v1 }
 0x7df   : > { %3085 = vmatpush1.bf16.msra.mxu0 %v8157_v17  ;;  %v8178_v17 = vld [vmem:[#allocation86_spill] sm:$0xff] }
 0x7e0   : > { %3086 = vmatprep.subr.bf16.mxu0 %v8158_v15 }
 0x7e3   : > { %3087 = vmatpush1.bf16.msra.mxu0 %v8159_v58 }
 0x7e4   : > { %3088 = vmatprep.subr.bf16.mxu0 %v8160_v30 }
 0x7e7   : > { %3089 = vmatpush1.bf16.msra.mxu0 %v8161_v26 }
 0x7e8   : > { %3090 = vmatprep.subr.bf16.mxu0 %v8162_v22  ;;  %v8179_v22 = vld [vmem:[#allocation104_spill] sm:$0xff] }
 0x7eb   : > { %3091 = vmatpush1.bf16.msra.mxu0 %v8163_v25 }
 0x7ec   : > { %3092 = vmatprep.subr.bf16.mxu0 %v8164_v40 }
 0x7ef   : > { %3093 = vmatpush1.bf16.msra.mxu0 %v8165_v3 }
 0x7f0   : > { %3094 = vmatprep.subr.bf16.mxu0 %v8166_v41  ;;  %v8180_v41 = vld [vmem:[#allocation75_spill] sm:$0xff] }
 0x7f3   : > { %3095 = vmatpush1.bf16.msra.mxu0 %v8167_v33 }
 0x7f4   : > { %3096 = vmatprep.subr.bf16.mxu0 %v8168_v11 }
 0x7f7   : > { %3097 = vmatpush1.bf16.msra.mxu0 %v8169_v35 }
 0x7f8   : > { %3098 = vmatprep.subr.bf16.mxu0 %v8170_v31  ;;  %v8181_v31 = vld [vmem:[#allocation77_spill] sm:$0xff] }
 0x7fb   : > { %3099 = vmatpush1.bf16.msra.mxu0 %v8171_v12 }
 0x7fc   : > { %3100 = vmatprep.subr.bf16.mxu0 %v8172_v27  ;;  %v8182_v27 = vld [vmem:[#allocation66_spill] sm:$0xff] }
 0x7ff   : > { %3101 = vmatpush1.bf16.msra.mxu0 %v8173_v13 }
 0x800   : > { %3102 = vmatprep.subr.bf16.mxu0 %v8174_v59 }
 0x803   : > { %3103 = vmatpush1.bf16.msra.mxu0 %v8175_v45 }
 0x804   : > { %3104 = vmatprep.subr.bf16.mxu0 %v8176_v23 }
 0x807   : > { %3105 = vmatpush1.bf16.msra.mxu0 %v8177_v53 }
 0x808   : > { %3209 = vmatprep.subr.bf16.mxu0 %v4774_v8 }
 0x85d   : > { %v2891_v36 = vpop.f32.mrb[60].mxu0  ;;  %v2932_v1 = vpop.f32.mrb[48].mxu1 }
 0x85e   : > { %v2892_v15 = vadd.f32 %v2891_v36, %v8178_v17  ;;  %v2893_v58 = vpop.f32.mrb[61].mxu0  ;;  %v2934_v30 = vpop.f32.mrb[49].mxu1  ;;  %v2933_v36 = vadd.f32 %v2932_v1, %v7952_v51 }
 0x85f   : > { %v2894_v26 = vadd.f32 %v2893_v58, %v7947_v18  ;;  %v2935_v25 = vadd.f32 %v2934_v30, %v8179_v22  ;;  %v2895_v40 = vpop.f32.mrb[62].mxu0  ;;  %v2936_v3 = vpop.f32.mrb[50].mxu1 }
 0x860   : > { %v2986_v33 = vadd.f32 %v2892_v15, %v8180_v41  ;;  %v2896_v11 = vpop.f32.mrb[63].mxu0  ;;  %v2937_v35 = vpop.f32.mrb[51].mxu1  ;;  %v8183_v40 = vld [vmem:[#allocation76_spill] sm:$0xff] }
 0x861   : > { %v2987_v12 = vadd.f32 %v2894_v26, %v8181_v31  ;;  %v3006_v13 = vadd.f32 %v2935_v25, %v8182_v27 }
 0x862   : > { %v4010_v59 = vmul.f32 -1.442695, %v2986_v33 }
 0x863   : > { %v4011_v45 = vmul.f32 -1.442695, %v2987_v12  ;;  %v4012_v41 = vmul.f32 -1.442695, %v3006_v13 }
 0x864   : > { %4596 = vpow2.f32 %v4010_v59 }
 0x865   : > { %4598 = vpow2.f32 %v4011_v45 }
 0x86e   : > { %v4597_v23 = vpop.eup %4596 }
 0x86f   : > { %v2994_v53 = vadd.f32 1.0, %v4597_v23  ;;  %v4599_v8 = vpop.eup %4598 }
 0x870   : > { %v2995_v3 = vadd.f32 1.0, %v4599_v8  ;;  %v8184_v8 = vld [vmem:[#allocation92_spill] sm:$0xff] }
 0x871   : > { %4600 = vrcp.f32 %v2994_v53 }
 0x87b   : > { %v4601_v58 = vpop.eup %4600 }
 0x87c   : > { %v3000_v30 = vmul.f32 %v4601_v58, %v2933_v36 }
 0x87e   : > { %v3001_v15 = vadd.f32 %v3000_v30, %v8183_v40 }
 0x880   : > { %4602 = vtanh.f32 %v3001_v15  ;;  %v8185_v15 = vld [vmem:[#allocation93_spill] sm:$0xff] }
 0x881   : > { %4604 = vrcp.f32 %v2995_v3 }
 0x882   : > { %4606 = vpow2.f32 %v4012_v41 }
 0x88a   : > { %v4603_v26 = vpop.eup %4602 }
 0x88b   : > { %v3003_v25 = vsub.f32 %v7075_v61, %v4603_v26  ;;  %v4605_v33 = vpop.eup %4604 }
 0x88c   : > { %v4607_v35 = vpop.eup %4606 }
 0x88d   : > { %v3004_v11 = vmul.f32 %v4605_v33, %v3003_v25  ;;  %v3014_v12 = vadd.f32 1.0, %v4607_v35 }
 0x88f   : > { %v7265_v31 = vadd.f32 %v4603_v26, %v3004_v11  ;;  %4608 = vrcp.f32 %v3014_v12 }
 0x891   : > { %v7269_v1 = vpack.c.bf16 %v7265_v31, %v7265_v31 }
 0x893   : > { %v3028_v27 = vrot.slane %v7269_v1, 4 }
 0x895   : > { %3030 = vst [vmem:[#allocation2 + $0x20] sm:$0xf0] %v3028_v27 }
 0x899   : > { %v4609_v53 = vpop.eup %4608 }
 0x89d   : > { %v2973_v13 = vpop.f32.mrb[64].mxu0 }
 0x89e   : > { %v2974_v59 = vadd.f32 %v2973_v13, %v7954_v2  ;;  %v2975_v45 = vpop.f32.mrb[65].mxu0  ;;  %v7284_v13 = vld [vmem:[%s5446_s2 + $0x10] ss:$24 sps:$4 sm:$0xff]  }
 0x89f   : > { %v2976_v61 = vadd.f32 %v2975_v45, %v6299_v37  ;;  %v2977_v23 = vpop.f32.mrb[66].mxu0  ;;  %v7298_v45 = vld [vmem:[%s5446_s2 + $0x74] ss:$24 sps:$4 sm:$0xff]  }
 0x8a0   : > { %v3007_v36 = vadd.f32 %v2974_v59, %v8184_v8  ;;  %v2978_v58 = vpop.f32.mrb[67].mxu0  ;;  %v7294_v59 = vld [vmem:[%s5446_s2 + $0x40] ss:$24 sps:$4 sm:$0xff]  }
 0x8a1   : > { %v3020_v30 = vmul.f32 %v4609_v53, %v2976_v61  ;;  %v7304_v61 = vld [vmem:[%s5446_s2 + $0x70] ss:$24 sps:$4 sm:$0xff]   ;;  %v4816_v53 = vld [vmem:[%s5446_s2 + $0x12c] ss:$24 sps:$4 sm:$0xff]  }
 0x8a2   : > { %v4013_v40 = vmul.f32 -1.442695, %v3007_v36  ;;  %v4815_v23 = vld [vmem:[%s5446_s2 + $0xf8] ss:$24 sps:$4 sm:$0xff]   ;;  %v4817_v8 = vld [vmem:[%s5446_s2 + $0x128] ss:$24 sps:$4 sm:$0xff]  }
 0x8a3   : > { %v3021_v3 = vadd.f32 %v3020_v30, %v8185_v15  ;;  %v4818_v36 = vld [vmem:[%s5446_s2 + $0x15c] ss:$24 sps:$4 sm:$0xff]   ;;  %v4819_v58 = vld [vmem:[%s5446_s2 + $0x158] ss:$24 sps:$4 sm:$0xff]   ;;  %v4820_v30 = vld [vmem:[%s5446_s2 + $0x18c] ss:$24 sps:$4 sm:$0xff]  }
 0x8a4   : > { %4610 = vpow2.f32 %v4013_v40  ;;  %v4821_v40 = vld [vmem:[%s5446_s2 + $0x188] ss:$24 sps:$4 sm:$0xff]   ;;  %v4822_v15 = vld [vmem:[%s5446_s2 + $0x1bc] ss:$24 sps:$4 sm:$0xff]  }
 0x8a5   : > { %4612 = vtanh.f32 %v3021_v3  ;;  %v4823_v3 = vld [vmem:[%s5446_s2 + $0x1b8] ss:$24 sps:$4 sm:$0xff]  }
 0x8ae   : > { %v4611_v41 = vpop.eup %4610 }
 0x8af   : > { %v3015_v26 = vadd.f32 1.0, %v4611_v41  ;;  %v4613_v25 = vpop.eup %4612  ;;  %v4824_v41 = vld [vmem:[%s5446_s2 + $0x1ec] ss:$24 sps:$4 sm:$0xff]  }
 0x8b0   : > { %v3023_v33 = vsub.f32 %v7087_v44, %v4613_v25  ;;  %v7288_v44 = vld [vmem:[%s5446_s2 + $0x44] ss:$24 sps:$4 sm:$0xff]  }
 0x8b1   : > { %4614 = vrcp.f32 %v3015_v26  ;;  %v4825_v26 = vld [vmem:[%s5446_s2 + $0x1e8] ss:$24 sps:$4 sm:$0xff]  }
 0x8bb   : > { %v4615_v11 = vpop.eup %4614 }
 0x8bc   : > { %v3024_v35 = vmul.f32 %v4615_v11, %v3023_v33  ;;  %v4827_v33 = vld [vmem:[%s5446_s2 + $0x218] ss:$24 sps:$4 sm:$0xff]   ;;  %v4828_v11 = vld [vmem:[%s5446_s2 + $0x24c] ss:$24 sps:$4 sm:$0xff]  }
 0x8be   : > { %v7277_v12 = vadd.f32 %v4613_v25, %v3024_v35  ;;  %v4826_v25 = vld [vmem:[%s5446_s2 + $0x21c] ss:$24 sps:$4 sm:$0xff]   ;;  %v4829_v35 = vld [vmem:[%s5446_s2 + $0x248] ss:$24 sps:$4 sm:$0xff]  }
 0x8c0   : > { %v3031_v27 = vpack.c.bf16 %v7277_v12, %v7277_v12 }
 0x8c2   : > { %3032 = vst [vmem:[#allocation2 + $0x18] sm:$0xf] %v3031_v27  ;;  %3065 = vmatprep.mubr.bf16.mxu1 %v3031_v27  ;;  %3106 = vmatprep.mubr.bf16.mxu0 %v3031_v27 }
 0x8c3   : > { %3066 = vmatmul.mubr.bf16.vlgmr.msra.gmra.mrb[52].mxu1 %v7269_v1  ;;  %3107 = vmatmul.mubr.bf16.vlgmr.msra.gmra.mrb[68].mxu0 %v7269_v1 }
 0x8c4   : > { %3116 = vmatpush1.bf16.msra.mxu1 %v7284_v13  ;;  %3147 = vmatprep.mubr.bf16.mxu1 %v3031_v27  ;;  %v4830_v27 = vld [vmem:[%s5446_s2 + $0x27c] ss:$24 sps:$4 sm:$0xff]  }
 0x8c5   : > { %3117 = vmatprep.subr.bf16.mxu1 %v7288_v44  ;;  %3210 = vmatpush1.bf16.msra.mxu0 %v7096_v46  ;;  %v7308_v46 = vld [vmem:[%s5446_s2 + $0xa4] ss:$24 sps:$4 sm:$0xff]  }
 0x8c6   : > { %3211 = vmatprep.subr.bf16.mxu0 %v7100_v63  ;;  %v7314_v63 = vld [vmem:[%s5446_s2 + $0xa0] ss:$24 sps:$4 sm:$0xff]  }
 0x8c8   : > { %3118 = vmatpush1.bf16.msra.mxu1 %v7294_v59 }
 0x8c9   : > { %3119 = vmatprep.subr.bf16.mxu1 %v7298_v45  ;;  %3212 = vmatpush1.bf16.msra.mxu0 %v7106_v56  ;;  %v7318_v56 = vld [vmem:[%s5446_s2 + $0xd4] ss:$24 sps:$4 sm:$0xff]  }
 0x8ca   : > { %3213 = vmatprep.subr.bf16.mxu0 %v7110_v28  ;;  %v7324_v28 = vld [vmem:[%s5446_s2 + $0xd0] ss:$24 sps:$4 sm:$0xff]  }
 0x8cc   : > { %3120 = vmatpush1.bf16.msra.mxu1 %v7304_v61 }
 0x8cd   : > { %3121 = vmatprep.subr.bf16.mxu1 %v7308_v46  ;;  %3214 = vmatpush1.bf16.msra.mxu0 %v7116_v16  ;;  %v7328_v16 = vld [vmem:[%s5446_s2 + $0x104] ss:$24 sps:$4 sm:$0xff]  }
 0x8ce   : > { %3215 = vmatprep.subr.bf16.mxu0 %v7120_v55  ;;  %v7334_v55 = vld [vmem:[%s5446_s2 + $0x100] ss:$24 sps:$4 sm:$0xff]  }
 0x8d0   : > { %3122 = vmatpush1.bf16.msra.mxu1 %v7314_v63 }
 0x8d1   : > { %3123 = vmatprep.subr.bf16.mxu1 %v7318_v56  ;;  %3216 = vmatpush1.bf16.msra.mxu0 %v7126_v0  ;;  %v7338_v0 = vld [vmem:[%s5446_s2 + $0x134] ss:$24 sps:$4 sm:$0xff]  }
 0x8d2   : > { %3217 = vmatprep.subr.bf16.mxu0 %v7130_v4  ;;  %v7344_v4 = vld [vmem:[%s5446_s2 + $0x130] ss:$24 sps:$4 sm:$0xff]  }
 0x8d4   : > { %3124 = vmatpush1.bf16.msra.mxu1 %v7324_v28 }
 0x8d5   : > { %3125 = vmatprep.subr.bf16.mxu1 %v7328_v16  ;;  %3218 = vmatpush1.bf16.msra.mxu0 %v7136_v6  ;;  %v7348_v6 = vld [vmem:[%s5446_s2 + $0x164] ss:$24 sps:$4 sm:$0xff]  }
 0x8d6   : > { %3219 = vmatprep.subr.bf16.mxu0 %v7140_v49  ;;  %v7354_v49 = vld [vmem:[%s5446_s2 + $0x160] ss:$24 sps:$4 sm:$0xff]  }
 0x8d8   : > { %3126 = vmatpush1.bf16.msra.mxu1 %v7334_v55 }
 0x8d9   : > { %3127 = vmatprep.subr.bf16.mxu1 %v7338_v0  ;;  %3220 = vmatpush1.bf16.msra.mxu0 %v7146_v29  ;;  %v7358_v29 = vld [vmem:[%s5446_s2 + $0x194] ss:$24 sps:$4 sm:$0xff]  }
 0x8da   : > { %3221 = vmatprep.subr.bf16.mxu0 %v7150_v34  ;;  %v7364_v34 = vld [vmem:[%s5446_s2 + $0x190] ss:$24 sps:$4 sm:$0xff]  }
 0x8dc   : > { %3128 = vmatpush1.bf16.msra.mxu1 %v7344_v4 }
 0x8dd   : > { %3129 = vmatprep.subr.bf16.mxu1 %v7348_v6  ;;  %3222 = vmatpush1.bf16.msra.mxu0 %v7156_v39  ;;  %v7368_v39 = vld [vmem:[%s5446_s2 + $0x1c4] ss:$24 sps:$4 sm:$0xff]  }
 0x8de   : > { %3223 = vmatprep.subr.bf16.mxu0 %v7160_v43  ;;  %v7374_v43 = vld [vmem:[%s5446_s2 + $0x1c0] ss:$24 sps:$4 sm:$0xff]  }
 0x8e0   : > { %3130 = vmatpush1.bf16.msra.mxu1 %v7354_v49 }
 0x8e1   : > { %3131 = vmatprep.subr.bf16.mxu1 %v7358_v29  ;;  %3224 = vmatpush1.bf16.msra.mxu0 %v7166_v48  ;;  %v4795_v48 = vld [vmem:[%s5446_s2 + $0x244] ss:$24 sps:$4 sm:$0xff]  }
 0x8e2   : > { %3225 = vmatprep.subr.bf16.mxu0 %v7170_v50  ;;  %v4804_v50 = vld [vmem:[%s5446_s2 + $0x14] ss:$24 sps:$4 sm:$0xff]  }
 0x8e4   : > { %3132 = vmatpush1.bf16.msra.mxu1 %v7364_v34 }
 0x8e5   : > { %3133 = vmatprep.subr.bf16.mxu1 %v7368_v39  ;;  %3226 = vmatpush1.bf16.msra.mxu0 %v7176_v54  ;;  %v4807_v54 = vld [vmem:[%s5446_s2 + $0x38] ss:$24 sps:$4 sm:$0xff]  }
 0x8e6   : > { %3227 = vmatprep.subr.bf16.mxu0 %v7180_v57  ;;  %v4808_v57 = vld [vmem:[%s5446_s2 + $0x6c] ss:$24 sps:$4 sm:$0xff]  }
 0x8e8   : > { %3134 = vmatpush1.bf16.msra.mxu1 %v7374_v43 }
 0x8e9   : > { %3135 = vmatprep.subr.bf16.mxu1 %v8075_v62  ;;  %3228 = vmatpush1.bf16.msra.mxu0 %v7186_v24  ;;  %v4794_v62 = vld [vmem:[%s5446_s2 + $0x210] ss:$24 sps:$4 sm:$0xff]  }
 0x8ea   : > { %3229 = vmatprep.subr.bf16.mxu0 %v7190_v9  ;;  %v4809_v24 = vld [vmem:[%s5446_s2 + $0x68] ss:$24 sps:$4 sm:$0xff]   ;;  %v4810_v9 = vld [vmem:[%s5446_s2 + $0x9c] ss:$24 sps:$4 sm:$0xff]  }
 0x8ec   : > { %3136 = vmatpush1.bf16.msra.mxu1 %v8078_v47  ;;  %v4796_v47 = vld [vmem:[%s5446_s2 + $0x240] ss:$24 sps:$4 sm:$0xff]  }
 0x8ed   : > { %3137 = vmatprep.subr.bf16.mxu1 %v8079_v10  ;;  %3230 = vmatpush1.bf16.msra.mxu0 %v7196_v14  ;;  %v4797_v10 = vld [vmem:[%s5446_s2 + $0x274] ss:$24 sps:$4 sm:$0xff]   ;;  %v4811_v14 = vld [vmem:[%s5446_s2 + $0x98] ss:$24 sps:$4 sm:$0xff]  }
 0x8ee   : > { %3231 = vmatprep.subr.bf16.mxu0 %v7200_v19  ;;  %v4812_v19 = vld [vmem:[%s5446_s2 + $0xcc] ss:$24 sps:$4 sm:$0xff]  }
 0x8f0   : > { %3138 = vmatpush1.bf16.msra.mxu1 %v8082_v52  ;;  %v4798_v52 = vld [vmem:[%s5446_s2 + $0x270] ss:$24 sps:$4 sm:$0xff]  }
 0x8f1   : > { %3139 = vmatprep.subr.bf16.mxu1 %v8083_v7  ;;  %3232 = vmatpush1.bf16.msra.mxu0 %v4794_v62  ;;  %v4799_v7 = vld [vmem:[%s5446_s2 + $0x2a4] ss:$24 sps:$4 sm:$0xff]   ;;  %v4831_v62 = vld [vmem:[%s5446_s2 + $0x278] ss:$24 sps:$4 sm:$0xff]  }
 0x8f2   : > { %3233 = vmatprep.subr.bf16.mxu0 %v4795_v48  ;;  %v4832_v48 = vld [vmem:[%s5446_s2 + $0x2ac] ss:$24 sps:$4 sm:$0xff]  }
 0x8f4   : > { %3140 = vmatpush1.bf16.msra.mxu1 %v8086_v32  ;;  %v4800_v32 = vld [vmem:[%s5446_s2 + $0x2a0] ss:$24 sps:$4 sm:$0xff]  }
 0x8f5   : > { %3141 = vmatprep.subr.bf16.mxu1 %v8087_v5  ;;  %3234 = vmatpush1.bf16.msra.mxu0 %v4796_v47  ;;  %v4801_v5 = vld [vmem:[%s5446_s2 + $0x2d4] ss:$24 sps:$4 sm:$0xff]   ;;  %v4833_v47 = vld [vmem:[%s5446_s2 + $0x2a8] ss:$24 sps:$4 sm:$0xff]  }
 0x8f6   : > { %3235 = vmatprep.subr.bf16.mxu0 %v4797_v10  ;;  %v4834_v10 = vld [vmem:[%s5446_s2 + $0x2dc] ss:$24 sps:$4 sm:$0xff]  }
 0x8f8   : > { %3142 = vmatpush1.bf16.msra.mxu1 %v8090_v42  ;;  %v4802_v42 = vld [vmem:[%s5446_s2 + $0xc] ss:$24 sps:$4 sm:$0xff]  }
 0x8f9   : > { %3143 = vmatprep.subr.bf16.mxu1 %v8091_v60  ;;  %3236 = vmatpush1.bf16.msra.mxu0 %v4798_v52  ;;  %v4803_v60 = vld [vmem:[%s5446_s2 + $0x2d0] ss:$24 sps:$4 sm:$0xff]  }
 0x8fa   : > { %3237 = vmatprep.subr.bf16.mxu0 %v4799_v7  ;;  %v4835_v52 = vld [vmem:[%s5446_s2 + $0x2d8] ss:$24 sps:$4 sm:$0xff]  }
 0x8fc   : > { %3144 = vmatpush1.bf16.msra.mxu1 %v8094_v21  ;;  %v4805_v21 = vld [vmem:[%s5446_s2 + $0x8] ss:$24 sps:$4 sm:$0xff]  }
 0x8fd   : > { %3145 = vmatprep.subr.bf16.mxu1 %v8095_v38  ;;  %3238 = vmatpush1.bf16.msra.mxu0 %v4800_v32  ;;  %v4806_v38 = vld [vmem:[%s5446_s2 + $0x3c] ss:$24 sps:$4 sm:$0xff]  }
 0x8fe   : > { %3239 = vmatprep.subr.bf16.mxu0 %v4801_v5 }
 0x900   : > { %3146 = vmatpush1.bf16.msra.mxu1 %v8143_v20  ;;  %v4813_v20 = vld [vmem:[%s5446_s2 + $0xc8] ss:$24 sps:$4 sm:$0xff]  }
 0x901   : > { %3250 = vmatprep.subr.bf16.mxu1 %v4802_v42  ;;  %3240 = vmatpush1.bf16.msra.mxu0 %v4803_v60 }
 0x902   : > { %3291 = vmatprep.subr.bf16.mxu0 %v4804_v50 }
 0x903   : > { %3148 = vmatmul.mubr.bf16.vlgmr.msra.gmra.mrb[56].mxu1 %v7269_v1  ;;  %v4814_v1 = vld [vmem:[%s5446_s2 + $0xfc] ss:$24 sps:$4 sm:$0xff]  }
 0x904   : > { %3251 = vmatpush1.bf16.msra.mxu1 %v4805_v21 }
 0x905   : > { %3252 = vmatprep.subr.bf16.mxu1 %v4806_v38 }
 0x908   : > { %3253 = vmatpush1.bf16.msra.mxu1 %v4807_v54 }
 0x909   : > { %3254 = vmatprep.subr.bf16.mxu1 %v4808_v57  ;;  %v8186_v57 = vld [vmem:[#allocation79_spill] sm:$0xff] }
 0x90c   : > { %3255 = vmatpush1.bf16.msra.mxu1 %v4809_v24 }
 0x90d   : > { %3256 = vmatprep.subr.bf16.mxu1 %v4810_v9 }
 0x910   : > { %3257 = vmatpush1.bf16.msra.mxu1 %v4811_v14 }
 0x911   : > { %3258 = vmatprep.subr.bf16.mxu1 %v4812_v19  ;;  %v8187_v19 = vld [vmem:[#allocation81_spill] sm:$0xff] }
 0x914   : > { %3259 = vmatpush1.bf16.msra.mxu1 %v4813_v20 }
 0x915   : > { %3260 = vmatprep.subr.bf16.mxu1 %v4814_v1  ;;  %v8188_v1 = vld [vmem:[#allocation23_spill] sm:$0xff] }
 0x918   : > { %3261 = vmatpush1.bf16.msra.mxu1 %v4815_v23 }
 0x919   : > { %3262 = vmatprep.subr.bf16.mxu1 %v4816_v53 }
 0x91c   : > { %3263 = vmatpush1.bf16.msra.mxu1 %v4817_v8 }
 0x91d   : > { %3264 = vmatprep.subr.bf16.mxu1 %v4818_v36 }
 0x920   : > { %3265 = vmatpush1.bf16.msra.mxu1 %v4819_v58 }
 0x921   : > { %3266 = vmatprep.subr.bf16.mxu1 %v4820_v30 }
 0x924   : > { %3267 = vmatpush1.bf16.msra.mxu1 %v4821_v40 }
 0x925   : > { %3268 = vmatprep.subr.bf16.mxu1 %v4822_v15 }
 0x928   : > { %3269 = vmatpush1.bf16.msra.mxu1 %v4823_v3 }
 0x929   : > { %3270 = vmatprep.subr.bf16.mxu1 %v4824_v41  ;;  %v8189_v41 = vld [vmem:[#allocation80_spill] sm:$0xff] }
 0x92c   : > { %3271 = vmatpush1.bf16.msra.mxu1 %v4825_v26 }
 0x92d   : > { %3272 = vmatprep.subr.bf16.mxu1 %v4826_v25 }
 0x930   : > { %3273 = vmatpush1.bf16.msra.mxu1 %v4827_v33 }
 0x931   : > { %3274 = vmatprep.subr.bf16.mxu1 %v4828_v11 }
 0x934   : > { %3275 = vmatpush1.bf16.msra.mxu1 %v4829_v35 }
 0x935   : > { %3276 = vmatprep.subr.bf16.mxu1 %v4830_v27 }
 0x938   : > { %3277 = vmatpush1.bf16.msra.mxu1 %v4831_v62 }
 0x939   : > { %3278 = vmatprep.subr.bf16.mxu1 %v4832_v48 }
 0x93c   : > { %3279 = vmatpush1.bf16.msra.mxu1 %v4833_v47 }
 0x93d   : > { %3280 = vmatprep.subr.bf16.mxu1 %v4834_v10 }
 0x940   : > { %3281 = vmatpush1.bf16.msra.mxu1 %v4835_v52 }
 0x996   : > { %v3067_v7 = vpop.f32.mrb[52].mxu1  ;;  %v3108_v32 = vpop.f32.mrb[68].mxu0 }
 0x997   : > { %v3068_v5 = vadd.f32 %v3067_v7, %v8178_v17  ;;  %v3069_v42 = vpop.f32.mrb[53].mxu1  ;;  %v3110_v60 = vpop.f32.mrb[69].mxu0  ;;  %v3109_v40 = vadd.f32 %v3108_v32, %v7952_v51 }
 0x998   : > { %v3070_v50 = vadd.f32 %v3069_v42, %v7947_v18  ;;  %v3111_v21 = vadd.f32 %v3110_v60, %v8179_v22  ;;  %v3071_v38 = vpop.f32.mrb[54].mxu1  ;;  %v3112_v54 = vpop.f32.mrb[70].mxu0 }
 0x999   : > { %v3162_v24 = vadd.f32 %v3068_v5, %v8186_v57  ;;  %v3072_v9 = vpop.f32.mrb[55].mxu1  ;;  %v3113_v14 = vpop.f32.mrb[71].mxu0 }
 0x99a   : > { %v3163_v20 = vadd.f32 %v3070_v50, %v8187_v19  ;;  %v3182_v23 = vadd.f32 %v3111_v21, %v8188_v1  ;;  %v8190_v50 = vld [vmem:[#allocation90_spill] sm:$0xff] }
 0x99b   : > { %v4014_v53 = vmul.f32 -1.442695, %v3162_v24  ;;  %v8191_v24 = vld [vmem:[#allocation91_spill] sm:$0xff] }
 0x99c   : > { %v4015_v8 = vmul.f32 -1.442695, %v3163_v20  ;;  %v4016_v33 = vmul.f32 -1.442695, %v3182_v23 }
 0x99d   : > { %4616 = vpow2.f32 %v4014_v53 }
 0x99e   : > { %4618 = vpow2.f32 %v4015_v8 }
 0x9a7   : > { %v4617_v36 = vpop.eup %4616 }
 0x9a8   : > { %v3170_v58 = vadd.f32 1.0, %v4617_v36  ;;  %v4619_v30 = vpop.eup %4618 }
 0x9a9   : > { %v3171_v25 = vadd.f32 1.0, %v4619_v30 }
 0x9aa   : > { %4620 = vrcp.f32 %v3170_v58 }
 0x9b4   : > { %v4621_v15 = vpop.eup %4620 }
 0x9b5   : > { %v3176_v3 = vmul.f32 %v4621_v15, %v3109_v40  ;;  %v8192_v40 = vld [vmem:[#allocation83_spill] sm:$0xff] }
 0x9b7   : > { %v3177_v26 = vadd.f32 %v3176_v3, %v8189_v41 }
 0x9b9   : > { %4622 = vtanh.f32 %v3177_v26  ;;  %v8193_v26 = vld [vmem:[#allocation85_spill] sm:$0xff] }
 0x9ba   : > { %4624 = vrcp.f32 %v3171_v25 }
 0x9bb   : > { %4626 = vpow2.f32 %v4016_v33  ;;  %v8194_v33 = vld [vmem:[#allocation19_spill] sm:$0xff] }
 0x9c3   : > { %v4623_v11 = vpop.eup %4622 }
 0x9c4   : > { %v3179_v35 = vsub.f32 %v7265_v31, %v4623_v11  ;;  %v4625_v27 = vpop.eup %4624 }
 0x9c5   : > { %v4627_v48 = vpop.eup %4626 }
 0x9c6   : > { %v3180_v62 = vmul.f32 %v4625_v27, %v3179_v35  ;;  %v3190_v52 = vadd.f32 1.0, %v4627_v48 }
 0x9c8   : > { %v7445_v47 = vadd.f32 %v4623_v11, %v3180_v62  ;;  %4628 = vrcp.f32 %v3190_v52  ;;  %v8195_v52 = vld [vmem:[#allocation84_spill] sm:$0xff] }
 0x9ca   : > { %v7449_v10 = vpack.c.bf16 %v7445_v47, %v7445_v47 }
 0x9cc   : > { %3203 = vst [vmem:[#allocation2 + $0x30] sm:$0xf] %v7449_v10 }
 0x9d2   : > { %v4629_v60 = vpop.eup %4628 }
 0x9d6   : > { %v3149_v7 = vpop.f32.mrb[56].mxu1 }
 0x9d7   : > { %v3150_v32 = vadd.f32 %v3149_v7, %v7954_v2  ;;  %v3151_v5 = vpop.f32.mrb[57].mxu1 }
 0x9d8   : > { %v3152_v42 = vadd.f32 %v3151_v5, %v6299_v37  ;;  %v3153_v31 = vpop.f32.mrb[58].mxu1 }
 0x9d9   : > { %v3183_v21 = vadd.f32 %v3150_v32, %v8190_v50  ;;  %v3154_v38 = vpop.f32.mrb[59].mxu1 }
 0x9da   : > { %v3196_v54 = vmul.f32 %v4629_v60, %v3152_v42 }
 0x9db   : > { %v4017_v57 = vmul.f32 -1.442695, %v3183_v21 }
 0x9dc   : > { %v3197_v9 = vadd.f32 %v3196_v54, %v8191_v24 }
 0x9dd   : > { %4630 = vpow2.f32 %v4017_v57 }
 0x9de   : > { %4632 = vtanh.f32 %v3197_v9 }
 0x9e7   : > { %v4631_v14 = vpop.eup %4630 }
 0x9e8   : > { %v3191_v19 = vadd.f32 1.0, %v4631_v14  ;;  %v4633_v20 = vpop.eup %4632 }
 0x9e9   : > { %v3199_v1 = vsub.f32 %v7277_v12, %v4633_v20  ;;  %v4836_v12 = vld [vmem:[%s5446_s2 + $0x1f4] ss:$24 sps:$4 sm:$0xff]  }
 0x9ea   : > { %4634 = vrcp.f32 %v3191_v19 }
 0x9f4   : > { %v4635_v23 = vpop.eup %4634 }
 0x9f5   : > { %v3200_v53 = vmul.f32 %v4635_v23, %v3199_v1  ;;  %v8196_v23 = vld [vmem:[#allocation88_spill] sm:$0xff] }
 0x9f7   : > { %v7457_v8 = vadd.f32 %v4633_v20, %v3200_v53 }
 0x9f9   : > { %v3204_v36 = vpack.c.bf16 %v7457_v8, %v7457_v8 }
 0x9fb   : > { %v3206_v58 = vrot.slane %v3204_v36, 4  ;;  %3241 = vmatprep.mubr.bf16.mxu0 %v3204_v36  ;;  %3282 = vmatprep.mubr.bf16.mxu1 %v3204_v36 }
 0x9fc   : > { %3242 = vmatmul.mubr.bf16.vlgmr.msra.gmra.mrb[72].mxu0 %v7449_v10  ;;  %3283 = vmatmul.mubr.bf16.vlgmr.msra.gmra.mrb[60].mxu1 %v7449_v10 }
 0x9fd   : > { %3208 = vst [vmem:[#allocation2 + $0x8] sm:$0xf0] %v3206_v58  ;;  %3292 = vmatpush1.bf16.msra.mxu0 %v7284_v13  ;;  %3323 = vmatprep.mubr.bf16.mxu0 %v3204_v36  ;;  %v4837_v13 = vld [vmem:[%s5446_s2 + $0x1f0] ss:$24 sps:$4 sm:$0xff]  }
 0x9fe   : > { %3293 = vmatprep.subr.bf16.mxu0 %v7288_v44  ;;  %v4838_v44 = vld [vmem:[%s5446_s2 + $0x224] ss:$24 sps:$4 sm:$0xff]  }
 0xa01   : > { %3294 = vmatpush1.bf16.msra.mxu0 %v7294_v59  ;;  %v4839_v59 = vld [vmem:[%s5446_s2 + $0x220] ss:$24 sps:$4 sm:$0xff]  }
 0xa02   : > { %3295 = vmatprep.subr.bf16.mxu0 %v7298_v45  ;;  %v4840_v45 = vld [vmem:[%s5446_s2 + $0x254] ss:$24 sps:$4 sm:$0xff]  }
 0xa05   : > { %3296 = vmatpush1.bf16.msra.mxu0 %v7304_v61  ;;  %v4841_v61 = vld [vmem:[%s5446_s2 + $0x250] ss:$24 sps:$4 sm:$0xff]  }
 0xa06   : > { %3297 = vmatprep.subr.bf16.mxu0 %v7308_v46  ;;  %v4842_v46 = vld [vmem:[%s5446_s2 + $0x284] ss:$24 sps:$4 sm:$0xff]  }
 0xa09   : > { %3298 = vmatpush1.bf16.msra.mxu0 %v7314_v63  ;;  %v4843_v63 = vld [vmem:[%s5446_s2 + $0x280] ss:$24 sps:$4 sm:$0xff]  }
 0xa0a   : > { %3299 = vmatprep.subr.bf16.mxu0 %v7318_v56  ;;  %v4844_v56 = vld [vmem:[%s5446_s2 + $0x2b4] ss:$24 sps:$4 sm:$0xff]  }
 0xa0d   : > { %3300 = vmatpush1.bf16.msra.mxu0 %v7324_v28  ;;  %v4845_v28 = vld [vmem:[%s5446_s2 + $0x2b0] ss:$24 sps:$4 sm:$0xff]  }
 0xa0e   : > { %3301 = vmatprep.subr.bf16.mxu0 %v7328_v16  ;;  %v4846_v16 = vld [vmem:[%s5446_s2 + $0x2e4] ss:$24 sps:$4 sm:$0xff]  }
 0xa11   : > { %3302 = vmatpush1.bf16.msra.mxu0 %v7334_v55  ;;  %v4847_v55 = vld [vmem:[%s5446_s2 + $0x2e0] ss:$24 sps:$4 sm:$0xff]  }
 0xa12   : > { %3303 = vmatprep.subr.bf16.mxu0 %v7338_v0 }
 0xa15   : > { %3304 = vmatpush1.bf16.msra.mxu0 %v7344_v4 }
 0xa16   : > { %3305 = vmatprep.subr.bf16.mxu0 %v7348_v6 }
 0xa19   : > { %3306 = vmatpush1.bf16.msra.mxu0 %v7354_v49 }
 0xa1a   : > { %3307 = vmatprep.subr.bf16.mxu0 %v7358_v29 }
 0xa1d   : > { %3308 = vmatpush1.bf16.msra.mxu0 %v7364_v34 }
 0xa1e   : > { %3309 = vmatprep.subr.bf16.mxu0 %v7368_v39 }
 0xa21   : > { %3310 = vmatpush1.bf16.msra.mxu0 %v7374_v43 }
 0xa22   : > { %3311 = vmatprep.subr.bf16.mxu0 %v4836_v12  ;;  %v8197_v12 = vld [vmem:[#allocation89_spill] sm:$0xff] }
 0xa25   : > { %3312 = vmatpush1.bf16.msra.mxu0 %v4837_v13 }
 0xa26   : > { %3313 = vmatprep.subr.bf16.mxu0 %v4838_v44 }
 0xa29   : > { %3314 = vmatpush1.bf16.msra.mxu0 %v4839_v59 }
 0xa2a   : > { %3315 = vmatprep.subr.bf16.mxu0 %v4840_v45 }
 0xa2d   : > { %3316 = vmatpush1.bf16.msra.mxu0 %v4841_v61 }
 0xa2e   : > { %3317 = vmatprep.subr.bf16.mxu0 %v4842_v46 }
 0xa31   : > { %3318 = vmatpush1.bf16.msra.mxu0 %v4843_v63 }
 0xa32   : > { %3319 = vmatprep.subr.bf16.mxu0 %v4844_v56  ;;  %v4848_v56 = vld [vmem:[#allocation11 + $0x40] sm:$0xff] (!%p4022_p7)  }
 0xa33   : > { %4090 = vmatprep.subr.bf16.mxu1 (!%p4022_p7), %v4848_v56 }
 0xa35   : > { %3320 = vmatpush1.bf16.msra.mxu0 %v4845_v28  ;;  %v4849_v28 = vld [vmem:[#allocation11] sm:$0xff] (!%p4022_p7)  }
 0xa36   : > { %3321 = vmatprep.subr.bf16.mxu0 %v4846_v16  ;;  %v4850_v16 = vld [vmem:[#allocation11 + $0x48] sm:$0xff] (!%p4022_p7)   ;;  %4098 = vmatpush3.bf16.msra.mxu1 (!%p4022_p7), %v4849_v28 }
 0xa37   : > { %4091 = vmatprep.subr.bf16.mxu1 (!%p4022_p7), %v4850_v16 }
 0xa39   : > { %3322 = vmatpush1.bf16.msra.mxu0 %v4847_v55  ;;  %v4851_v55 = vld [vmem:[#allocation11 + $0x8] sm:$0xff] (!%p4022_p7)  }
 0xa3a   : > { %4050 = vmatprep.subr.bf16.mxu0 (!%p4022_p7), %v4848_v56  ;;  %4099 = vmatpush3.bf16.msra.mxu1 (!%p4022_p7), %v4851_v55 }
 0xa3c   : > { %3324 = vmatmul.mubr.bf16.vlgmr.msra.gmra.mrb[76].mxu0 %v7449_v10 }
 0xa3d   : > { %4051 = vmatpush3.bf16.msra.mxu0 (!%p4022_p7), %v4849_v28 }
 0xa3e   : > { %4052 = vmatprep.subr.bf16.mxu0 (!%p4022_p7), %v4850_v16 }
 0xa41   : > { %4053 = vmatpush3.bf16.msra.mxu0 (!%p4022_p7), %v4851_v55 }
 0xacf   : > { %v3243_v0 = vpop.f32.mrb[72].mxu0  ;;  %v3284_v4 = vpop.f32.mrb[60].mxu1 }
 0xad0   : > { %v3244_v6 = vadd.f32 %v3243_v0, %v8178_v17  ;;  %v3245_v49 = vpop.f32.mrb[73].mxu0  ;;  %v3286_v29 = vpop.f32.mrb[61].mxu1  ;;  %v4852_v0 = vld [vmem:[#allocation11 + $0x50] sm:$0xff] (!%p4022_p7)  }
 0xad1   : > { %v3246_v34 = vadd.f32 %v3245_v49, %v7947_v18  ;;  %v3287_v39 = vadd.f32 %v3286_v29, %v8179_v22  ;;  %v3247_v43 = vpop.f32.mrb[74].mxu0  ;;  %v3288_v30 = vpop.f32.mrb[62].mxu1  ;;  %v3285_v22 = vadd.f32 %v3284_v4, %v7952_v51  ;;  %4054 = vmatprep.subr.bf16.mxu0 (!%p4022_p7), %v4852_v0  ;;  %4092 = vmatprep.subr.bf16.mxu1 (!%p4022_p7), %v4852_v0  ;;  %v4854_v4 = vld [vmem:[#allocation11 + $0x58] sm:$0xff] (!%p4022_p7)   ;;  %v4856_v49 = vld [vmem:[#allocation11 + $0x60] sm:$0xff] (!%p4022_p7)  }
 0xad2   : > { %v3338_v15 = vadd.f32 %v3244_v6, %v8192_v40  ;;  %v3248_v3 = vpop.f32.mrb[75].mxu0  ;;  %v3289_v41 = vpop.f32.mrb[63].mxu1  ;;  %v4855_v6 = vld [vmem:[#allocation11 + $0x18] sm:$0xff] (!%p4022_p7)   ;;  %v4857_v29 = vld [vmem:[#allocation11 + $0x20] sm:$0xff] (!%p4022_p7)   ;;  %v3394_v43 = vld [vmem:[#allocation2 + $0x28] sm:$0xff] (!%p4022_p7) }
 0xad3   : > { %v3339_v25 = vadd.f32 %v3246_v34, %v8193_v26  ;;  %v3358_v11 = vadd.f32 %v3287_v39, %v8194_v33  ;;  %v4858_v34 = vld [vmem:[#allocation11 + $0x68] sm:$0xff] (!%p4022_p7)   ;;  %3580 = vmatprep.mubr.bf16.mxu1 (!%p4022_p7), %v3394_v43  ;;  %v4860_v40 = vld [vmem:[#allocation11 + $0x70] sm:$0xff] (!%p4022_p7)   ;;  %v4862_v3 = vld [vmem:[#allocation11 + $0x78] sm:$0xff] (!%p4022_p7)  }
 0xad4   : > { %v4018_v35 = vmul.f32 -1.442695, %v3338_v15  ;;  %v4859_v30 = vld [vmem:[#allocation11 + $0x28] sm:$0xff] (!%p4022_p7)   ;;  %v4861_v15 = vld [vmem:[#allocation11 + $0x30] sm:$0xff] (!%p4022_p7)   ;;  %v4863_v41 = vld [vmem:[#allocation11 + $0x38] sm:$0xff] (!%p4022_p7)  }
 0xad5   : > { %v4019_v27 = vmul.f32 -1.442695, %v3339_v25  ;;  %v4020_v5 = vmul.f32 -1.442695, %v3358_v11  ;;  %v3389_v26 = vld [vmem:[#allocation2] sm:$0xff] (!%p4022_p7)  ;;  %v3392_v33 = vld [vmem:[#allocation2 + $0x18] sm:$0xff] (!%p4022_p7) }
 0xad6   : > { %4636 = vpow2.f32 %v4018_v35  ;;  %v3393_v25 = vld [vmem:[#allocation2 + $0x20] sm:$0xff] (!%p4022_p7)  ;;  %v3396_v11 = vld [vmem:[#allocation2 + $0x38] sm:$0xff] (!%p4022_p7)  ;;  %v3391_v35 = vld [vmem:[#allocation2 + $0x10] sm:$0xff] (!%p4022_p7) }
 0xad7   : > { %4638 = vpow2.f32 %v4019_v27 }
 0xae0   : > { %v4637_v17 = vpop.eup %4636 }
 0xae1   : > { %v3346_v62 = vadd.f32 1.0, %v4637_v17  ;;  %v4639_v18 = vpop.eup %4638 }
 0xae2   : > { %v3347_v32 = vadd.f32 1.0, %v4639_v18  ;;  %v4023_v18 = vld [vmem:[#allocation12] ss:$0 sm:$0xff] (!%p4022_p7) }
 0xae3   : > { %4640 = vrcp.f32 %v3346_v62 }
 0xaed   : > { %v4641_v48 = vpop.eup %4640 }
 0xaee   : > { %v3352_v10 = vmul.f32 %v4641_v48, %v3285_v22 }
 0xaf0   : > { %v3353_v7 = vadd.f32 %v3352_v10, %v8195_v52 }
 0xaf2   : > { %4642 = vtanh.f32 %v3353_v7 }
 0xaf3   : > { %4644 = vrcp.f32 %v3347_v32 }
 0xaf4   : > { %4646 = vpow2.f32 %v4020_v5 }
 0xafc   : > { %v4643_v42 = vpop.eup %4642 }
 0xafd   : > { %v3355_v31 = vsub.f32 %v7445_v47, %v4643_v42  ;;  %v4645_v60 = vpop.eup %4644 }
 0xafe   : > { %v4647_v21 = vpop.eup %4646 }
 0xaff   : > { %v3356_v50 = vmul.f32 %v4645_v60, %v3355_v31  ;;  %v3366_v57 = vadd.f32 1.0, %v4647_v21 }
 0xb01   : > { %v3357_v38 = vadd.f32 %v4643_v42, %v3356_v50  ;;  %4648 = vrcp.f32 %v3366_v57 }
 0xb03   : > { %v3378_v54 = vpack.c.bf16 %v3357_v38, %v3357_v38 }
 0xb05   : > { %v3380_v24 = vrot.slane %v3378_v54, 4 }
 0xb07   : > { %3382 = vst [vmem:[#allocation2 + $0x30] sm:$0xf0] %v3380_v24 }
 0xb0b   : > { %v4649_v1 = vpop.eup %4648 }
 0xb0e   : > { %v3395_v27 = vld [vmem:[#allocation2 + $0x30] sm:$0xff] (!%p4022_p7) }
 0xb0f   : > { %v3325_v51 = vpop.f32.mrb[76].mxu0 }
 0xb10   : > { %v3326_v9 = vadd.f32 %v3325_v51, %v7954_v2  ;;  %v3327_v14 = vpop.f32.mrb[77].mxu0 }
 0xb11   : > { %v3328_v19 = vadd.f32 %v3327_v14, %v6299_v37  ;;  %v3329_v20 = vpop.f32.mrb[78].mxu0 }
 0xb12   : > { %v3359_v53 = vadd.f32 %v3326_v9, %v8196_v23  ;;  %v3330_v47 = vpop.f32.mrb[79].mxu0 }
 0xb13   : > { %v3372_v36 = vmul.f32 %v4649_v1, %v3328_v19 }
 0xb14   : > { %v4021_v58 = vmul.f32 -1.442695, %v3359_v53 }
 0xb15   : > { %v3373_v13 = vadd.f32 %v3372_v36, %v8197_v12 }
 0xb16   : > { %4650 = vpow2.f32 %v4021_v58 }
 0xb17   : > { %4652 = vtanh.f32 %v3373_v13 }
 0xb20   : > { %v4651_v44 = vpop.eup %4650 }
 0xb21   : > { %v3367_v59 = vadd.f32 1.0, %v4651_v44  ;;  %v4653_v45 = vpop.eup %4652 }
 0xb22   : > { %v3375_v2 = vsub.f32 %v7457_v8, %v4653_v45  ;;  %v4853_v8 = vld [vmem:[#allocation11 + $0x10] sm:$0xff] (!%p4022_p7)  }
 0xb23   : > { %4654 = vrcp.f32 %v3367_v59  ;;  %4055 = vmatpush3.bf16.msra.mxu0 (!%p4022_p7), %v4853_v8  ;;  %4100 = vmatpush3.bf16.msra.mxu1 (!%p4022_p7), %v4853_v8 }
 0xb24   : > { %4056 = vmatprep.subr.bf16.mxu0 (!%p4022_p7), %v4854_v4  ;;  %4093 = vmatprep.subr.bf16.mxu1 (!%p4022_p7), %v4854_v4 }
 0xb27   : > { %4057 = vmatpush3.bf16.msra.mxu0 (!%p4022_p7), %v4855_v6  ;;  %4101 = vmatpush3.bf16.msra.mxu1 (!%p4022_p7), %v4855_v6 }
 0xb28   : > { %4058 = vmatprep.subr.bf16.mxu0 (!%p4022_p7), %v4856_v49  ;;  %4094 = vmatprep.subr.bf16.mxu1 (!%p4022_p7), %v4856_v49 }
 0xb2b   : > { %4059 = vmatpush3.bf16.msra.mxu0 (!%p4022_p7), %v4857_v29  ;;  %4102 = vmatpush3.bf16.msra.mxu1 (!%p4022_p7), %v4857_v29 }
 0xb2c   : > { %4060 = vmatprep.subr.bf16.mxu0 (!%p4022_p7), %v4858_v34  ;;  %4095 = vmatprep.subr.bf16.mxu1 (!%p4022_p7), %v4858_v34 }
 0xb2d   : > { %v4655_v61 = vpop.eup %4654 }
 0xb2e   : > { %v3376_v46 = vmul.f32 %v4655_v61, %v3375_v2  ;;  %3388 = sbr.rel (%p4022_p7) target bundleno = 3132 (0xc3c), region = 80 }
 0xb2f   : > { %4061 = vmatpush3.bf16.msra.mxu0 (!%p4022_p7), %v4859_v30  ;;  %4103 = vmatpush3.bf16.msra.mxu1 (!%p4022_p7), %v4859_v30 }
 0xb30   : > { %v3377_v37 = vadd.f32 %v4653_v45, %v3376_v46  ;;  %4062 = vmatprep.subr.bf16.mxu0 (!%p4022_p7), %v4860_v40  ;;  %4096 = vmatprep.subr.bf16.mxu1 (!%p4022_p7), %v4860_v40 }
 0xb32   : > { %v3383_v63 = vpack.c.bf16 %v3377_v37, %v3377_v37 }
 0xb33   : > { %4063 = vmatpush3.bf16.msra.mxu0 (!%p4022_p7), %v4861_v15  ;;  %4104 = vmatpush3.bf16.msra.mxu1 (!%p4022_p7), %v4861_v15 }
 0xb34   : > { %3384 = vst [vmem:[#allocation2 + $0x8] sm:$0xf] %v3383_v63  ;;  %4064 = vmatprep.subr.bf16.mxu0 (!%p4022_p7), %v4862_v3  ;;  %4097 = vmatprep.subr.bf16.mxu1 (!%p4022_p7), %v4862_v3 }
 0xb37   : > { %4065 = vmatpush3.bf16.msra.mxu0 %v4863_v41  ;;  %4105 = vmatpush3.bf16.msra.mxu1 %v4863_v41 }
 0xb3a   : > { %3581 = vmatmul.mubr.bf16.vlgmr.msra.gmra.mrb[0].mxu1 %v3393_v25 }
 0xb3b   : > { %v3390_v39 = vld [vmem:[#allocation2 + $0x8] sm:$0xff]  ;;  %3588 = vmatprep.mubr.bf16.mxu1 %v3396_v11 }
 0xb3c   : > { %3564 = vmatprep.mubr.bf16.mxu0 %v3390_v39 }
 0xb3d   : > { %3565 = vmatmul.mubr.bf16.vlgmr.msra.gmra.mrb[0].mxu0 %v3389_v26 }
 0xb3e   : > { %3572 = vmatprep.mubr.bf16.mxu0 %v3392_v33 }
 0xb42   : > { %3589 = vmatmul.mubr.bf16.gmra.mrb[4].mxu1 %v3395_v27 }
 0xb45   : > { %3573 = vmatmul.mubr.bf16.gmra.mrb[4].mxu0 %v3391_v35 }
 0xc0d   : > { %v4078_v62 = vpop.f32.mrb[0].mxu1 }
 0xc0e   : > { %v4079_v48 = vpop.f32.mrb[1].mxu1 }
 0xc0f   : > { %v4080_v52 = vadd.f32 %v4079_v48, %v4078_v62  ;;  %v4081_v32 = vpop.f32.mrb[2].mxu1 }
 0xc10   : > { %v4066_v17 = vpop.f32.mrb[0].mxu0  ;;  %v4082_v42 = vpop.f32.mrb[3].mxu1 }
 0xc11   : > { %v4067_v22 = vpop.f32.mrb[1].mxu0  ;;  %v3583_v60 = vadd.f32 %v4080_v52, %v4023_v18  ;;  %v4083_v21 = vadd.f32 %v4082_v42, %v4081_v32 }
 0xc12   : > { %v4068_v10 = vadd.f32 %v4067_v22, %v4066_v17  ;;  %v4069_v7 = vpop.f32.mrb[2].mxu0 }
 0xc13   : > { %v4070_v5 = vpop.f32.mrb[3].mxu0  ;;  %v4044_v54 = vmul.f32 -1.442695, %v3583_v60  ;;  %v3586_v24 = vadd.f32 %v4083_v21, %v4023_v18 }
 0xc14   : > { %v3567_v31 = vadd.f32 %v4068_v10, %v4023_v18  ;;  %v4071_v50 = vadd.f32 %v4070_v5, %v4069_v7 }
 0xc15   : > { %v4045_v9 = vmul.f32 -1.442695, %v3586_v24  ;;  %v4084_v19 = vpop.f32.mrb[4].mxu1 }
 0xc16   : > { %v4040_v38 = vmul.f32 -1.442695, %v3567_v31  ;;  %v3570_v57 = vadd.f32 %v4071_v50, %v4023_v18  ;;  %v4085_v1 = vpop.f32.mrb[5].mxu1 }
 0xc17   : > { %v4086_v53 = vadd.f32 %v4085_v1, %v4084_v19  ;;  %v4087_v36 = vpop.f32.mrb[6].mxu1 }
 0xc18   : > { %4864 = vpow2.f32 %v4040_v38  ;;  %v4041_v51 = vmul.f32 -1.442695, %v3570_v57  ;;  %v4072_v14 = vpop.f32.mrb[4].mxu0  ;;  %v4088_v12 = vpop.f32.mrb[7].mxu1 }
 0xc19   : > { %4866 = vpow2.f32 %v4044_v54  ;;  %v4073_v20 = vpop.f32.mrb[5].mxu0  ;;  %v3591_v44 = vadd.f32 %v4086_v53, %v4023_v18  ;;  %v4089_v45 = vadd.f32 %v4088_v12, %v4087_v36 }
 0xc1a   : > { %4868 = vpow2.f32 %v4041_v51  ;;  %v4074_v23 = vadd.f32 %v4073_v20, %v4072_v14  ;;  %v4075_v47 = vpop.f32.mrb[6].mxu0 }
 0xc1b   : > { %4870 = vpow2.f32 %v4045_v9  ;;  %v4076_v58 = vpop.f32.mrb[7].mxu0  ;;  %v4046_v61 = vmul.f32 -1.442695, %v3591_v44  ;;  %v3594_v37 = vadd.f32 %v4089_v45, %v4023_v18 }
 0xc1c   : > { %v3575_v13 = vadd.f32 %v4074_v23, %v4023_v18  ;;  %v4077_v59 = vadd.f32 %v4076_v58, %v4075_v47 }
 0xc1d   : > { %v4047_v56 = vmul.f32 -1.442695, %v3594_v37 }
 0xc1e   : > { %v4042_v2 = vmul.f32 -1.442695, %v3575_v13  ;;  %v3578_v46 = vadd.f32 %v4077_v59, %v4023_v18 }
 0xc20   : > { %4872 = vpow2.f32 %v4042_v2  ;;  %v4043_v63 = vmul.f32 -1.442695, %v3578_v46 }
 0xc21   : > { %4874 = vpow2.f32 %v4046_v61 }
 0xc22   : > { %v4865_v28 = vpop.eup %4864  ;;  %4876 = vpow2.f32 %v4043_v63 }
 0xc23   : > { %v4867_v16 = vpop.eup %4866  ;;  %v3621_v55 = vadd.f32 1.0, %v4865_v28  ;;  %4878 = vpow2.f32 %v4047_v56 }
 0xc24   : > { %v4869_v0 = vpop.eup %4868  ;;  %v3625_v8 = vadd.f32 1.0, %v4867_v16 }
 0xc25   : > { %v4871_v4 = vpop.eup %4870  ;;  %4880 = vrcp.f32 %v3621_v55  ;;  %v3622_v6 = vadd.f32 1.0, %v4869_v0 }
 0xc26   : > { %4882 = vrcp.f32 %v3625_v8  ;;  %v3626_v49 = vadd.f32 1.0, %v4871_v4 }
 0xc27   : > { %4884 = vrcp.f32 %v3622_v6 }
 0xc28   : > { %4886 = vrcp.f32 %v3626_v49 }
 0xc2a   : > { %v4873_v29 = vpop.eup %4872 }
 0xc2b   : > { %v4875_v34 = vpop.eup %4874  ;;  %v3623_v39 = vadd.f32 1.0, %v4873_v29 }
 0xc2c   : > { %v4877_v43 = vpop.eup %4876  ;;  %v3627_v30 = vadd.f32 1.0, %v4875_v34 }
 0xc2d   : > { %v4879_v40 = vpop.eup %4878  ;;  %4888 = vrcp.f32 %v3623_v39  ;;  %v3624_v15 = vadd.f32 1.0, %v4877_v43 }
 0xc2e   : > { %4890 = vrcp.f32 %v3627_v30  ;;  %v3628_v3 = vadd.f32 1.0, %v4879_v40 }
 0xc2f   : > { %v4881_v41 = vpop.eup %4880  ;;  %4892 = vrcp.f32 %v3624_v15 }
 0xc30   : > { %v4883_v26 = vpop.eup %4882  ;;  %3645 = vst [vmem:[%s7554_s7] sm:$0xff] %v4881_v41  ;;  %4894 = vrcp.f32 %v3628_v3 }
 0xc31   : > { %v4885_v25 = vpop.eup %4884  ;;  %3649 = vst [vmem:[%s7554_s7 + $0x20] sm:$0xff] %v4883_v26 }
 0xc32   : > { %v4887_v33 = vpop.eup %4886  ;;  %3646 = vst [vmem:[%s7554_s7 + $0x8] sm:$0xff] %v4885_v25 }
 0xc33   : > { %3650 = vst [vmem:[%s7554_s7 + $0x28] sm:$0xff] %v4887_v33 }
 0xc37   : > { %v4889_v11 = vpop.eup %4888 }
 0xc38   : > { %v4891_v35 = vpop.eup %4890  ;;  %3647 = vst [vmem:[%s7554_s7 + $0x10] sm:$0xff] %v4889_v11 }
 0xc39   : > { %v4893_v27 = vpop.eup %4892  ;;  %3651 = vst [vmem:[%s7554_s7 + $0x30] sm:$0xff] %v4891_v35 }
 0xc3a   : > { %v4895_v17 = vpop.eup %4894  ;;  %3648 = vst [vmem:[%s7554_s7 + $0x18] sm:$0xff] %v4893_v27 }
 0xc3b   : > { %3652 = vst [vmem:[%s7554_s7 + $0x38] sm:$0xff] %v4895_v17 }
 0xc3c PF: > { %p24_p11 = scmp.ge.s32.totalorder %s5197_s29, 5   ;;  %s8198_s24 = smov %s5114_s25 }
 0xc3d   : > { %s8199_s25 = smov %s5118_s26  ;;  %s8200_s26 = smov %s5207_s9 }
 0xc3e   : > { %s8201_s27 = smov %s5197_s29  ;;  %26 = sbr.rel (!%p24_p11) target bundleno = 11 (0xb), region = 137 }
 0xc45   :  { %3664 = vsyncpa [#allocation5], 1 }
 0xc46   :  { %3666 = vsyncpa [#allocation5 + $0x1], 1 }
 0xc47   :  { %3667 = vsyncpa [#allocation7], 1 }
 0xc48   :  { %3669 = vsyncpa [#allocation7 + $0x1], 1 }
 0xc49   :  { %3670 = vsyncpa [#allocation10], 1 }
 0xc4a   :  { %3672 = vsyncpa [#allocation10 + $0x1], 1 }
 0xc4b   :  { %3673 = vsyncpa [#allocation13], 1 }

</bundles_post_ra>
